<compile_context>
chip_gen: v6e
topology: v6e:2x2x1
jax: 0.10.0
libtpu: 0.0.40
codegen_flags: <defaults>
</compile_context>

<pallas_src>
import functools
import math

import jax
import jax.numpy as jnp
from jax.experimental import pallas as pl
from jax.experimental.pallas import tpu as pltpu

RND_CONST = 0.0  # RND_const in the reference

FC_K = 64 * 7 * 7      # 3136 flatten features
FC_K_PAD = 3200        # 25 * 128 (padded so K-tiles are 128-multiples)
FC_KT = 640            # 5 * 128, K-tile for the f1 reduction grid
FC_N = 256


def _round_up(x, m):
    return ((x + m - 1) // m) * m


# ---------------------------------------------------------------------------
# Pallas kernel: fused matmul + bias (+ optional ReLU), bf16 in / f32 acc
# ---------------------------------------------------------------------------
def _matmul_bias_kernel(x_ref, w_ref, b_ref, o_ref, *, relu):
    acc = jnp.dot(x_ref[...], w_ref[...], preferred_element_type=jnp.float32)
    acc = acc + b_ref[...]            # b_ref is (1, N) f32, broadcasts over rows
    if relu:
        acc = jnp.maximum(acc, 0.0)
    o_ref[...] = acc.astype(o_ref.dtype)


def conv_matmul(patches, w, b, *, relu, num_m_blocks=2):
    """y = relu?(patches @ w + b).  patches:(M,K) bf16, w:(K,N) bf16, b:(1,N) f32.

    M is padded to num_m_blocks * (multiple of 8) and tiled over a leading
    'parallel' grid axis (uses both TensorCores on v7x).
    """
    m, k = patches.shape
    k2, n = w.shape
    assert k == k2, (k, k2)
    mt = _round_up(pl.cdiv(m, num_m_blocks), 8)
    m_pad = mt * num_m_blocks
    if m_pad != m:
        patches = jnp.pad(patches, ((0, m_pad - m), (0, 0)))
    out = pl.pallas_call(
        functools.partial(_matmul_bias_kernel, relu=relu),
        out_shape=jax.ShapeDtypeStruct((m_pad, n), jnp.bfloat16),
        grid=(num_m_blocks,),
        in_specs=[
            pl.BlockSpec((mt, k), lambda i: (i, 0)),
            pl.BlockSpec((k, n), lambda i: (0, 0)),
            pl.BlockSpec((1, n), lambda i: (0, 0)),
        ],
        out_specs=pl.BlockSpec((mt, n), lambda i: (i, 0)),
        compiler_params=pltpu.CompilerParams(
            dimension_semantics=("parallel",)),
    )(patches, w, b)
    return out[:m]


# ---------------------------------------------------------------------------
# Pallas kernel: fused FC head (f1 K-gridded reduction + f2 [+ f3] in VMEM)
# ---------------------------------------------------------------------------
def _fc_head_kernel(*refs, num_tail):
    # refs = (h, w1, b1, [w_i, b_i] * num_tail, out, acc_scratch)
    h_ref, w1_ref, b1_ref = refs[:3]
    tail = refs[3:3 + 2 * num_tail]
    o_ref, acc_ref = refs[3 + 2 * num_tail:]

    k = pl.program_id(0)

    @pl.when(k == 0)
    def _():
        acc_ref[...] = jnp.zeros_like(acc_ref)

    acc_ref[...] += jnp.dot(h_ref[...], w1_ref[...],
                            preferred_element_type=jnp.float32)

    @pl.when(k == pl.num_programs(0) - 1)
    def _():
        y = jnp.maximum(acc_ref[...] + b1_ref[...], 0.0)     # ReLU after f1
        for idx in range(num_tail):
            w_ref = tail[2 * idx]
            b_ref = tail[2 * idx + 1]
            y = jnp.dot(y.astype(jnp.bfloat16), w_ref[...],
                        preferred_element_type=jnp.float32) + b_ref[...]
            if idx < num_tail - 1:                           # ReLU between tails
                y = jnp.maximum(y, 0.0)
        o_ref[...] = y.astype(o_ref.dtype)


def fc_head(h, layers):
    """Fused FC head.  h:(B, FC_K) bf16; layers = [(w1,b1), (w2,b2), (w3,b3)?]
    with weights already in (K, N) bf16 layout (f1 K padded to FC_K_PAD)."""
    m = h.shape[0]
    h = jnp.pad(h, ((0, 0), (0, FC_K_PAD - FC_K)))
    num_tail = len(layers) - 1
    w1, b1 = layers[0]
    in_arrays = [h, w1, b1]
    in_specs = [
        pl.BlockSpec((m, FC_KT), lambda k: (0, k)),
        pl.BlockSpec((FC_KT, FC_N), lambda k: (k, 0)),
        pl.BlockSpec((1, FC_N), lambda k: (0, 0)),
    ]
    for w, b in layers[1:]:
        in_arrays += [w, b]
        in_specs += [
            pl.BlockSpec((FC_N, FC_N), lambda k: (0, 0)),
            pl.BlockSpec((1, FC_N), lambda k: (0, 0)),
        ]
    return pl.pallas_call(
        functools.partial(_fc_head_kernel, num_tail=num_tail),
        out_shape=jax.ShapeDtypeStruct((m, FC_N), jnp.float32),
        grid=(FC_K_PAD // FC_KT,),
        in_specs=in_specs,
        out_specs=pl.BlockSpec((m, FC_N), lambda k: (0, 0)),
        scratch_shapes=[pltpu.VMEM((m, FC_N), jnp.float32)],
        compiler_params=pltpu.CompilerParams(
            dimension_semantics=("arbitrary",)),
    )(*in_arrays)


# ---------------------------------------------------------------------------
# Conv2d (valid padding, stride) = NHWC im2col (glue) + Pallas matmul kernel
# ---------------------------------------------------------------------------
# TODO(synk): fold im2col patch construction into the conv kernel (build the
# kh*kw shifted views on the VMEM-resident tile) to remove HBM amplification.
def _im2col_nhwc(x, kh, kw, stride):
    """x: (B, H, W, C) -> patches (B*oh*ow, kh*kw*C) in (kh, kw, C) order."""
    b, h, w, c = x.shape
    oh = (h - kh) // stride + 1
    ow = (w - kw) // stride + 1
    cols = []
    for i in range(kh):
        for j in range(kw):
            cols.append(x[:, i:i + (oh - 1) * stride + 1:stride,
                             j:j + (ow - 1) * stride + 1:stride, :])  # (B,oh,ow,C)
    p = jnp.stack(cols, axis=3)                     # (B, oh, ow, kh*kw, C)
    return p.reshape(b * oh * ow, kh * kw * c), oh, ow


def conv2d_nhwc(x, w_mat, b, *, ksize, stride, relu=True):
    """x: NHWC bf16, w_mat: (kh*kw*inC, outC) bf16, b: (1, outC) f32 -> NHWC bf16."""
    bsz = x.shape[0]
    patches, oh, ow = _im2col_nhwc(x, ksize, ksize, stride)
    y = conv_matmul(patches, w_mat, b, relu=relu)   # (B*oh*ow, outC)
    return y.reshape(bsz, oh, ow, -1)               # contiguous, no relayout


# ---------------------------------------------------------------------------
# Parameter initialization (PyTorch layouts) + one-time kernel-layout prep
# ---------------------------------------------------------------------------
def _init_raw_net(key, c_in, extra_fc):
    ks = jax.random.split(key, 8)
    ortho = jax.nn.initializers.orthogonal(scale=math.sqrt(2.0))

    def conv_init(k, shape):   # PyTorch default-ish kaiming-uniform bound
        fan_in = shape[1] * shape[2] * shape[3]
        bound = 1.0 / math.sqrt(fan_in)
        return jax.random.uniform(k, shape, jnp.float32, -bound, bound)

    p = {
        "c1w": conv_init(ks[0], (64, c_in, 8, 8)),
        "c1b": jnp.zeros((64,), jnp.float32),
        "c2w": conv_init(ks[1], (64, 64, 4, 4)),
        "c2b": jnp.zeros((64,), jnp.float32),
        "c3w": conv_init(ks[2], (64, 64, 3, 3)),
        "c3b": jnp.zeros((64,), jnp.float32),
        # Linear layers: orthogonal(sqrt(2)) init, zero bias (as in __init__).
        "f1w": ortho(ks[3], (FC_N, FC_K), jnp.float32),
        "f1b": jnp.zeros((FC_N,), jnp.float32),
        "f2w": ortho(ks[4], (FC_N, FC_N), jnp.float32),
        "f2b": jnp.zeros((FC_N,), jnp.float32),
    }
    if extra_fc:
        p["f3w"] = ortho(ks[5], (FC_N, FC_N), jnp.float32)
        p["f3b"] = jnp.zeros((FC_N,), jnp.float32)
    return p


def _prepare_net(raw, extra_fc):
    """One-time conversion into the layouts the Pallas kernels consume."""
    prep = {}
    for name in ("c1", "c2", "c3"):
        w = raw[name + "w"]                                   # (outC,inC,kh,kw)
        out_c, in_c, kh, kw = w.shape
        prep[name + "w"] = (w.transpose(2, 3, 1, 0)           # (kh,kw,inC,outC)
                              .reshape(kh * kw * in_c, out_c)
                              .astype(jnp.bfloat16))
        prep[name + "b"] = raw[name + "b"].reshape(1, out_c).astype(jnp.float32)
    # f1: reorder the input axis from PyTorch (C,H,W) flatten to NHWC (H,W,C)
    # flatten, transpose to (K, N), pad K to FC_K_PAD.
    f1 = (raw["f1w"].reshape(FC_N, 64, 7, 7)
                    .transpose(2, 3, 1, 0)                    # (7,7,64,256)
                    .reshape(FC_K, FC_N))
    f1 = jnp.pad(f1, ((0, FC_K_PAD - FC_K), (0, 0)))
    prep["f1w"] = f1.astype(jnp.bfloat16)
    prep["f1b"] = raw["f1b"].reshape(1, FC_N).astype(jnp.float32)
    prep["f2w"] = raw["f2w"].T.astype(jnp.bfloat16)
    prep["f2b"] = raw["f2b"].reshape(1, FC_N).astype(jnp.float32)
    if extra_fc:
        prep["f3w"] = raw["f3w"].T.astype(jnp.bfloat16)
        prep["f3b"] = raw["f3b"].reshape(1, FC_N).astype(jnp.float32)
    return prep


def init_rnd_params(key, num_inputs):
    kt, kp = jax.random.split(key)
    c_in = num_inputs * 2
    return {
        "target": _prepare_net(_init_raw_net(kt, c_in, False), False),
        "predictor": _prepare_net(_init_raw_net(kp, c_in, True), True),
    }


# ---------------------------------------------------------------------------
# Forward passes
# ---------------------------------------------------------------------------
def _trunk(p, x_nhwc):
    h = conv2d_nhwc(x_nhwc, p["c1w"], p["c1b"], ksize=8, stride=4)
    h = conv2d_nhwc(h, p["c2w"], p["c2b"], ksize=4, stride=2)
    h = conv2d_nhwc(h, p["c3w"], p["c3b"], ksize=3, stride=1)
    return h.reshape(h.shape[0], -1)   # (B, 3136), NHWC order (matches f1w prep)


def target_forward(p, x_nhwc):
    h = _trunk(p, x_nhwc)
    return fc_head(h, [(p["f1w"], p["f1b"]), (p["f2w"], p["f2b"])])


def predictor_forward(p, x_nhwc):
    h = _trunk(p, x_nhwc)
    return fc_head(h, [(p["f1w"], p["f1b"]), (p["f2w"], p["f2b"]),
                       (p["f3w"], p["f3b"])])


def rnd_forward(params, obs, next_obs):
    """Matches RND.forward: (predict_feature*RND_const, target_feature*RND_const)."""
    tobs = jnp.concatenate([obs, next_obs], axis=1)            # NCHW (B,2*ni,H,W)
    x = tobs.transpose(0, 2, 3, 1).astype(jnp.bfloat16)        # single NHWC relayout
    target_feature = target_forward(params["target"], x)
    predict_feature = predictor_forward(params["predictor"], x)
    return predict_feature * RND_CONST, target_feature * RND_CONST


# ---------------------------------------------------------------------------
if __name__ == "__main__":
    num_inputs = 2
    batch = 2
    H = W = 84  # required by the Linear(64*7*7, 256) layer

    key = jax.random.PRNGKey(0)
    k_params, k_obs, k_next = jax.random.split(key, 3)

    params = init_rnd_params(k_params, num_inputs)
    obs = jax.random.normal(k_obs, (batch, num_inputs, H, W), jnp.float32)
    next_obs = jax.random.normal(k_next, (batch, num_inputs, H, W), jnp.float32)

    fwd = jax.jit(rnd_forward)
    predict_feature, target_feature = fwd(params, obs, next_obs)
    jax.block_until_ready((predict_feature, target_feature))

    assert predict_feature.shape == (batch, 256)
    assert target_feature.shape == (batch, 256)
    print("KERNEL_OK")
</pallas_src>

<mosaic_0001>
module attributes {stable_mosaic.version = 11 : i64} {
  func.func @_matmul_bias_kernel(%arg0: i32, %arg1: memref<400x256xbf16, #tpu.memory_space<vmem>>, %arg2: memref<256x64xbf16, #tpu.memory_space<vmem>>, %arg3: memref<1x64xf32, #tpu.memory_space<vmem>>, %arg4: memref<400x64xbf16, #tpu.memory_space<vmem>>) attributes {dimension_semantics = [#tpu.dimension_semantics<parallel>], iteration_bounds = array<i64: 2>, scalar_prefetch = 0 : i64, scratch_operands = 0 : i64, tpu.core_type = #tpu.core_type<tc>, window_params = [{transform_indices = @transform_0, window_bounds = array<i64: 400, 256>}, {pipeline_mode = #tpu.pipeline_mode<synchronous>, transform_indices = @transform_1, window_bounds = array<i64: 256, 64>}, {pipeline_mode = #tpu.pipeline_mode<synchronous>, transform_indices = @transform_2, window_bounds = array<i64: 1, 64>}, {transform_indices = @transform_3, window_bounds = array<i64: 400, 64>}]} {
    %c0 = arith.constant 0 : index
    %c0_0 = arith.constant 0 : index
    %0 = vector.load %arg1[%c0, %c0_0] : memref<400x256xbf16, #tpu.memory_space<vmem>>, vector<400x256xbf16>
    %c0_1 = arith.constant 0 : index
    %c0_2 = arith.constant 0 : index
    %1 = vector.load %arg2[%c0_1, %c0_2] : memref<256x64xbf16, #tpu.memory_space<vmem>>, vector<256x64xbf16>
    %cst = arith.constant dense<0.000000e+00> : vector<400x64xf32>
    %2 = tpu.matmul %0, %1, %cst {dimension_numbers = #tpu.dot_dimension_numbers<[1], [0], [0], [1], [0, 0, 1, 1], [], []>} : vector<400x256xbf16>, vector<256x64xbf16>, vector<400x64xf32> -> vector<400x64xf32>
    %c0_3 = arith.constant 0 : index
    %c0_4 = arith.constant 0 : index
    %3 = vector.load %arg3[%c0_3, %c0_4] : memref<1x64xf32, #tpu.memory_space<vmem>>, vector<1x64xf32>
    %4 = vector.broadcast %3 : vector<1x64xf32> to vector<400x64xf32>
    %5 = arith.addf %2, %4 : vector<400x64xf32>
    %cst_5 = arith.constant 0.000000e+00 : f32
    %6 = vector.broadcast %cst_5 : f32 to vector<400x64xf32>
    %7 = arith.maximumf %5, %6 : vector<400x64xf32>
    %8 = arith.truncf %7 : vector<400x64xf32> to vector<400x64xbf16>
    %c0_6 = arith.constant 0 : index
    %c0_7 = arith.constant 0 : index
    %9 = vector.load %arg4[%c0_6, %c0_7] : memref<400x64xbf16, #tpu.memory_space<vmem>>, vector<400x64xbf16>
    tpu.vector_store %arg4[%c0_6, %c0_7], %8 {strides = array<i32>} : memref<400x64xbf16, #tpu.memory_space<vmem>>, vector<400x64xbf16>,
    return
  }
  func.func @transform_0(%arg0: i32) -> (i32, i32) {
    %c0_i32 = arith.constant 0 : i32
    %c0_i32_0 = arith.constant 0 : i32
    return %arg0, %c0_i32 : i32, i32
  }
  func.func @transform_1(%arg0: i32) -> (i32, i32) {
    %c0_i32 = arith.constant 0 : i32
    %c0_i32_0 = arith.constant 0 : i32
    %c0_i32_1 = arith.constant 0 : i32
    return %c0_i32, %c0_i32_0 : i32, i32
  }
  func.func @transform_2(%arg0: i32) -> (i32, i32) {
    %c0_i32 = arith.constant 0 : i32
    %c0_i32_0 = arith.constant 0 : i32
    %c0_i32_1 = arith.constant 0 : i32
    return %c0_i32, %c0_i32_0 : i32, i32
  }
  func.func @transform_3(%arg0: i32) -> (i32, i32) {
    %c0_i32 = arith.constant 0 : i32
    %c0_i32_0 = arith.constant 0 : i32
    return %arg0, %c0_i32 : i32, i32
  }
}

module attributes {stable_mosaic.version = 11 : i64} {
  func.func @_matmul_bias_kernel(%arg0: i32, %arg1: memref<88x1024xbf16, #tpu.memory_space<vmem>>, %arg2: memref<1024x64xbf16, #tpu.memory_space<vmem>>, %arg3: memref<1x64xf32, #tpu.memory_space<vmem>>, %arg4: memref<88x64xbf16, #tpu.memory_space<vmem>>) attributes {dimension_semantics = [#tpu.dimension_semantics<parallel>], iteration_bounds = array<i64: 2>, scalar_prefetch = 0 : i64, scratch_operands = 0 : i64, tpu.core_type = #tpu.core_type<tc>, window_params = [{transform_indices = @transform_0, window_bounds = array<i64: 88, 1024>}, {pipeline_mode = #tpu.pipeline_mode<synchronous>, transform_indices = @transform_1, window_bounds = array<i64: 1024, 64>}, {pipeline_mode = #tpu.pipeline_mode<synchronous>, transform_indices = @transform_2, window_bounds = array<i64: 1, 64>}, {transform_indices = @transform_3, window_bounds = array<i64: 88, 64>}]} {
    %c0 = arith.constant 0 : index
    %c0_0 = arith.constant 0 : index
    %0 = vector.load %arg1[%c0, %c0_0] : memref<88x1024xbf16, #tpu.memory_space<vmem>>, vector<88x1024xbf16>
    %c0_1 = arith.constant 0 : index
    %c0_2 = arith.constant 0 : index
    %1 = vector.load %arg2[%c0_1, %c0_2] : memref<1024x64xbf16, #tpu.memory_space<vmem>>, vector<1024x64xbf16>
    %cst = arith.constant dense<0.000000e+00> : vector<88x64xf32>
    %2 = tpu.matmul %0, %1, %cst {dimension_numbers = #tpu.dot_dimension_numbers<[1], [0], [0], [1], [0, 0, 1, 1], [], []>} : vector<88x1024xbf16>, vector<1024x64xbf16>, vector<88x64xf32> -> vector<88x64xf32>
    %c0_3 = arith.constant 0 : index
    %c0_4 = arith.constant 0 : index
    %3 = vector.load %arg3[%c0_3, %c0_4] : memref<1x64xf32, #tpu.memory_space<vmem>>, vector<1x64xf32>
    %4 = vector.broadcast %3 : vector<1x64xf32> to vector<88x64xf32>
    %5 = arith.addf %2, %4 : vector<88x64xf32>
    %cst_5 = arith.constant 0.000000e+00 : f32
    %6 = vector.broadcast %cst_5 : f32 to vector<88x64xf32>
    %7 = arith.maximumf %5, %6 : vector<88x64xf32>
    %8 = arith.truncf %7 : vector<88x64xf32> to vector<88x64xbf16>
    %c0_6 = arith.constant 0 : index
    %c0_7 = arith.constant 0 : index
    %9 = vector.load %arg4[%c0_6, %c0_7] : memref<88x64xbf16, #tpu.memory_space<vmem>>, vector<88x64xbf16>
    tpu.vector_store %arg4[%c0_6, %c0_7], %8 {strides = array<i32>} : memref<88x64xbf16, #tpu.memory_space<vmem>>, vector<88x64xbf16>,
    return
  }
  func.func @transform_0(%arg0: i32) -> (i32, i32) {
    %c0_i32 = arith.constant 0 : i32
    %c0_i32_0 = arith.constant 0 : i32
    return %arg0, %c0_i32 : i32, i32
  }
  func.func @transform_1(%arg0: i32) -> (i32, i32) {
    %c0_i32 = arith.constant 0 : i32
    %c0_i32_0 = arith.constant 0 : i32
    %c0_i32_1 = arith.constant 0 : i32
    return %c0_i32, %c0_i32_0 : i32, i32
  }
  func.func @transform_2(%arg0: i32) -> (i32, i32) {
    %c0_i32 = arith.constant 0 : i32
    %c0_i32_0 = arith.constant 0 : i32
    %c0_i32_1 = arith.constant 0 : i32
    return %c0_i32, %c0_i32_0 : i32, i32
  }
  func.func @transform_3(%arg0: i32) -> (i32, i32) {
    %c0_i32 = arith.constant 0 : i32
    %c0_i32_0 = arith.constant 0 : i32
    return %arg0, %c0_i32 : i32, i32
  }
}

module attributes {stable_mosaic.version = 11 : i64} {
  func.func @_matmul_bias_kernel(%arg0: i32, %arg1: memref<56x576xbf16, #tpu.memory_space<vmem>>, %arg2: memref<576x64xbf16, #tpu.memory_space<vmem>>, %arg3: memref<1x64xf32, #tpu.memory_space<vmem>>, %arg4: memref<56x64xbf16, #tpu.memory_space<vmem>>) attributes {dimension_semantics = [#tpu.dimension_semantics<parallel>], iteration_bounds = array<i64: 2>, scalar_prefetch = 0 : i64, scratch_operands = 0 : i64, tpu.core_type = #tpu.core_type<tc>, window_params = [{transform_indices = @transform_0, window_bounds = array<i64: 56, 576>}, {pipeline_mode = #tpu.pipeline_mode<synchronous>, transform_indices = @transform_1, window_bounds = array<i64: 576, 64>}, {pipeline_mode = #tpu.pipeline_mode<synchronous>, transform_indices = @transform_2, window_bounds = array<i64: 1, 64>}, {transform_indices = @transform_3, window_bounds = array<i64: 56, 64>}]} {
    %c0 = arith.constant 0 : index
    %c0_0 = arith.constant 0 : index
    %0 = vector.load %arg1[%c0, %c0_0] : memref<56x576xbf16, #tpu.memory_space<vmem>>, vector<56x576xbf16>
    %c0_1 = arith.constant 0 : index
    %c0_2 = arith.constant 0 : index
    %1 = vector.load %arg2[%c0_1, %c0_2] : memref<576x64xbf16, #tpu.memory_space<vmem>>, vector<576x64xbf16>
    %cst = arith.constant dense<0.000000e+00> : vector<56x64xf32>
    %2 = tpu.matmul %0, %1, %cst {dimension_numbers = #tpu.dot_dimension_numbers<[1], [0], [0], [1], [0, 0, 1, 1], [], []>} : vector<56x576xbf16>, vector<576x64xbf16>, vector<56x64xf32> -> vector<56x64xf32>
    %c0_3 = arith.constant 0 : index
    %c0_4 = arith.constant 0 : index
    %3 = vector.load %arg3[%c0_3, %c0_4] : memref<1x64xf32, #tpu.memory_space<vmem>>, vector<1x64xf32>
    %4 = vector.broadcast %3 : vector<1x64xf32> to vector<56x64xf32>
    %5 = arith.addf %2, %4 : vector<56x64xf32>
    %cst_5 = arith.constant 0.000000e+00 : f32
    %6 = vector.broadcast %cst_5 : f32 to vector<56x64xf32>
    %7 = arith.maximumf %5, %6 : vector<56x64xf32>
    %8 = arith.truncf %7 : vector<56x64xf32> to vector<56x64xbf16>
    %c0_6 = arith.constant 0 : index
    %c0_7 = arith.constant 0 : index
    %9 = vector.load %arg4[%c0_6, %c0_7] : memref<56x64xbf16, #tpu.memory_space<vmem>>, vector<56x64xbf16>
    tpu.vector_store %arg4[%c0_6, %c0_7], %8 {strides = array<i32>} : memref<56x64xbf16, #tpu.memory_space<vmem>>, vector<56x64xbf16>,
    return
  }
  func.func @transform_0(%arg0: i32) -> (i32, i32) {
    %c0_i32 = arith.constant 0 : i32
    %c0_i32_0 = arith.constant 0 : i32
    return %arg0, %c0_i32 : i32, i32
  }
  func.func @transform_1(%arg0: i32) -> (i32, i32) {
    %c0_i32 = arith.constant 0 : i32
    %c0_i32_0 = arith.constant 0 : i32
    %c0_i32_1 = arith.constant 0 : i32
    return %c0_i32, %c0_i32_0 : i32, i32
  }
  func.func @transform_2(%arg0: i32) -> (i32, i32) {
    %c0_i32 = arith.constant 0 : i32
    %c0_i32_0 = arith.constant 0 : i32
    %c0_i32_1 = arith.constant 0 : i32
    return %c0_i32, %c0_i32_0 : i32, i32
  }
  func.func @transform_3(%arg0: i32) -> (i32, i32) {
    %c0_i32 = arith.constant 0 : i32
    %c0_i32_0 = arith.constant 0 : i32
    return %arg0, %c0_i32 : i32, i32
  }
}

module attributes {stable_mosaic.version = 11 : i64} {
  func.func @_fc_head_kernel(%arg0: i32, %arg1: memref<2x640xbf16, #tpu.memory_space<vmem>>, %arg2: memref<640x256xbf16, #tpu.memory_space<vmem>>, %arg3: memref<1x256xf32, #tpu.memory_space<vmem>>, %arg4: memref<256x256xbf16, #tpu.memory_space<vmem>>, %arg5: memref<1x256xf32, #tpu.memory_space<vmem>>, %arg6: memref<256x256xbf16, #tpu.memory_space<vmem>>, %arg7: memref<1x256xf32, #tpu.memory_space<vmem>>, %arg8: memref<2x256xf32, #tpu.memory_space<vmem>>, %arg9: memref<2x256xf32, #tpu.memory_space<vmem>>) attributes {dimension_semantics = [#tpu.dimension_semantics<arbitrary>], iteration_bounds = array<i64: 5>, scalar_prefetch = 0 : i64, scratch_operands = 1 : i64, tpu.core_type = #tpu.core_type<tc>, window_params = [{transform_indices = @transform_0, window_bounds = array<i64: 2, 640>}, {transform_indices = @transform_1, window_bounds = array<i64: 640, 256>}, {pipeline_mode = #tpu.pipeline_mode<synchronous>, transform_indices = @transform_2, window_bounds = array<i64: 1, 256>}, {pipeline_mode = #tpu.pipeline_mode<synchronous>, transform_indices = @transform_3, window_bounds = array<i64: 256, 256>}, {pipeline_mode = #tpu.pipeline_mode<synchronous>, transform_indices = @transform_4, window_bounds = array<i64: 1, 256>}, {pipeline_mode = #tpu.pipeline_mode<synchronous>, transform_indices = @transform_5, window_bounds = array<i64: 256, 256>}, {pipeline_mode = #tpu.pipeline_mode<synchronous>, transform_indices = @transform_6, window_bounds = array<i64: 1, 256>}, {pipeline_mode = #tpu.pipeline_mode<synchronous>, transform_indices = @transform_7, window_bounds = array<i64: 2, 256>}]} {
    %c0_i32 = arith.constant 0 : i32
    %0 = arith.cmpi eq, %arg0, %c0_i32 : i32
    %1 = arith.extui %0 : i1 to i32
    %c0_i32_0 = arith.constant 0 : i32
    %2 = arith.cmpi ne, %1, %c0_i32_0 : i32
    scf.if %2 {
      %cst_9 = arith.constant 0.000000e+00 : f32
      %12 = vector.broadcast %cst_9 : f32 to vector<2x256xf32>
      %c0_10 = arith.constant 0 : index
      %c0_11 = arith.constant 0 : index
      %13 = vector.load %arg9[%c0_10, %c0_11] : memref<2x256xf32, #tpu.memory_space<vmem>>, vector<2x256xf32>
      tpu.vector_store %arg9[%c0_10, %c0_11], %12 {strides = array<i32>} : memref<2x256xf32, #tpu.memory_space<vmem>>, vector<2x256xf32>,
    } else {
    }
    %c0 = arith.constant 0 : index
    %c0_1 = arith.constant 0 : index
    %3 = vector.load %arg9[%c0, %c0_1] : memref<2x256xf32, #tpu.memory_space<vmem>>, vector<2x256xf32>
    %c0_2 = arith.constant 0 : index
    %c0_3 = arith.constant 0 : index
    %4 = vector.load %arg1[%c0_2, %c0_3] : memref<2x640xbf16, #tpu.memory_space<vmem>>, vector<2x640xbf16>
    %c0_4 = arith.constant 0 : index
    %c0_5 = arith.constant 0 : index
    %5 = vector.load %arg2[%c0_4, %c0_5] : memref<640x256xbf16, #tpu.memory_space<vmem>>, vector<640x256xbf16>
    %cst = arith.constant dense<0.000000e+00> : vector<2x256xf32>
    %6 = tpu.matmul %4, %5, %cst {dimension_numbers = #tpu.dot_dimension_numbers<[1], [0], [0], [1], [0, 0, 1, 1], [], []>} : vector<2x640xbf16>, vector<640x256xbf16>, vector<2x256xf32> -> vector<2x256xf32>
    %7 = arith.addf %3, %6 : vector<2x256xf32>
    %c0_6 = arith.constant 0 : index
    %c0_7 = arith.constant 0 : index
    %8 = vector.load %arg9[%c0_6, %c0_7] : memref<2x256xf32, #tpu.memory_space<vmem>>, vector<2x256xf32>
    tpu.vector_store %arg9[%c0_6, %c0_7], %7 {strides = array<i32>} : memref<2x256xf32, #tpu.memory_space<vmem>>, vector<2x256xf32>,
    %c4_i32 = arith.constant 4 : i32
    %9 = arith.cmpi eq, %arg0, %c4_i32 : i32
    %10 = arith.extui %9 : i1 to i32
    %c0_i32_8 = arith.constant 0 : i32
    %11 = arith.cmpi ne, %10, %c0_i32_8 : i32
    scf.if %11 {
      %c0_9 = arith.constant 0 : index
      %c0_10 = arith.constant 0 : index
      %12 = vector.load %arg9[%c0_9, %c0_10] : memref<2x256xf32, #tpu.memory_space<vmem>>, vector<2x256xf32>
      %c0_11 = arith.constant 0 : index
      %c0_12 = arith.constant 0 : index
      %13 = vector.load %arg3[%c0_11, %c0_12] : memref<1x256xf32, #tpu.memory_space<vmem>>, vector<1x256xf32>
      %14 = vector.broadcast %13 : vector<1x256xf32> to vector<2x256xf32>
      %15 = arith.addf %12, %14 : vector<2x256xf32>
      %cst_13 = arith.constant 0.000000e+00 : f32
      %16 = vector.broadcast %cst_13 : f32 to vector<2x256xf32>
      %17 = arith.maximumf %15, %16 : vector<2x256xf32>
      %18 = arith.truncf %17 : vector<2x256xf32> to vector<2x256xbf16>
      %c0_14 = arith.constant 0 : index
      %c0_15 = arith.constant 0 : index
      %19 = vector.load %arg4[%c0_14, %c0_15] : memref<256x256xbf16, #tpu.memory_space<vmem>>, vector<256x256xbf16>
      %cst_16 = arith.constant dense<0.000000e+00> : vector<2x256xf32>
      %20 = tpu.matmul %18, %19, %cst_16 {dimension_numbers = #tpu.dot_dimension_numbers<[1], [0], [0], [1], [0, 0, 1, 1], [], []>} : vector<2x256xbf16>, vector<256x256xbf16>, vector<2x256xf32> -> vector<2x256xf32>
      %c0_17 = arith.constant 0 : index
      %c0_18 = arith.constant 0 : index
      %21 = vector.load %arg5[%c0_17, %c0_18] : memref<1x256xf32, #tpu.memory_space<vmem>>, vector<1x256xf32>
      %22 = vector.broadcast %21 : vector<1x256xf32> to vector<2x256xf32>
      %23 = arith.addf %20, %22 : vector<2x256xf32>
      %cst_19 = arith.constant 0.000000e+00 : f32
      %24 = vector.broadcast %cst_19 : f32 to vector<2x256xf32>
      %25 = arith.maximumf %23, %24 : vector<2x256xf32>
      %26 = arith.truncf %25 : vector<2x256xf32> to vector<2x256xbf16>
      %c0_20 = arith.constant 0 : index
      %c0_21 = arith.constant 0 : index
      %27 = vector.load %arg6[%c0_20, %c0_21] : memref<256x256xbf16, #tpu.memory_space<vmem>>, vector<256x256xbf16>
      %cst_22 = arith.constant dense<0.000000e+00> : vector<2x256xf32>
      %28 = tpu.matmul %26, %27, %cst_22 {dimension_numbers = #tpu.dot_dimension_numbers<[1], [0], [0], [1], [0, 0, 1, 1], [], []>} : vector<2x256xbf16>, vector<256x256xbf16>, vector<2x256xf32> -> vector<2x256xf32>
      %c0_23 = arith.constant 0 : index
      %c0_24 = arith.constant 0 : index
      %29 = vector.load %arg7[%c0_23, %c0_24] : memref<1x256xf32, #tpu.memory_space<vmem>>, vector<1x256xf32>
      %30 = vector.broadcast %29 : vector<1x256xf32> to vector<2x256xf32>
      %31 = arith.addf %28, %30 : vector<2x256xf32>
      %c0_25 = arith.constant 0 : index
      %c0_26 = arith.constant 0 : index
      %32 = vector.load %arg8[%c0_25, %c0_26] : memref<2x256xf32, #tpu.memory_space<vmem>>, vector<2x256xf32>
      tpu.vector_store %arg8[%c0_25, %c0_26], %31 {strides = array<i32>} : memref<2x256xf32, #tpu.memory_space<vmem>>, vector<2x256xf32>,
    } else {
    }
    return
  }
  func.func @transform_0(%arg0: i32) -> (i32, i32) {
    %c0_i32 = arith.constant 0 : i32
    %c0_i32_0 = arith.constant 0 : i32
    return %c0_i32, %arg0 : i32, i32
  }
  func.func @transform_1(%arg0: i32) -> (i32, i32) {
    %c0_i32 = arith.constant 0 : i32
    %c0_i32_0 = arith.constant 0 : i32
    return %arg0, %c0_i32 : i32, i32
  }
  func.func @transform_2(%arg0: i32) -> (i32, i32) {
    %c0_i32 = arith.constant 0 : i32
    %c0_i32_0 = arith.constant 0 : i32
    %c0_i32_1 = arith.constant 0 : i32
    return %c0_i32, %c0_i32_0 : i32, i32
  }
  func.func @transform_3(%arg0: i32) -> (i32, i32) {
    %c0_i32 = arith.constant 0 : i32
    %c0_i32_0 = arith.constant 0 : i32
    %c0_i32_1 = arith.constant 0 : i32
    return %c0_i32, %c0_i32_0 : i32, i32
  }
  func.func @transform_4(%arg0: i32) -> (i32, i32) {
    %c0_i32 = arith.constant 0 : i32
    %c0_i32_0 = arith.constant 0 : i32
    %c0_i32_1 = arith.constant 0 : i32
    return %c0_i32, %c0_i32_0 : i32, i32
  }
  func.func @transform_5(%arg0: i32) -> (i32, i32) {
    %c0_i32 = arith.constant 0 : i32
    %c0_i32_0 = arith.constant 0 : i32
    %c0_i32_1 = arith.constant 0 : i32
    return %c0_i32, %c0_i32_0 : i32, i32
  }
  func.func @transform_6(%arg0: i32) -> (i32, i32) {
    %c0_i32 = arith.constant 0 : i32
    %c0_i32_0 = arith.constant 0 : i32
    %c0_i32_1 = arith.constant 0 : i32
    return %c0_i32, %c0_i32_0 : i32, i32
  }
  func.func @transform_7(%arg0: i32) -> (i32, i32) {
    %c0_i32 = arith.constant 0 : i32
    %c0_i32_0 = arith.constant 0 : i32
    %c0_i32_1 = arith.constant 0 : i32
    return %c0_i32, %c0_i32_0 : i32, i32
  }
}

module attributes {stable_mosaic.version = 11 : i64} {
  func.func @_fc_head_kernel(%arg0: i32, %arg1: memref<2x640xbf16, #tpu.memory_space<vmem>>, %arg2: memref<640x256xbf16, #tpu.memory_space<vmem>>, %arg3: memref<1x256xf32, #tpu.memory_space<vmem>>, %arg4: memref<256x256xbf16, #tpu.memory_space<vmem>>, %arg5: memref<1x256xf32, #tpu.memory_space<vmem>>, %arg6: memref<2x256xf32, #tpu.memory_space<vmem>>, %arg7: memref<2x256xf32, #tpu.memory_space<vmem>>) attributes {dimension_semantics = [#tpu.dimension_semantics<arbitrary>], iteration_bounds = array<i64: 5>, scalar_prefetch = 0 : i64, scratch_operands = 1 : i64, tpu.core_type = #tpu.core_type<tc>, window_params = [{transform_indices = @transform_0, window_bounds = array<i64: 2, 640>}, {transform_indices = @transform_1, window_bounds = array<i64: 640, 256>}, {pipeline_mode = #tpu.pipeline_mode<synchronous>, transform_indices = @transform_2, window_bounds = array<i64: 1, 256>}, {pipeline_mode = #tpu.pipeline_mode<synchronous>, transform_indices = @transform_3, window_bounds = array<i64: 256, 256>}, {pipeline_mode = #tpu.pipeline_mode<synchronous>, transform_indices = @transform_4, window_bounds = array<i64: 1, 256>}, {pipeline_mode = #tpu.pipeline_mode<synchronous>, transform_indices = @transform_5, window_bounds = array<i64: 2, 256>}]} {
    %c0_i32 = arith.constant 0 : i32
    %0 = arith.cmpi eq, %arg0, %c0_i32 : i32
    %1 = arith.extui %0 : i1 to i32
    %c0_i32_0 = arith.constant 0 : i32
    %2 = arith.cmpi ne, %1, %c0_i32_0 : i32
    scf.if %2 {
      %cst_9 = arith.constant 0.000000e+00 : f32
      %12 = vector.broadcast %cst_9 : f32 to vector<2x256xf32>
      %c0_10 = arith.constant 0 : index
      %c0_11 = arith.constant 0 : index
      %13 = vector.load %arg7[%c0_10, %c0_11] : memref<2x256xf32, #tpu.memory_space<vmem>>, vector<2x256xf32>
      tpu.vector_store %arg7[%c0_10, %c0_11], %12 {strides = array<i32>} : memref<2x256xf32, #tpu.memory_space<vmem>>, vector<2x256xf32>,
    } else {
    }
    %c0 = arith.constant 0 : index
    %c0_1 = arith.constant 0 : index
    %3 = vector.load %arg7[%c0, %c0_1] : memref<2x256xf32, #tpu.memory_space<vmem>>, vector<2x256xf32>
    %c0_2 = arith.constant 0 : index
    %c0_3 = arith.constant 0 : index
    %4 = vector.load %arg1[%c0_2, %c0_3] : memref<2x640xbf16, #tpu.memory_space<vmem>>, vector<2x640xbf16>
    %c0_4 = arith.constant 0 : index
    %c0_5 = arith.constant 0 : index
    %5 = vector.load %arg2[%c0_4, %c0_5] : memref<640x256xbf16, #tpu.memory_space<vmem>>, vector<640x256xbf16>
    %cst = arith.constant dense<0.000000e+00> : vector<2x256xf32>
    %6 = tpu.matmul %4, %5, %cst {dimension_numbers = #tpu.dot_dimension_numbers<[1], [0], [0], [1], [0, 0, 1, 1], [], []>} : vector<2x640xbf16>, vector<640x256xbf16>, vector<2x256xf32> -> vector<2x256xf32>
    %7 = arith.addf %3, %6 : vector<2x256xf32>
    %c0_6 = arith.constant 0 : index
    %c0_7 = arith.constant 0 : index
    %8 = vector.load %arg7[%c0_6, %c0_7] : memref<2x256xf32, #tpu.memory_space<vmem>>, vector<2x256xf32>
    tpu.vector_store %arg7[%c0_6, %c0_7], %7 {strides = array<i32>} : memref<2x256xf32, #tpu.memory_space<vmem>>, vector<2x256xf32>,
    %c4_i32 = arith.constant 4 : i32
    %9 = arith.cmpi eq, %arg0, %c4_i32 : i32
    %10 = arith.extui %9 : i1 to i32
    %c0_i32_8 = arith.constant 0 : i32
    %11 = arith.cmpi ne, %10, %c0_i32_8 : i32
    scf.if %11 {
      %c0_9 = arith.constant 0 : index
      %c0_10 = arith.constant 0 : index
      %12 = vector.load %arg7[%c0_9, %c0_10] : memref<2x256xf32, #tpu.memory_space<vmem>>, vector<2x256xf32>
      %c0_11 = arith.constant 0 : index
      %c0_12 = arith.constant 0 : index
      %13 = vector.load %arg3[%c0_11, %c0_12] : memref<1x256xf32, #tpu.memory_space<vmem>>, vector<1x256xf32>
      %14 = vector.broadcast %13 : vector<1x256xf32> to vector<2x256xf32>
      %15 = arith.addf %12, %14 : vector<2x256xf32>
      %cst_13 = arith.constant 0.000000e+00 : f32
      %16 = vector.broadcast %cst_13 : f32 to vector<2x256xf32>
      %17 = arith.maximumf %15, %16 : vector<2x256xf32>
      %18 = arith.truncf %17 : vector<2x256xf32> to vector<2x256xbf16>
      %c0_14 = arith.constant 0 : index
      %c0_15 = arith.constant 0 : index
      %19 = vector.load %arg4[%c0_14, %c0_15] : memref<256x256xbf16, #tpu.memory_space<vmem>>, vector<256x256xbf16>
      %cst_16 = arith.constant dense<0.000000e+00> : vector<2x256xf32>
      %20 = tpu.matmul %18, %19, %cst_16 {dimension_numbers = #tpu.dot_dimension_numbers<[1], [0], [0], [1], [0, 0, 1, 1], [], []>} : vector<2x256xbf16>, vector<256x256xbf16>, vector<2x256xf32> -> vector<2x256xf32>
      %c0_17 = arith.constant 0 : index
      %c0_18 = arith.constant 0 : index
      %21 = vector.load %arg5[%c0_17, %c0_18] : memref<1x256xf32, #tpu.memory_space<vmem>>, vector<1x256xf32>
      %22 = vector.broadcast %21 : vector<1x256xf32> to vector<2x256xf32>
      %23 = arith.addf %20, %22 : vector<2x256xf32>
      %c0_19 = arith.constant 0 : index
      %c0_20 = arith.constant 0 : index
      %24 = vector.load %arg6[%c0_19, %c0_20] : memref<2x256xf32, #tpu.memory_space<vmem>>, vector<2x256xf32>
      tpu.vector_store %arg6[%c0_19, %c0_20], %23 {strides = array<i32>} : memref<2x256xf32, #tpu.memory_space<vmem>>, vector<2x256xf32>,
    } else {
    }
    return
  }
  func.func @transform_0(%arg0: i32) -> (i32, i32) {
    %c0_i32 = arith.constant 0 : i32
    %c0_i32_0 = arith.constant 0 : i32
    return %c0_i32, %arg0 : i32, i32
  }
  func.func @transform_1(%arg0: i32) -> (i32, i32) {
    %c0_i32 = arith.constant 0 : i32
    %c0_i32_0 = arith.constant 0 : i32
    return %arg0, %c0_i32 : i32, i32
  }
  func.func @transform_2(%arg0: i32) -> (i32, i32) {
    %c0_i32 = arith.constant 0 : i32
    %c0_i32_0 = arith.constant 0 : i32
    %c0_i32_1 = arith.constant 0 : i32
    return %c0_i32, %c0_i32_0 : i32, i32
  }
  func.func @transform_3(%arg0: i32) -> (i32, i32) {
    %c0_i32 = arith.constant 0 : i32
    %c0_i32_0 = arith.constant 0 : i32
    %c0_i32_1 = arith.constant 0 : i32
    return %c0_i32, %c0_i32_0 : i32, i32
  }
  func.func @transform_4(%arg0: i32) -> (i32, i32) {
    %c0_i32 = arith.constant 0 : i32
    %c0_i32_0 = arith.constant 0 : i32
    %c0_i32_1 = arith.constant 0 : i32
    return %c0_i32, %c0_i32_0 : i32, i32
  }
  func.func @transform_5(%arg0: i32) -> (i32, i32) {
    %c0_i32 = arith.constant 0 : i32
    %c0_i32_0 = arith.constant 0 : i32
    %c0_i32_1 = arith.constant 0 : i32
    return %c0_i32, %c0_i32_0 : i32, i32
  }
}

</mosaic_0001>

<bundles_post_ra>
// kernel: rnd_forward.12
= control target key start
LH: loop header
LB: loop body
LE: loop exit
PB: predicated region body
PF: predicated region fallthrough
CT: control target
= control target key end

     0   :  { %s1542_s12 = smov 0   ;;  %s1852_s0 = inlined_call_operand.vmem [shape: bf16[800,256], index: 0, kind: input, shape index: {}]   ;;  %s1853_s1 = inlined_call_operand.vmem [shape: bf16[256,64], index: 1, kind: input, shape index: {}]   ;;  %s1854_s2 = inlined_call_operand.vmem [shape: f32[1,64], index: 2, kind: input, shape index: {}]   ;;  %s1855_s3 = inlined_call_operand.vmem [shape: bf16[800,64], index: 3, kind: output, shape index: {}]  }
   0x1 LB: > { %s1203_s13 = sadd.s32 4294967295, %s1519_s12   ;;  %p1207_p0 = scmp.ge.s32.totalorder %s1519_s12, 1  ;;  %s1519_s12 = sphi %s1542_s12, %s13_s12  }
   0x2   : > { %p139_p1 = scmp.lt.s32.totalorder %s1519_s12, 3 }
   0x4   : > { %p140_p2 = pnand %p1207_p0, %p139_p1 }
   0x5   : > { %s164_s16 = smul.u32 (!%p140_p2), 50, %s1203_s13 }
   0x6   : > { %143 = sbr.rel (%p140_p2) target bundleno = 376 (0x178), region = 32 }
   0x7   : > { %p165_p3 = scmp.lt.s32.totalorder (!%p140_p2), %s164_s16, 99 }
   0xb   : > { %v1422_v0 = vld [vmem:[%s1853_s1 + $0x38] sm:$0xff]   ;;  %v1521_v1 = vmov 0   ;;  %v1423_v2 = vld [vmem:[%s1853_s1 + $0x30] sm:$0xff]   ;;  %v1424_v3 = vld [vmem:[%s1853_s1 + $0x28] sm:$0xff]   ;;  %s1857_s16 = smov (!%p165_p3, %s164_s16), 99  ;;  %vm1096_vm0 = vcmask 519168  }
   0xc   : > { %613 = vmatprep.subr.bf16.mxu0 %v1521_v1  ;;  %1381 = vmatprep.subr.bf16.mxu1 %v1521_v1  ;;  %v1425_v4 = vld [vmem:[%s1853_s1 + $0x20] sm:$0xff]   ;;  %s1330_s23 = sshll.u32 %s1857_s16, 3  ;;  %v1426_v5 = vld [vmem:[%s1853_s1 + $0x18] sm:$0xff]   ;;  %v1427_v7 = vld [vmem:[%s1853_s1 + $0x10] sm:$0xff]   ;;  %s1210_s29 = sshll.u32 %s1857_s16, 2 }
   0xd   : > { %614 = vmatpush1.bf16.msra.mxu0 %v1422_v0  ;;  %1397 = vmatpush1.bf16.msra.mxu1 %v1422_v0  ;;  %s1579_s28 = scalar_lea.vmem %s1852_s0, %s1330_s23  ;;  %v1428_v9 = vld [vmem:[%s1853_s1 + $0x8] sm:$0xff]   ;;  %v1429_v10 = vld [vmem:[%s1853_s1] sm:$0xff]   ;;  %v1430_v11 = vld [vmem:[%s1853_s1 + $0x78] sm:$0xff]  }
   0xe   : > { %615 = vmatprep.subr.bf16.mxu0 %v1521_v1  ;;  %1382 = vmatprep.subr.bf16.mxu1 %v1521_v1  ;;  %v1440_v6 = vld [vmem:[%s1579_s28 + $0x4] ss:$8 sps:$4 sm:$0xff]   ;;  %v1443_v8 = vld [vmem:[%s1579_s28 + $0xd4] ss:$8 sps:$4 sm:$0xff]   ;;  %v1438_v19 = vld [vmem:[%s1579_s28] ss:$8 sps:$4 sm:$0xff]  }
   0xf   : > { %645 = vmatprep.mubr.bf16.mxu0 %v1440_v6  ;;  %749 = vmatprep.mubr.bf16.mxu1 %v1443_v8  ;;  %v1431_v12 = vld [vmem:[%s1853_s1 + $0x70] sm:$0xff]   ;;  %v1432_v13 = vld [vmem:[%s1853_s1 + $0x68] sm:$0xff]   ;;  %v1433_v14 = vld [vmem:[%s1853_s1 + $0x60] sm:$0xff]  }
  0x10   : > { %v1434_v15 = vld [vmem:[%s1853_s1 + $0x58] sm:$0xff]   ;;  %v1435_v16 = vld [vmem:[%s1853_s1 + $0x50] sm:$0xff]   ;;  %v1436_v17 = vld [vmem:[%s1853_s1 + $0x48] sm:$0xff]  }
  0x11   : > { %616 = vmatpush1.bf16.msra.mxu0 %v1423_v2  ;;  %1398 = vmatpush1.bf16.msra.mxu1 %v1423_v2  ;;  %v1437_v18 = vld [vmem:[%s1853_s1 + $0x40] sm:$0xff]   ;;  %v1441_v20 = vld [vmem:[%s1579_s28 + $0xd0] ss:$8 sps:$4 sm:$0xff]   ;;  %v1444_v21 = vld [vmem:[%s1579_s28 + $0x14] ss:$8 sps:$4 sm:$0xff]  }
  0x12   : > { %617 = vmatprep.subr.bf16.mxu0 %v1521_v1  ;;  %1383 = vmatprep.subr.bf16.mxu1 %v1521_v1  ;;  %v1447_v22 = vld [vmem:[%s1579_s28 + $0xe4] ss:$8 sps:$4 sm:$0xff]   ;;  %v1446_v23 = vld [vmem:[%s1579_s28 + $0x10] ss:$8 sps:$4 sm:$0xff]   ;;  %v1449_v24 = vld [vmem:[%s1579_s28 + $0xe0] ss:$8 sps:$4 sm:$0xff]  }
  0x13   : > { %v1450_v25 = vld [vmem:[%s1579_s28 + $0x24] ss:$8 sps:$4 sm:$0xff]   ;;  %v1453_v26 = vld [vmem:[%s1579_s28 + $0xf4] ss:$8 sps:$4 sm:$0xff]   ;;  %v1452_v27 = vld [vmem:[%s1579_s28 + $0x20] ss:$8 sps:$4 sm:$0xff]  }
  0x14   : > { %v1455_v28 = vld [vmem:[%s1579_s28 + $0xf0] ss:$8 sps:$4 sm:$0xff]   ;;  %v1456_v29 = vld [vmem:[%s1579_s28 + $0x34] ss:$8 sps:$4 sm:$0xff]   ;;  %v1459_v30 = vld [vmem:[%s1579_s28 + $0x104] ss:$8 sps:$4 sm:$0xff]  }
  0x15   : > { %618 = vmatpush1.bf16.msra.mxu0 %v1424_v3  ;;  %1399 = vmatpush1.bf16.msra.mxu1 %v1424_v3  ;;  %v1458_v31 = vld [vmem:[%s1579_s28 + $0x30] ss:$8 sps:$4 sm:$0xff]   ;;  %v1461_v32 = vld [vmem:[%s1579_s28 + $0x100] ss:$8 sps:$4 sm:$0xff]   ;;  %v1462_v33 = vld [vmem:[%s1579_s28 + $0x44] ss:$8 sps:$4 sm:$0xff]  }
  0x16   : > { %619 = vmatprep.subr.bf16.mxu0 %v1521_v1  ;;  %1384 = vmatprep.subr.bf16.mxu1 %v1521_v1  ;;  %v1465_v34 = vld [vmem:[%s1579_s28 + $0x114] ss:$8 sps:$4 sm:$0xff]   ;;  %v1464_v35 = vld [vmem:[%s1579_s28 + $0x40] ss:$8 sps:$4 sm:$0xff]   ;;  %v1467_v36 = vld [vmem:[%s1579_s28 + $0x110] ss:$8 sps:$4 sm:$0xff]  }
  0x17   : > { %v1468_v37 = vld [vmem:[%s1579_s28 + $0x54] ss:$8 sps:$4 sm:$0xff]   ;;  %v1471_v38 = vld [vmem:[%s1579_s28 + $0x124] ss:$8 sps:$4 sm:$0xff]   ;;  %v1470_v39 = vld [vmem:[%s1579_s28 + $0x50] ss:$8 sps:$4 sm:$0xff]  }
  0x18   : > { %v1473_v40 = vld [vmem:[%s1579_s28 + $0x120] ss:$8 sps:$4 sm:$0xff]   ;;  %v1474_v41 = vld [vmem:[%s1579_s28 + $0x64] ss:$8 sps:$4 sm:$0xff]   ;;  %v1477_v42 = vld [vmem:[%s1579_s28 + $0x134] ss:$8 sps:$4 sm:$0xff]  }
  0x19   : > { %620 = vmatpush1.bf16.msra.mxu0 %v1425_v4  ;;  %1400 = vmatpush1.bf16.msra.mxu1 %v1425_v4  ;;  %v1476_v43 = vld [vmem:[%s1579_s28 + $0x60] ss:$8 sps:$4 sm:$0xff]   ;;  %v1479_v44 = vld [vmem:[%s1579_s28 + $0x130] ss:$8 sps:$4 sm:$0xff]   ;;  %v1480_v45 = vld [vmem:[%s1579_s28 + $0x74] ss:$8 sps:$4 sm:$0xff]  }
  0x1a   : > { %621 = vmatprep.subr.bf16.mxu0 %v1521_v1  ;;  %1385 = vmatprep.subr.bf16.mxu1 %v1521_v1  ;;  %v1483_v46 = vld [vmem:[%s1579_s28 + $0x144] ss:$8 sps:$4 sm:$0xff]   ;;  %v1482_v47 = vld [vmem:[%s1579_s28 + $0x70] ss:$8 sps:$4 sm:$0xff]   ;;  %v1485_v48 = vld [vmem:[%s1579_s28 + $0x140] ss:$8 sps:$4 sm:$0xff]  }
  0x1b   : > { %v1486_v49 = vld [vmem:[%s1579_s28 + $0x84] ss:$8 sps:$4 sm:$0xff]   ;;  %v1489_v50 = vld [vmem:[%s1579_s28 + $0x154] ss:$8 sps:$4 sm:$0xff]   ;;  %v1488_v51 = vld [vmem:[%s1579_s28 + $0x80] ss:$8 sps:$4 sm:$0xff]  }
  0x1c   : > { %v1491_v52 = vld [vmem:[%s1579_s28 + $0x150] ss:$8 sps:$4 sm:$0xff]   ;;  %v1492_v53 = vld [vmem:[%s1579_s28 + $0x94] ss:$8 sps:$4 sm:$0xff]   ;;  %v1495_v54 = vld [vmem:[%s1579_s28 + $0x164] ss:$8 sps:$4 sm:$0xff]  }
  0x1d   : > { %622 = vmatpush1.bf16.msra.mxu0 %v1426_v5  ;;  %1401 = vmatpush1.bf16.msra.mxu1 %v1426_v5  ;;  %v1494_v55 = vld [vmem:[%s1579_s28 + $0x90] ss:$8 sps:$4 sm:$0xff]   ;;  %v1497_v56 = vld [vmem:[%s1579_s28 + $0x160] ss:$8 sps:$4 sm:$0xff]   ;;  %v1498_v57 = vld [vmem:[%s1579_s28 + $0xa4] ss:$8 sps:$4 sm:$0xff]  }
  0x1e   : > { %623 = vmatprep.subr.bf16.mxu0 %v1521_v1  ;;  %1386 = vmatprep.subr.bf16.mxu1 %v1521_v1  ;;  %v1501_v58 = vld [vmem:[%s1579_s28 + $0x174] ss:$8 sps:$4 sm:$0xff]   ;;  %v1500_v59 = vld [vmem:[%s1579_s28 + $0xa0] ss:$8 sps:$4 sm:$0xff]   ;;  %v1503_v60 = vld [vmem:[%s1579_s28 + $0x170] ss:$8 sps:$4 sm:$0xff]  }
  0x1f   : > { %v1504_v61 = vld [vmem:[%s1579_s28 + $0xb4] ss:$8 sps:$4 sm:$0xff]   ;;  %v1507_v62 = vld [vmem:[%s1579_s28 + $0x184] ss:$8 sps:$4 sm:$0xff]   ;;  %v1506_v63 = vld [vmem:[%s1579_s28 + $0xb0] ss:$8 sps:$4 sm:$0xff]  }
  0x20   : > { %v1509_v0 = vld [vmem:[%s1579_s28 + $0x180] ss:$8 sps:$4 sm:$0xff]  }
  0x21   : > { %624 = vmatpush1.bf16.msra.mxu0 %v1427_v7  ;;  %1402 = vmatpush1.bf16.msra.mxu1 %v1427_v7  ;;  %v1512_v2 = vld [vmem:[%s1579_s28 + $0xc0] ss:$8 sps:$4 sm:$0xff]  }
  0x22   : > { %625 = vmatprep.subr.bf16.mxu0 %v1521_v1  ;;  %1387 = vmatprep.subr.bf16.mxu1 %v1521_v1  ;;  %v1691_v3 = vld [vmem:[%s1854_s2] ss:$0 sm:$0xff] }
  0x25   : > { %626 = vmatpush1.bf16.msra.mxu0 %v1428_v9  ;;  %1403 = vmatpush1.bf16.msra.mxu1 %v1428_v9 }
  0x26   : > { %627 = vmatprep.subr.bf16.mxu0 %v1521_v1  ;;  %1388 = vmatprep.subr.bf16.mxu1 %v1521_v1 }
  0x29   : > { %628 = vmatpush1.bf16.msra.mxu0 %v1429_v10  ;;  %1404 = vmatpush1.bf16.msra.mxu1 %v1429_v10 }
  0x2a   : > { %629 = vmatprep.subr.bf16.mxu0 %v1521_v1  ;;  %1389 = vmatprep.subr.bf16.mxu1 %v1521_v1 }
  0x2d   : > { %630 = vmatpush2.bf16.msra.mxu0 %v1430_v11  ;;  %1405 = vmatpush2.bf16.msra.mxu1 %v1430_v11 }
  0x2e   : > { %631 = vmatprep.subr.bf16.mxu0 %v1521_v1  ;;  %1390 = vmatprep.subr.bf16.mxu1 %v1521_v1 }
  0x31   : > { %632 = vmatpush2.bf16.msra.mxu0 %v1431_v12  ;;  %1406 = vmatpush2.bf16.msra.mxu1 %v1431_v12 }
  0x32   : > { %633 = vmatprep.subr.bf16.mxu0 %v1521_v1  ;;  %1391 = vmatprep.subr.bf16.mxu1 %v1521_v1 }
  0x35   : > { %634 = vmatpush2.bf16.msra.mxu0 %v1432_v13  ;;  %1407 = vmatpush2.bf16.msra.mxu1 %v1432_v13 }
  0x36   : > { %635 = vmatprep.subr.bf16.mxu0 %v1521_v1  ;;  %1392 = vmatprep.subr.bf16.mxu1 %v1521_v1 }
  0x39   : > { %636 = vmatpush2.bf16.msra.mxu0 %v1433_v14  ;;  %1408 = vmatpush2.bf16.msra.mxu1 %v1433_v14 }
  0x3a   : > { %637 = vmatprep.subr.bf16.mxu0 %v1521_v1  ;;  %1393 = vmatprep.subr.bf16.mxu1 %v1521_v1 }
  0x3d   : > { %638 = vmatpush2.bf16.msra.mxu0 %v1434_v15  ;;  %1409 = vmatpush2.bf16.msra.mxu1 %v1434_v15 }
  0x3e   : > { %639 = vmatprep.subr.bf16.mxu0 %v1521_v1  ;;  %1394 = vmatprep.subr.bf16.mxu1 %v1521_v1 }
  0x41   : > { %640 = vmatpush2.bf16.msra.mxu0 %v1435_v16  ;;  %1410 = vmatpush2.bf16.msra.mxu1 %v1435_v16 }
  0x42   : > { %641 = vmatprep.subr.bf16.mxu0 %v1521_v1  ;;  %1395 = vmatprep.subr.bf16.mxu1 %v1521_v1 }
  0x45   : > { %642 = vmatpush2.bf16.msra.mxu0 %v1436_v17  ;;  %1411 = vmatpush2.bf16.msra.mxu1 %v1436_v17 }
  0x46   : > { %643 = vmatprep.subr.bf16.mxu0 %v1521_v1  ;;  %1396 = vmatprep.subr.bf16.mxu1 %v1521_v1  ;;  %v1510_v1 = vld [vmem:[%s1579_s28 + $0xc4] ss:$8 sps:$4 sm:$0xff]   ;;  %s1699_s28 = scalar_lea.vmem %s1855_s3, %s1210_s29 }
  0x49   : > { %644 = vmatpush2.bf16.msra.mxu0 %v1437_v18  ;;  %1412 = vmatpush2.bf16.msra.mxu1 %v1437_v18 }
  0x4c   : > { %646 = vmatmul.mubr.bf16.vlgmr.msra.gmra.mxu0 %v1438_v19  ;;  %750 = vmatmul.mubr.bf16.vlgmr.msra.gmra.mxu1 %v1441_v20 }
  0x4d   : > { %653 = vmatprep.mubr.bf16.mxu0 %v1444_v21  ;;  %757 = vmatprep.mubr.bf16.mxu1 %v1447_v22 }
  0x54   : > { %654 = vmatmul.mubr.bf16.gmra.mxu0 %v1446_v23  ;;  %758 = vmatmul.mubr.bf16.gmra.mxu1 %v1449_v24 }
  0x55   : > { %661 = vmatprep.mubr.bf16.mxu0 %v1450_v25  ;;  %765 = vmatprep.mubr.bf16.mxu1 %v1453_v26 }
  0x5c   : > { %662 = vmatmul.mubr.bf16.gmra.mxu0 %v1452_v27  ;;  %766 = vmatmul.mubr.bf16.gmra.mxu1 %v1455_v28 }
  0x5d   : > { %669 = vmatprep.mubr.bf16.mxu0 %v1456_v29  ;;  %773 = vmatprep.mubr.bf16.mxu1 %v1459_v30 }
  0x64   : > { %670 = vmatmul.mubr.bf16.gmra.mxu0 %v1458_v31  ;;  %774 = vmatmul.mubr.bf16.gmra.mxu1 %v1461_v32 }
  0x65   : > { %677 = vmatprep.mubr.bf16.mxu0 %v1462_v33  ;;  %781 = vmatprep.mubr.bf16.mxu1 %v1465_v34 }
  0x6c   : > { %678 = vmatmul.mubr.bf16.gmra.mxu0 %v1464_v35  ;;  %782 = vmatmul.mubr.bf16.gmra.mxu1 %v1467_v36 }
  0x6d   : > { %685 = vmatprep.mubr.bf16.mxu0 %v1468_v37  ;;  %789 = vmatprep.mubr.bf16.mxu1 %v1471_v38 }
  0x74   : > { %686 = vmatmul.mubr.bf16.gmra.mxu0 %v1470_v39  ;;  %790 = vmatmul.mubr.bf16.gmra.mxu1 %v1473_v40 }
  0x75   : > { %693 = vmatprep.mubr.bf16.mxu0 %v1474_v41  ;;  %797 = vmatprep.mubr.bf16.mxu1 %v1477_v42 }
  0x7c   : > { %694 = vmatmul.mubr.bf16.gmra.mxu0 %v1476_v43  ;;  %798 = vmatmul.mubr.bf16.gmra.mxu1 %v1479_v44 }
  0x7d   : > { %701 = vmatprep.mubr.bf16.mxu0 %v1480_v45  ;;  %805 = vmatprep.mubr.bf16.mxu1 %v1483_v46 }
  0x84   : > { %702 = vmatmul.mubr.bf16.gmra.mxu0 %v1482_v47  ;;  %806 = vmatmul.mubr.bf16.gmra.mxu1 %v1485_v48 }
  0x85   : > { %709 = vmatprep.mubr.bf16.mxu0 %v1486_v49  ;;  %813 = vmatprep.mubr.bf16.mxu1 %v1489_v50 }
  0x8c   : > { %710 = vmatmul.mubr.bf16.gmra.mxu0 %v1488_v51  ;;  %814 = vmatmul.mubr.bf16.gmra.mxu1 %v1491_v52 }
  0x8d   : > { %717 = vmatprep.mubr.bf16.mxu0 %v1492_v53  ;;  %821 = vmatprep.mubr.bf16.mxu1 %v1495_v54 }
  0x94   : > { %718 = vmatmul.mubr.bf16.gmra.mxu0 %v1494_v55  ;;  %822 = vmatmul.mubr.bf16.gmra.mxu1 %v1497_v56 }
  0x95   : > { %725 = vmatprep.mubr.bf16.mxu0 %v1498_v57  ;;  %829 = vmatprep.mubr.bf16.mxu1 %v1501_v58 }
  0x9c   : > { %726 = vmatmul.mubr.bf16.gmra.mxu0 %v1500_v59  ;;  %830 = vmatmul.mubr.bf16.gmra.mxu1 %v1503_v60 }
  0x9d   : > { %733 = vmatprep.mubr.bf16.mxu0 %v1504_v61  ;;  %837 = vmatprep.mubr.bf16.mxu1 %v1507_v62 }
  0xa4   : > { %734 = vmatmul.mubr.bf16.gmra.mxu0 %v1506_v63  ;;  %838 = vmatmul.mubr.bf16.gmra.mxu1 %v1509_v0 }
  0xa5   : > { %741 = vmatprep.mubr.bf16.mxu0 %v1510_v1 }
  0xac   : > { %742 = vmatmul.mubr.bf16.gmra.mxu0 %v1512_v2 }
 0x10c   : > { %v647_v4 = vpop.f32.mrf.mxu0  ;;  %v751_v5 = vpop.f32.mrf.mxu1 }
 0x10d   : > { %v648_v6 = vadd.f32 %v1691_v3, %v647_v4  ;;  %v752_v7 = vadd.f32 %v1691_v3, %v751_v5 }
 0x10e   : > { %v649_v8 = vpop.f32.mrf.mxu0  ;;  %v753_v9 = vpop.f32.mrf.mxu1 }
 0x10f   : > { %v846_v10 = vmax.f32 %v648_v6, 0.0  ;;  %v872_v11 = vmax.f32 %v752_v7, 0.0 }
 0x110   : > { %v650_v12 = vpop.f32.mrf.mxu0  ;;  %v754_v13 = vpop.f32.mrf.mxu1 }
 0x111   : > { %v1331_v14 = vpack.c.bf16 %v846_v10, %v846_v10  ;;  %v1357_v15 = vpack.c.bf16 %v872_v11, %v872_v11  ;;  %v651_v16 = vadd.f32 %v1691_v3, %v650_v12  ;;  %v755_v17 = vadd.f32 %v1691_v3, %v754_v13 }
 0x112   : > { %v652_v18 = vpop.f32.mrf.mxu0  ;;  %v756_v19 = vpop.f32.mrf.mxu1 }
 0x113   : > { %1097 = vst.msk [vmem:[%s1699_s28] sm:$0xf] %vm1096_vm0, %v1331_v14  ;;  %1123 = vst.msk [vmem:[%s1699_s28 + $0x68] sm:$0xf] %vm1096_vm0, %v1357_v15  ;;  %v847_v20 = vmax.f32 %v651_v16, 0.0  ;;  %v873_v21 = vmax.f32 %v755_v17, 0.0 }
 0x114   : > { %v655_v22 = vpop.f32.mrf.mxu0  ;;  %v759_v23 = vpop.f32.mrf.mxu1 }
 0x115   : > { %v1332_v24 = vpack.c.bf16 %v847_v20, %v847_v20  ;;  %v1358_v25 = vpack.c.bf16 %v873_v21, %v873_v21  ;;  %v656_v26 = vadd.f32 %v1691_v3, %v655_v22  ;;  %v760_v27 = vadd.f32 %v1691_v3, %v759_v23 }
 0x116   : > { %v657_v28 = vpop.f32.mrf.mxu0  ;;  %v761_v29 = vpop.f32.mrf.mxu1 }
 0x117   : > { %1098 = vst.msk [vmem:[%s1699_s28 + $0x4] sm:$0xf] %vm1096_vm0, %v1332_v24  ;;  %1124 = vst.msk [vmem:[%s1699_s28 + $0x6c] sm:$0xf] %vm1096_vm0, %v1358_v25  ;;  %v848_v30 = vmax.f32 %v656_v26, 0.0  ;;  %v874_v31 = vmax.f32 %v760_v27, 0.0 }
 0x118   : > { %v658_v32 = vpop.f32.mrf.mxu0  ;;  %v762_v33 = vpop.f32.mrf.mxu1 }
 0x119   : > { %v1333_v34 = vpack.c.bf16 %v848_v30, %v848_v30  ;;  %v1359_v35 = vpack.c.bf16 %v874_v31, %v874_v31  ;;  %v659_v36 = vadd.f32 %v1691_v3, %v658_v32  ;;  %v763_v37 = vadd.f32 %v1691_v3, %v762_v33 }
 0x11a   : > { %v660_v38 = vpop.f32.mrf.mxu0  ;;  %v764_v39 = vpop.f32.mrf.mxu1 }
 0x11b   : > { %1099 = vst.msk [vmem:[%s1699_s28 + $0x8] sm:$0xf] %vm1096_vm0, %v1333_v34  ;;  %1125 = vst.msk [vmem:[%s1699_s28 + $0x70] sm:$0xf] %vm1096_vm0, %v1359_v35  ;;  %v849_v40 = vmax.f32 %v659_v36, 0.0  ;;  %v875_v41 = vmax.f32 %v763_v37, 0.0 }
 0x11c   : > { %v663_v42 = vpop.f32.mrf.mxu0  ;;  %v767_v43 = vpop.f32.mrf.mxu1 }
 0x11d   : > { %v1334_v44 = vpack.c.bf16 %v849_v40, %v849_v40  ;;  %v1360_v45 = vpack.c.bf16 %v875_v41, %v875_v41  ;;  %v664_v46 = vadd.f32 %v1691_v3, %v663_v42  ;;  %v768_v47 = vadd.f32 %v1691_v3, %v767_v43 }
 0x11e   : > { %v665_v48 = vpop.f32.mrf.mxu0  ;;  %v769_v49 = vpop.f32.mrf.mxu1 }
 0x11f   : > { %1100 = vst.msk [vmem:[%s1699_s28 + $0xc] sm:$0xf] %vm1096_vm0, %v1334_v44  ;;  %1126 = vst.msk [vmem:[%s1699_s28 + $0x74] sm:$0xf] %vm1096_vm0, %v1360_v45  ;;  %v850_v50 = vmax.f32 %v664_v46, 0.0  ;;  %v876_v51 = vmax.f32 %v768_v47, 0.0 }
 0x120   : > { %v666_v52 = vpop.f32.mrf.mxu0  ;;  %v770_v53 = vpop.f32.mrf.mxu1 }
 0x121   : > { %v1335_v54 = vpack.c.bf16 %v850_v50, %v850_v50  ;;  %v1361_v55 = vpack.c.bf16 %v876_v51, %v876_v51  ;;  %v667_v56 = vadd.f32 %v1691_v3, %v666_v52  ;;  %v771_v57 = vadd.f32 %v1691_v3, %v770_v53 }
 0x122   : > { %v668_v58 = vpop.f32.mrf.mxu0  ;;  %v772_v59 = vpop.f32.mrf.mxu1 }
 0x123   : > { %1101 = vst.msk [vmem:[%s1699_s28 + $0x10] sm:$0xf] %vm1096_vm0, %v1335_v54  ;;  %1127 = vst.msk [vmem:[%s1699_s28 + $0x78] sm:$0xf] %vm1096_vm0, %v1361_v55  ;;  %v851_v60 = vmax.f32 %v667_v56, 0.0  ;;  %v877_v61 = vmax.f32 %v771_v57, 0.0 }
 0x124   : > { %v671_v62 = vpop.f32.mrf.mxu0  ;;  %v775_v63 = vpop.f32.mrf.mxu1 }
 0x125   : > { %v1336_v0 = vpack.c.bf16 %v851_v60, %v851_v60  ;;  %v1362_v1 = vpack.c.bf16 %v877_v61, %v877_v61  ;;  %v672_v2 = vadd.f32 %v1691_v3, %v671_v62  ;;  %v776_v4 = vadd.f32 %v1691_v3, %v775_v63 }
 0x126   : > { %v673_v5 = vpop.f32.mrf.mxu0  ;;  %v777_v6 = vpop.f32.mrf.mxu1 }
 0x127   : > { %1102 = vst.msk [vmem:[%s1699_s28 + $0x14] sm:$0xf] %vm1096_vm0, %v1336_v0  ;;  %1128 = vst.msk [vmem:[%s1699_s28 + $0x7c] sm:$0xf] %vm1096_vm0, %v1362_v1  ;;  %v852_v7 = vmax.f32 %v672_v2, 0.0  ;;  %v878_v8 = vmax.f32 %v776_v4, 0.0 }
 0x128   : > { %v674_v9 = vpop.f32.mrf.mxu0  ;;  %v778_v10 = vpop.f32.mrf.mxu1 }
 0x129   : > { %v1337_v11 = vpack.c.bf16 %v852_v7, %v852_v7  ;;  %v1363_v12 = vpack.c.bf16 %v878_v8, %v878_v8  ;;  %v675_v13 = vadd.f32 %v1691_v3, %v674_v9  ;;  %v779_v14 = vadd.f32 %v1691_v3, %v778_v10 }
 0x12a   : > { %v676_v15 = vpop.f32.mrf.mxu0  ;;  %v780_v16 = vpop.f32.mrf.mxu1 }
 0x12b   : > { %1103 = vst.msk [vmem:[%s1699_s28 + $0x18] sm:$0xf] %vm1096_vm0, %v1337_v11  ;;  %1129 = vst.msk [vmem:[%s1699_s28 + $0x80] sm:$0xf] %vm1096_vm0, %v1363_v12  ;;  %v853_v17 = vmax.f32 %v675_v13, 0.0  ;;  %v879_v18 = vmax.f32 %v779_v14, 0.0 }
 0x12c   : > { %v679_v19 = vpop.f32.mrf.mxu0  ;;  %v783_v20 = vpop.f32.mrf.mxu1 }
 0x12d   : > { %v1338_v21 = vpack.c.bf16 %v853_v17, %v853_v17  ;;  %v1364_v22 = vpack.c.bf16 %v879_v18, %v879_v18  ;;  %v680_v23 = vadd.f32 %v1691_v3, %v679_v19  ;;  %v784_v24 = vadd.f32 %v1691_v3, %v783_v20 }
 0x12e   : > { %v681_v25 = vpop.f32.mrf.mxu0  ;;  %v785_v26 = vpop.f32.mrf.mxu1 }
 0x12f   : > { %1104 = vst.msk [vmem:[%s1699_s28 + $0x1c] sm:$0xf] %vm1096_vm0, %v1338_v21  ;;  %1130 = vst.msk [vmem:[%s1699_s28 + $0x84] sm:$0xf] %vm1096_vm0, %v1364_v22  ;;  %v854_v27 = vmax.f32 %v680_v23, 0.0  ;;  %v880_v28 = vmax.f32 %v784_v24, 0.0 }
 0x130   : > { %v682_v29 = vpop.f32.mrf.mxu0  ;;  %v786_v30 = vpop.f32.mrf.mxu1 }
 0x131   : > { %v1339_v31 = vpack.c.bf16 %v854_v27, %v854_v27  ;;  %v1365_v32 = vpack.c.bf16 %v880_v28, %v880_v28  ;;  %v683_v33 = vadd.f32 %v1691_v3, %v682_v29  ;;  %v787_v34 = vadd.f32 %v1691_v3, %v786_v30 }
 0x132   : > { %v684_v35 = vpop.f32.mrf.mxu0  ;;  %v788_v36 = vpop.f32.mrf.mxu1 }
 0x133   : > { %1105 = vst.msk [vmem:[%s1699_s28 + $0x20] sm:$0xf] %vm1096_vm0, %v1339_v31  ;;  %1131 = vst.msk [vmem:[%s1699_s28 + $0x88] sm:$0xf] %vm1096_vm0, %v1365_v32  ;;  %v855_v37 = vmax.f32 %v683_v33, 0.0  ;;  %v881_v38 = vmax.f32 %v787_v34, 0.0 }
 0x134   : > { %v687_v39 = vpop.f32.mrf.mxu0  ;;  %v791_v40 = vpop.f32.mrf.mxu1 }
 0x135   : > { %v1340_v41 = vpack.c.bf16 %v855_v37, %v855_v37  ;;  %v1366_v42 = vpack.c.bf16 %v881_v38, %v881_v38  ;;  %v688_v43 = vadd.f32 %v1691_v3, %v687_v39  ;;  %v792_v44 = vadd.f32 %v1691_v3, %v791_v40 }
 0x136   : > { %v689_v45 = vpop.f32.mrf.mxu0  ;;  %v793_v46 = vpop.f32.mrf.mxu1 }
 0x137   : > { %1106 = vst.msk [vmem:[%s1699_s28 + $0x24] sm:$0xf] %vm1096_vm0, %v1340_v41  ;;  %1132 = vst.msk [vmem:[%s1699_s28 + $0x8c] sm:$0xf] %vm1096_vm0, %v1366_v42  ;;  %v856_v47 = vmax.f32 %v688_v43, 0.0  ;;  %v882_v48 = vmax.f32 %v792_v44, 0.0 }
 0x138   : > { %v690_v49 = vpop.f32.mrf.mxu0  ;;  %v794_v50 = vpop.f32.mrf.mxu1 }
 0x139   : > { %v1341_v51 = vpack.c.bf16 %v856_v47, %v856_v47  ;;  %v1367_v52 = vpack.c.bf16 %v882_v48, %v882_v48  ;;  %v691_v53 = vadd.f32 %v1691_v3, %v690_v49  ;;  %v795_v54 = vadd.f32 %v1691_v3, %v794_v50 }
 0x13a   : > { %v692_v55 = vpop.f32.mrf.mxu0  ;;  %v796_v56 = vpop.f32.mrf.mxu1 }
 0x13b   : > { %1107 = vst.msk [vmem:[%s1699_s28 + $0x28] sm:$0xf] %vm1096_vm0, %v1341_v51  ;;  %1133 = vst.msk [vmem:[%s1699_s28 + $0x90] sm:$0xf] %vm1096_vm0, %v1367_v52  ;;  %v857_v57 = vmax.f32 %v691_v53, 0.0  ;;  %v883_v58 = vmax.f32 %v795_v54, 0.0 }
 0x13c   : > { %v695_v59 = vpop.f32.mrf.mxu0  ;;  %v799_v60 = vpop.f32.mrf.mxu1 }
 0x13d   : > { %v1342_v61 = vpack.c.bf16 %v857_v57, %v857_v57  ;;  %v1368_v62 = vpack.c.bf16 %v883_v58, %v883_v58  ;;  %v696_v63 = vadd.f32 %v1691_v3, %v695_v59  ;;  %v800_v0 = vadd.f32 %v1691_v3, %v799_v60 }
 0x13e   : > { %v697_v1 = vpop.f32.mrf.mxu0  ;;  %v801_v2 = vpop.f32.mrf.mxu1 }
 0x13f   : > { %1108 = vst.msk [vmem:[%s1699_s28 + $0x2c] sm:$0xf] %vm1096_vm0, %v1342_v61  ;;  %1134 = vst.msk [vmem:[%s1699_s28 + $0x94] sm:$0xf] %vm1096_vm0, %v1368_v62  ;;  %v858_v4 = vmax.f32 %v696_v63, 0.0  ;;  %v884_v5 = vmax.f32 %v800_v0, 0.0 }
 0x140   : > { %v698_v6 = vpop.f32.mrf.mxu0  ;;  %v802_v7 = vpop.f32.mrf.mxu1 }
 0x141   : > { %v1343_v8 = vpack.c.bf16 %v858_v4, %v858_v4  ;;  %v1369_v9 = vpack.c.bf16 %v884_v5, %v884_v5  ;;  %v699_v10 = vadd.f32 %v1691_v3, %v698_v6  ;;  %v803_v11 = vadd.f32 %v1691_v3, %v802_v7 }
 0x142   : > { %v700_v12 = vpop.f32.mrf.mxu0  ;;  %v804_v13 = vpop.f32.mrf.mxu1 }
 0x143   : > { %1109 = vst.msk [vmem:[%s1699_s28 + $0x30] sm:$0xf] %vm1096_vm0, %v1343_v8  ;;  %1135 = vst.msk [vmem:[%s1699_s28 + $0x98] sm:$0xf] %vm1096_vm0, %v1369_v9  ;;  %v859_v14 = vmax.f32 %v699_v10, 0.0  ;;  %v885_v15 = vmax.f32 %v803_v11, 0.0 }
 0x144   : > { %v703_v16 = vpop.f32.mrf.mxu0  ;;  %v807_v17 = vpop.f32.mrf.mxu1 }
 0x145   : > { %v1344_v18 = vpack.c.bf16 %v859_v14, %v859_v14  ;;  %v1370_v19 = vpack.c.bf16 %v885_v15, %v885_v15  ;;  %v704_v20 = vadd.f32 %v1691_v3, %v703_v16  ;;  %v808_v21 = vadd.f32 %v1691_v3, %v807_v17 }
 0x146   : > { %v705_v22 = vpop.f32.mrf.mxu0  ;;  %v809_v23 = vpop.f32.mrf.mxu1 }
 0x147   : > { %1110 = vst.msk [vmem:[%s1699_s28 + $0x34] sm:$0xf] %vm1096_vm0, %v1344_v18  ;;  %1136 = vst.msk [vmem:[%s1699_s28 + $0x9c] sm:$0xf] %vm1096_vm0, %v1370_v19  ;;  %v860_v24 = vmax.f32 %v704_v20, 0.0  ;;  %v886_v25 = vmax.f32 %v808_v21, 0.0 }
 0x148   : > { %v706_v26 = vpop.f32.mrf.mxu0  ;;  %v810_v27 = vpop.f32.mrf.mxu1 }
 0x149   : > { %v1345_v28 = vpack.c.bf16 %v860_v24, %v860_v24  ;;  %v1371_v29 = vpack.c.bf16 %v886_v25, %v886_v25  ;;  %v707_v30 = vadd.f32 %v1691_v3, %v706_v26  ;;  %v811_v31 = vadd.f32 %v1691_v3, %v810_v27 }
 0x14a   : > { %v708_v32 = vpop.f32.mrf.mxu0  ;;  %v812_v33 = vpop.f32.mrf.mxu1 }
 0x14b   : > { %1111 = vst.msk [vmem:[%s1699_s28 + $0x38] sm:$0xf] %vm1096_vm0, %v1345_v28  ;;  %1137 = vst.msk [vmem:[%s1699_s28 + $0xa0] sm:$0xf] %vm1096_vm0, %v1371_v29  ;;  %v861_v34 = vmax.f32 %v707_v30, 0.0  ;;  %v887_v35 = vmax.f32 %v811_v31, 0.0 }
 0x14c   : > { %v711_v36 = vpop.f32.mrf.mxu0  ;;  %v815_v37 = vpop.f32.mrf.mxu1 }
 0x14d   : > { %v1346_v38 = vpack.c.bf16 %v861_v34, %v861_v34  ;;  %v1372_v39 = vpack.c.bf16 %v887_v35, %v887_v35  ;;  %v712_v40 = vadd.f32 %v1691_v3, %v711_v36  ;;  %v816_v41 = vadd.f32 %v1691_v3, %v815_v37 }
 0x14e   : > { %v713_v42 = vpop.f32.mrf.mxu0  ;;  %v817_v43 = vpop.f32.mrf.mxu1 }
 0x14f   : > { %1112 = vst.msk [vmem:[%s1699_s28 + $0x3c] sm:$0xf] %vm1096_vm0, %v1346_v38  ;;  %1138 = vst.msk [vmem:[%s1699_s28 + $0xa4] sm:$0xf] %vm1096_vm0, %v1372_v39  ;;  %v862_v44 = vmax.f32 %v712_v40, 0.0  ;;  %v888_v45 = vmax.f32 %v816_v41, 0.0 }
 0x150   : > { %v714_v46 = vpop.f32.mrf.mxu0  ;;  %v818_v47 = vpop.f32.mrf.mxu1 }
 0x151   : > { %v1347_v48 = vpack.c.bf16 %v862_v44, %v862_v44  ;;  %v1373_v49 = vpack.c.bf16 %v888_v45, %v888_v45  ;;  %v715_v50 = vadd.f32 %v1691_v3, %v714_v46  ;;  %v819_v51 = vadd.f32 %v1691_v3, %v818_v47 }
 0x152   : > { %v716_v52 = vpop.f32.mrf.mxu0  ;;  %v820_v53 = vpop.f32.mrf.mxu1 }
 0x153   : > { %1113 = vst.msk [vmem:[%s1699_s28 + $0x40] sm:$0xf] %vm1096_vm0, %v1347_v48  ;;  %1139 = vst.msk [vmem:[%s1699_s28 + $0xa8] sm:$0xf] %vm1096_vm0, %v1373_v49  ;;  %v863_v54 = vmax.f32 %v715_v50, 0.0  ;;  %v889_v55 = vmax.f32 %v819_v51, 0.0 }
 0x154   : > { %v719_v56 = vpop.f32.mrf.mxu0  ;;  %v823_v57 = vpop.f32.mrf.mxu1 }
 0x155   : > { %v1348_v58 = vpack.c.bf16 %v863_v54, %v863_v54  ;;  %v1374_v59 = vpack.c.bf16 %v889_v55, %v889_v55  ;;  %v720_v60 = vadd.f32 %v1691_v3, %v719_v56  ;;  %v824_v61 = vadd.f32 %v1691_v3, %v823_v57 }
 0x156   : > { %v721_v62 = vpop.f32.mrf.mxu0  ;;  %v825_v63 = vpop.f32.mrf.mxu1 }
 0x157   : > { %1114 = vst.msk [vmem:[%s1699_s28 + $0x44] sm:$0xf] %vm1096_vm0, %v1348_v58  ;;  %1140 = vst.msk [vmem:[%s1699_s28 + $0xac] sm:$0xf] %vm1096_vm0, %v1374_v59  ;;  %v864_v0 = vmax.f32 %v720_v60, 0.0  ;;  %v890_v1 = vmax.f32 %v824_v61, 0.0 }
 0x158   : > { %v722_v2 = vpop.f32.mrf.mxu0  ;;  %v826_v4 = vpop.f32.mrf.mxu1 }
 0x159   : > { %v1349_v5 = vpack.c.bf16 %v864_v0, %v864_v0  ;;  %v1375_v6 = vpack.c.bf16 %v890_v1, %v890_v1  ;;  %v723_v7 = vadd.f32 %v1691_v3, %v722_v2  ;;  %v827_v8 = vadd.f32 %v1691_v3, %v826_v4 }
 0x15a   : > { %v724_v9 = vpop.f32.mrf.mxu0  ;;  %v828_v10 = vpop.f32.mrf.mxu1 }
 0x15b   : > { %1115 = vst.msk [vmem:[%s1699_s28 + $0x48] sm:$0xf] %vm1096_vm0, %v1349_v5  ;;  %1141 = vst.msk [vmem:[%s1699_s28 + $0xb0] sm:$0xf] %vm1096_vm0, %v1375_v6  ;;  %v865_v11 = vmax.f32 %v723_v7, 0.0  ;;  %v891_v12 = vmax.f32 %v827_v8, 0.0 }
 0x15c   : > { %v727_v13 = vpop.f32.mrf.mxu0  ;;  %v831_v14 = vpop.f32.mrf.mxu1 }
 0x15d   : > { %v1350_v15 = vpack.c.bf16 %v865_v11, %v865_v11  ;;  %v1376_v16 = vpack.c.bf16 %v891_v12, %v891_v12  ;;  %v728_v17 = vadd.f32 %v1691_v3, %v727_v13  ;;  %v832_v18 = vadd.f32 %v1691_v3, %v831_v14 }
 0x15e   : > { %v729_v19 = vpop.f32.mrf.mxu0  ;;  %v833_v20 = vpop.f32.mrf.mxu1 }
 0x15f   : > { %1116 = vst.msk [vmem:[%s1699_s28 + $0x4c] sm:$0xf] %vm1096_vm0, %v1350_v15  ;;  %1142 = vst.msk [vmem:[%s1699_s28 + $0xb4] sm:$0xf] %vm1096_vm0, %v1376_v16  ;;  %v866_v21 = vmax.f32 %v728_v17, 0.0  ;;  %v892_v22 = vmax.f32 %v832_v18, 0.0 }
 0x160   : > { %v730_v23 = vpop.f32.mrf.mxu0  ;;  %v834_v24 = vpop.f32.mrf.mxu1 }
 0x161   : > { %v1351_v25 = vpack.c.bf16 %v866_v21, %v866_v21  ;;  %v1377_v26 = vpack.c.bf16 %v892_v22, %v892_v22  ;;  %v731_v27 = vadd.f32 %v1691_v3, %v730_v23  ;;  %v835_v28 = vadd.f32 %v1691_v3, %v834_v24 }
 0x162   : > { %v732_v29 = vpop.f32.mrf.mxu0  ;;  %v836_v30 = vpop.f32.mrf.mxu1 }
 0x163   : > { %1117 = vst.msk [vmem:[%s1699_s28 + $0x50] sm:$0xf] %vm1096_vm0, %v1351_v25  ;;  %1143 = vst.msk [vmem:[%s1699_s28 + $0xb8] sm:$0xf] %vm1096_vm0, %v1377_v26  ;;  %v867_v31 = vmax.f32 %v731_v27, 0.0  ;;  %v893_v32 = vmax.f32 %v835_v28, 0.0 }
 0x164   : > { %v735_v33 = vpop.f32.mrf.mxu0  ;;  %v839_v34 = vpop.f32.mrf.mxu1 }
 0x165   : > { %v1352_v35 = vpack.c.bf16 %v867_v31, %v867_v31  ;;  %v1378_v36 = vpack.c.bf16 %v893_v32, %v893_v32  ;;  %v736_v37 = vadd.f32 %v1691_v3, %v735_v33  ;;  %v840_v38 = vadd.f32 %v1691_v3, %v839_v34 }
 0x166   : > { %v737_v39 = vpop.f32.mrf.mxu0  ;;  %v841_v40 = vpop.f32.mrf.mxu1 }
 0x167   : > { %1118 = vst.msk [vmem:[%s1699_s28 + $0x54] sm:$0xf] %vm1096_vm0, %v1352_v35  ;;  %1144 = vst.msk [vmem:[%s1699_s28 + $0xbc] sm:$0xf] %vm1096_vm0, %v1378_v36  ;;  %v868_v41 = vmax.f32 %v736_v37, 0.0  ;;  %v894_v42 = vmax.f32 %v840_v38, 0.0 }
 0x168   : > { %v738_v43 = vpop.f32.mrf.mxu0  ;;  %v842_v44 = vpop.f32.mrf.mxu1 }
 0x169   : > { %v1353_v45 = vpack.c.bf16 %v868_v41, %v868_v41  ;;  %v1379_v46 = vpack.c.bf16 %v894_v42, %v894_v42  ;;  %v739_v47 = vadd.f32 %v1691_v3, %v738_v43  ;;  %v843_v48 = vadd.f32 %v1691_v3, %v842_v44 }
 0x16a   : > { %v740_v49 = vpop.f32.mrf.mxu0  ;;  %v844_v50 = vpop.f32.mrf.mxu1 }
 0x16b   : > { %1119 = vst.msk [vmem:[%s1699_s28 + $0x58] sm:$0xf] %vm1096_vm0, %v1353_v45  ;;  %1145 = vst.msk [vmem:[%s1699_s28 + $0xc0] sm:$0xf] %vm1096_vm0, %v1379_v46  ;;  %v869_v51 = vmax.f32 %v739_v47, 0.0  ;;  %v895_v52 = vmax.f32 %v843_v48, 0.0 }
 0x16c   : > { %v743_v53 = vpop.f32.mrf.mxu0 }
 0x16d   : > { %v1354_v54 = vpack.c.bf16 %v869_v51, %v869_v51  ;;  %v1380_v55 = vpack.c.bf16 %v895_v52, %v895_v52  ;;  %v744_v56 = vadd.f32 %v1691_v3, %v743_v53 }
 0x16e   : > { %v745_v57 = vpop.f32.mrf.mxu0 }
 0x16f   : > { %1120 = vst.msk [vmem:[%s1699_s28 + $0x5c] sm:$0xf] %vm1096_vm0, %v1354_v54  ;;  %1146 = vst.msk [vmem:[%s1699_s28 + $0xc4] sm:$0xf] %vm1096_vm0, %v1380_v55  ;;  %v870_v58 = vmax.f32 %v744_v56, 0.0 }
 0x170   : > { %v746_v59 = vpop.f32.mrf.mxu0 }
 0x171   : > { %v1355_v60 = vpack.c.bf16 %v870_v58, %v870_v58  ;;  %v747_v61 = vadd.f32 %v1691_v3, %v746_v59 }
 0x172   : > { %v748_v62 = vpop.f32.mrf.mxu0 }
 0x173   : > { %1121 = vst.msk [vmem:[%s1699_s28 + $0x60] sm:$0xf] %vm1096_vm0, %v1355_v60  ;;  %v871_v63 = vmax.f32 %v747_v61, 0.0 }
 0x175   : > { %v1356_v0 = vpack.c.bf16 %v871_v63, %v871_v63 }
 0x177   : > { %1122 = vst.msk [vmem:[%s1699_s28 + $0x64] sm:$0xf] %vm1096_vm0, %v1356_v0 }
 0x178 PF: > { %s13_s12 = sadd.s32 1, %s1519_s12  }
 0x179   : > { %p10_p4 = scmp.ge.s32.totalorder %s13_s12, 4  }
 0x17b   :  { %12 = sbr.rel (!%p10_p4) target bundleno = 1 (0x1), region = 62 }

// kernel: rnd_forward.13
= control target key start
LH: loop header
LB: loop body
LE: loop exit
PB: predicated region body
PF: predicated region fallthrough
CT: control target
= control target key end

     0   :  { %s1875_s12 = smov 0   ;;  %s2272_s0 = inlined_call_operand.vmem [shape: bf16[176,1024], index: 0, kind: input, shape index: {}]   ;;  %s2273_s1 = inlined_call_operand.vmem [shape: bf16[1024,64], index: 1, kind: input, shape index: {}]   ;;  %s2274_s2 = inlined_call_operand.vmem [shape: f32[1,64], index: 2, kind: input, shape index: {}]   ;;  %s2275_s3 = inlined_call_operand.vmem [shape: bf16[176,64], index: 3, kind: output, shape index: {}]  }
   0x1 LB: > { %s1413_s13 = sadd.s32 4294967295, %s1853_s12   ;;  %p1417_p0 = scmp.ge.s32.totalorder %s1853_s12, 1  ;;  %s1853_s12 = sphi %s1875_s12, %s13_s12  }
   0x2   : > { %p139_p1 = scmp.lt.s32.totalorder %s1853_s12, 3 }
   0x4   : > { %p140_p2 = pnand %p1417_p0, %p139_p1 }
   0x5   : > { %s164_s19 = smul.u32 (!%p140_p2), 11, %s1413_s13 }
   0x6   : > { %143 = sbr.rel (%p140_p2) target bundleno = 339 (0x153), region = 32 }
   0x7   : > { %p165_p3 = scmp.lt.s32.totalorder (!%p140_p2), %s164_s19, 21 }
   0xb   : > { %v1775_v0 = vld [vmem:[%s2273_s1 + $0x78] sm:$0xff]   ;;  %v1779_v4 = vld [vmem:[%s2273_s1 + $0x70] sm:$0xff]   ;;  %v1783_v8 = vld [vmem:[%s2273_s1 + $0x68] sm:$0xff]   ;;  %s2277_s19 = smov (!%p165_p3, %s164_s19), 21  ;;  %vm1345_vm0 = vcmask 519168  }
   0xc   : > { %v1776_v1 = vld [vmem:[%s2273_s1 + $0xf8] sm:$0xff]   ;;  %1559 = vmatprep.subr.bf16.mxu0 %v1775_v0  ;;  %v1780_v5 = vld [vmem:[%s2273_s1 + $0xf0] sm:$0xff]   ;;  %v1784_v9 = vld [vmem:[%s2273_s1 + $0xe8] sm:$0xff]   ;;  %s1547_s18 = sshll.u32 %s2277_s19, 5  ;;  %s1420_s25 = sshll.u32 %s2277_s19, 2 }
   0xd   : > { %v1777_v2 = vld [vmem:[%s2273_s1 + $0x38] sm:$0xff]   ;;  %1611 = vmatprep.subr.bf16.mxu1 %v1776_v1  ;;  %v1781_v6 = vld [vmem:[%s2273_s1 + $0x30] sm:$0xff]   ;;  %v1785_v10 = vld [vmem:[%s2273_s1 + $0x28] sm:$0xff]   ;;  %s1981_s13 = scalar_lea.vmem %s2272_s0, %s1547_s18  ;;  %s2208_s28 = scalar_lea.vmem %s2275_s3, %s1420_s25 }
   0xe   : > { %v1778_v3 = vld [vmem:[%s2273_s1 + $0xb8] sm:$0xff]   ;;  %1560 = vmatpush3.bf16.msra.mxu0 %v1777_v2  ;;  %v1782_v7 = vld [vmem:[%s2273_s1 + $0xb0] sm:$0xff]   ;;  %v1786_v11 = vld [vmem:[%s2273_s1 + $0xa8] sm:$0xff]  }
   0xf   : > { %1612 = vmatpush3.bf16.msra.mxu1 %v1778_v3  ;;  %1561 = vmatprep.subr.bf16.mxu0 %v1779_v4  ;;  %v1787_v12 = vld [vmem:[%s2273_s1 + $0x60] sm:$0xff]   ;;  %v1791_v16 = vld [vmem:[%s2273_s1 + $0x58] sm:$0xff]   ;;  %v1795_v20 = vld [vmem:[%s2273_s1 + $0x50] sm:$0xff]  }
  0x10   : > { %1613 = vmatprep.subr.bf16.mxu1 %v1780_v5  ;;  %v1788_v13 = vld [vmem:[%s2273_s1 + $0xe0] sm:$0xff]   ;;  %v1792_v17 = vld [vmem:[%s2273_s1 + $0xd8] sm:$0xff]   ;;  %v1796_v21 = vld [vmem:[%s2273_s1 + $0xd0] sm:$0xff]  }
  0x11   : > { %v1789_v14 = vld [vmem:[%s2273_s1 + $0x20] sm:$0xff]   ;;  %v1793_v18 = vld [vmem:[%s2273_s1 + $0x18] sm:$0xff]   ;;  %v1797_v22 = vld [vmem:[%s2273_s1 + $0x10] sm:$0xff]  }
  0x12   : > { %1562 = vmatpush3.bf16.msra.mxu0 %v1781_v6  ;;  %v1790_v15 = vld [vmem:[%s2273_s1 + $0xa0] sm:$0xff]   ;;  %v1794_v19 = vld [vmem:[%s2273_s1 + $0x98] sm:$0xff]   ;;  %v1798_v23 = vld [vmem:[%s2273_s1 + $0x90] sm:$0xff]  }
  0x13   : > { %1614 = vmatpush3.bf16.msra.mxu1 %v1782_v7  ;;  %1563 = vmatprep.subr.bf16.mxu0 %v1783_v8  ;;  %v1799_v24 = vld [vmem:[%s2273_s1 + $0x48] sm:$0xff]   ;;  %v1803_v28 = vld [vmem:[%s2273_s1 + $0x40] sm:$0xff]   ;;  %v1807_v40 = vld [vmem:[%s2273_s1 + $0x178] sm:$0xff]  }
  0x14   : > { %1615 = vmatprep.subr.bf16.mxu1 %v1784_v9  ;;  %v1800_v25 = vld [vmem:[%s2273_s1 + $0xc8] sm:$0xff]   ;;  %v1804_v29 = vld [vmem:[%s2273_s1 + $0xc0] sm:$0xff]   ;;  %v1808_v41 = vld [vmem:[%s2273_s1 + $0x138] sm:$0xff]  }
  0x15   : > { %v1801_v26 = vld [vmem:[%s2273_s1 + $0x8] sm:$0xff]   ;;  %v1805_v30 = vld [vmem:[%s2273_s1] sm:$0xff]   ;;  %v1809_v42 = vld [vmem:[%s2273_s1 + $0x1f8] sm:$0xff]  }
  0x16   : > { %1564 = vmatpush3.bf16.msra.mxu0 %v1785_v10  ;;  %v1802_v27 = vld [vmem:[%s2273_s1 + $0x88] sm:$0xff]   ;;  %v1806_v31 = vld [vmem:[%s2273_s1 + $0x80] sm:$0xff]   ;;  %v1810_v43 = vld [vmem:[%s2273_s1 + $0x1b8] sm:$0xff]  }
  0x17   : > { %1616 = vmatpush3.bf16.msra.mxu1 %v1786_v11  ;;  %1565 = vmatprep.subr.bf16.mxu0 %v1787_v12  ;;  %v178_v32 = vld [vmem:[%s1981_s13] sm:$0xff]  ;;  %v179_v34 = vld [vmem:[%s1981_s13 + $0x8] sm:$0xff]  ;;  %v1811_v44 = vld [vmem:[%s2273_s1 + $0x170] sm:$0xff]  }
  0x18   : > { %1617 = vmatprep.subr.bf16.mxu1 %v1788_v13  ;;  %v182_v33 = vld [vmem:[%s1981_s13 + $0x20] sm:$0xff]  ;;  %v183_v37 = vld [vmem:[%s1981_s13 + $0x28] sm:$0xff]  ;;  %v1812_v51 = vld [vmem:[%s2273_s1 + $0x130] sm:$0xff]  }
  0x19   : > { %v1422_v35 = vcombine.low %v178_v32, %v182_v33  ;;  %v1423_v36 = vcombine.high %v178_v32, %v182_v33  ;;  %v1424_v38 = vcombine.low %v179_v34, %v183_v37  ;;  %v1425_v39 = vcombine.high %v179_v34, %v183_v37  ;;  %v186_v45 = vld [vmem:[%s1981_s13 + $0x40] sm:$0xff]  ;;  %v187_v48 = vld [vmem:[%s1981_s13 + $0x48] sm:$0xff]  ;;  %v1813_v54 = vld [vmem:[%s2273_s1 + $0x1f0] sm:$0xff]  }
  0x1a   : > { %1566 = vmatpush3.bf16.msra.mxu0 %v1789_v14  ;;  %v190_v46 = vld [vmem:[%s1981_s13 + $0x60] sm:$0xff]  ;;  %v191_v49 = vld [vmem:[%s1981_s13 + $0x68] sm:$0xff]  ;;  %v1814_v55 = vld [vmem:[%s2273_s1 + $0x1b0] sm:$0xff]  }
  0x1b   : > { %1618 = vmatpush3.bf16.msra.mxu1 %v1790_v15  ;;  %1567 = vmatprep.subr.bf16.mxu0 %v1791_v16  ;;  %v1431_v47 = vcombine.high %v186_v45, %v190_v46  ;;  %v1433_v50 = vcombine.high %v187_v48, %v191_v49  ;;  %v1430_v52 = vcombine.low %v186_v45, %v190_v46  ;;  %v1815_v56 = vld [vmem:[%s2273_s1 + $0x168] sm:$0xff]   ;;  %v194_v59 = vld [vmem:[%s1981_s13 + $0x80] sm:$0xff]  ;;  %v1823_v14 = vld [vmem:[%s2273_s1 + $0x158] sm:$0xff]  }
  0x1c   : > { %1619 = vmatprep.subr.bf16.mxu1 %v1792_v17  ;;  %1001 = vmatprep.mubr.bf16.mxu0 %v1423_v36  ;;  %v1432_v53 = vcombine.low %v187_v48, %v191_v49  ;;  %v1816_v57 = vld [vmem:[%s2273_s1 + $0x128] sm:$0xff]   ;;  %v198_v60 = vld [vmem:[%s1981_s13 + $0xa0] sm:$0xff]  ;;  %v1824_v15 = vld [vmem:[%s2273_s1 + $0x118] sm:$0xff]  }
  0x1d   : > { %1081 = vmatprep.mubr.bf16.mxu1 %v1425_v39  ;;  %v1817_v58 = vld [vmem:[%s2273_s1 + $0x1e8] sm:$0xff]   ;;  %v1439_v63 = vcombine.high %v194_v59, %v198_v60  ;;  %v1438_v2 = vcombine.low %v194_v59, %v198_v60  ;;  %v1819_v3 = vld [vmem:[%s2273_s1 + $0x160] sm:$0xff]   ;;  %v1825_v17 = vld [vmem:[%s2273_s1 + $0x1d8] sm:$0xff]  }
  0x1e   : > { %1568 = vmatpush3.bf16.msra.mxu0 %v1793_v18  ;;  %v195_v61 = vld [vmem:[%s1981_s13 + $0x88] sm:$0xff]  ;;  %v1820_v5 = vld [vmem:[%s2273_s1 + $0x120] sm:$0xff]   ;;  %v184_v45 = vld [vmem:[%s1981_s13 + $0x30] sm:$0xff] }
  0x1f   : > { %1620 = vmatpush3.bf16.msra.mxu1 %v1794_v19  ;;  %1569 = vmatprep.subr.bf16.mxu0 %v1795_v20  ;;  %v199_v62 = vld [vmem:[%s1981_s13 + $0xa8] sm:$0xff]  ;;  %v1821_v6 = vld [vmem:[%s2273_s1 + $0x1e0] sm:$0xff]   ;;  %v1826_v19 = vld [vmem:[%s2273_s1 + $0x198] sm:$0xff]  }
  0x20   : > { %1621 = vmatprep.subr.bf16.mxu1 %v1796_v21  ;;  %v1441_v0 = vcombine.high %v195_v61, %v199_v62  ;;  %v1818_v1 = vld [vmem:[%s2273_s1 + $0x1a8] sm:$0xff]   ;;  %v1440_v4 = vcombine.low %v195_v61, %v199_v62  ;;  %v1822_v7 = vld [vmem:[%s2273_s1 + $0x1a0] sm:$0xff]   ;;  %v1827_v20 = vld [vmem:[%s2273_s1 + $0x150] sm:$0xff]  }
  0x21   : > { %v202_v8 = vld [vmem:[%s1981_s13 + $0xc0] sm:$0xff]  ;;  %v203_v10 = vld [vmem:[%s1981_s13 + $0xc8] sm:$0xff]  ;;  %v185_v48 = vld [vmem:[%s1981_s13 + $0x38] sm:$0xff] }
  0x22   : > { %1570 = vmatpush3.bf16.msra.mxu0 %v1797_v22  ;;  %v206_v9 = vld [vmem:[%s1981_s13 + $0xe0] sm:$0xff]  ;;  %v207_v12 = vld [vmem:[%s1981_s13 + $0xe8] sm:$0xff]  ;;  %v196_v60 = vld [vmem:[%s1981_s13 + $0x90] sm:$0xff] }
  0x23   : > { %1622 = vmatpush3.bf16.msra.mxu1 %v1798_v23  ;;  %1571 = vmatprep.subr.bf16.mxu0 %v1799_v24  ;;  %v1447_v11 = vcombine.high %v202_v8, %v206_v9  ;;  %v1449_v13 = vcombine.high %v203_v10, %v207_v12  ;;  %v1446_v16 = vcombine.low %v202_v8, %v206_v9  ;;  %v210_v21 = vld [vmem:[%s1981_s13 + $0x100] sm:$0xff]  ;;  %v211_v24 = vld [vmem:[%s1981_s13 + $0x108] sm:$0xff]  ;;  %v200_v61 = vld [vmem:[%s1981_s13 + $0xb0] sm:$0xff] }
  0x24   : > { %1623 = vmatprep.subr.bf16.mxu1 %v1800_v25  ;;  %v1448_v18 = vcombine.low %v203_v10, %v207_v12  ;;  %v214_v22 = vld [vmem:[%s1981_s13 + $0x120] sm:$0xff]  ;;  %v215_v25 = vld [vmem:[%s1981_s13 + $0x128] sm:$0xff]  ;;  %v197_v62 = vld [vmem:[%s1981_s13 + $0x98] sm:$0xff]  ;;  %v1442_v8 = vcombine.low %v196_v60, %v200_v61 }
  0x25   : > { %v1455_v23 = vcombine.high %v210_v21, %v214_v22  ;;  %v1832_v32 = vld [vmem:[%s2273_s1 + $0x108] sm:$0xff]   ;;  %v1456_v33 = vcombine.low %v211_v24, %v215_v25  ;;  %v212_v12 = vld [vmem:[%s1981_s13 + $0x110] sm:$0xff] }
  0x26   : > { %1572 = vmatpush3.bf16.msra.mxu0 %v1801_v26  ;;  %v1457_v26 = vcombine.high %v211_v24, %v215_v25  ;;  %v1833_v34 = vld [vmem:[%s2273_s1 + $0x1c8] sm:$0xff]  }
  0x27   : > { %1624 = vmatpush3.bf16.msra.mxu1 %v1802_v27  ;;  %1573 = vmatprep.subr.bf16.mxu0 %v1803_v28  ;;  %v1828_v27 = vld [vmem:[%s2273_s1 + $0x110] sm:$0xff]   ;;  %v219_v37 = vld [vmem:[%s1981_s13 + $0x148] sm:$0xff] }
  0x28   : > { %1625 = vmatprep.subr.bf16.mxu1 %v1804_v29  ;;  %v1829_v28 = vld [vmem:[%s2273_s1 + $0x1d0] sm:$0xff]   ;;  %v1836_v39 = vld [vmem:[%s2273_s1 + $0x188] sm:$0xff]   ;;  %v1464_v49 = vcombine.low %v219_v37, %v219_v37 }
  0x29   : > { %v1830_v29 = vld [vmem:[%s2273_s1 + $0x190] sm:$0xff]  }
  0x2a   : > { %1574 = vmatpush3.bf16.msra.mxu0 %v1805_v30  ;;  %v1831_v30 = vld [vmem:[%s2273_s1 + $0x148] sm:$0xff]  }
  0x2b   : > { %1626 = vmatpush3.bf16.msra.mxu1 %v1806_v31  ;;  %1663 = vmatprep.subr.bf16.mxu0 %v1807_v40  ;;  %v1454_v31 = vcombine.low %v210_v21, %v214_v22  ;;  %v1839_v40 = vld [vmem:[%s2273_s1 + $0x140] sm:$0xff]   ;;  %v221_v21 = vld [vmem:[%s1981_s13 + $0x158] sm:$0xff] }
  0x2c   : > { %1715 = vmatprep.subr.bf16.mxu1 %v1809_v42  ;;  %v1841_v42 = vld [vmem:[%s2273_s1 + $0x1c0] sm:$0xff]   ;;  %v1469_v25 = vcombine.high %v221_v21, %v221_v21 }
  0x2d   : > { %1002 = vmatmul.mubr.bf16.vlgmr.msra.gmra.mxu0 %v1422_v35  ;;  %v218_v35 = vld [vmem:[%s1981_s13 + $0x140] sm:$0xff] }
  0x2e   : > { %1082 = vmatmul.mubr.bf16.vlgmr.msra.gmra.mxu1 %v1424_v38  ;;  %1664 = vmatpush3.bf16.msra.mxu0 %v1808_v41  ;;  %v1463_v36 = vcombine.high %v218_v35, %v218_v35  ;;  %v1465_v38 = vcombine.high %v219_v37, %v219_v37  ;;  %v1840_v41 = vld [vmem:[%s2273_s1 + $0x100] sm:$0xff]   ;;  %v1462_v46 = vcombine.low %v218_v35, %v218_v35 }
  0x2f   : > { %1716 = vmatpush3.bf16.msra.mxu1 %v1810_v43  ;;  %1665 = vmatprep.subr.bf16.mxu0 %v1811_v44  ;;  %v1842_v43 = vld [vmem:[%s2273_s1 + $0x180] sm:$0xff]   ;;  %v180_v44 = vld [vmem:[%s1981_s13 + $0x10] sm:$0xff] }
  0x30   : > { %1009 = vmatprep.mubr.bf16.mxu0 %v1431_v47  ;;  %1089 = vmatprep.mubr.bf16.mxu1 %v1433_v50  ;;  %v181_v47 = vld [vmem:[%s1981_s13 + $0x18] sm:$0xff]  ;;  %v1427_v50 = vcombine.high %v180_v44, %v184_v45 }
  0x31   : > { %1717 = vmatprep.subr.bf16.mxu1 %v1813_v54  ;;  %v189_v54 = vld [vmem:[%s1981_s13 + $0x58] sm:$0xff] }
  0x32   : > { %1666 = vmatpush3.bf16.msra.mxu0 %v1812_v51  ;;  %v1429_v51 = vcombine.high %v181_v47, %v185_v48 }
  0x33   : > { %1718 = vmatpush3.bf16.msra.mxu1 %v1814_v55  ;;  %1667 = vmatprep.subr.bf16.mxu0 %v1815_v56  ;;  %v193_v55 = vld [vmem:[%s1981_s13 + $0x78] sm:$0xff]  ;;  %v1426_v56 = vcombine.low %v180_v44, %v184_v45 }
  0x34   : > { %1719 = vmatprep.subr.bf16.mxu1 %v1817_v58  ;;  %v1437_v59 = vcombine.high %v189_v54, %v193_v55 }
  0x35   : > { %1010 = vmatmul.mubr.bf16.gmra.mxu0 %v1430_v52  ;;  %v188_v52 = vld [vmem:[%s1981_s13 + $0x50] sm:$0xff] }
  0x36   : > { %1090 = vmatmul.mubr.bf16.gmra.mxu1 %v1432_v53  ;;  %1668 = vmatpush3.bf16.msra.mxu0 %v1816_v57  ;;  %v192_v53 = vld [vmem:[%s1981_s13 + $0x70] sm:$0xff]  ;;  %v1428_v57 = vcombine.low %v181_v47, %v185_v48 }
  0x37   : > { %1017 = vmatprep.mubr.bf16.mxu0 %v1439_v63  ;;  %1097 = vmatprep.mubr.bf16.mxu1 %v1441_v0  ;;  %v1435_v58 = vcombine.high %v188_v52, %v192_v53  ;;  %v201_v63 = vld [vmem:[%s1981_s13 + $0xb8] sm:$0xff]  ;;  %v1434_v0 = vcombine.low %v188_v52, %v192_v53 }
  0x38   : > { %1720 = vmatpush3.bf16.msra.mxu1 %v1818_v1  ;;  %1669 = vmatprep.subr.bf16.mxu0 %v1819_v3  ;;  %v1436_v1 = vcombine.low %v189_v54, %v193_v55  ;;  %v1445_v3 = vcombine.high %v197_v62, %v201_v63  ;;  %v1444_v9 = vcombine.low %v197_v62, %v201_v63 }
  0x39   : > { %1721 = vmatprep.subr.bf16.mxu1 %v1821_v6  ;;  %v205_v6 = vld [vmem:[%s1981_s13 + $0xd8] sm:$0xff] }
  0x3a   : > { %1670 = vmatpush3.bf16.msra.mxu0 %v1820_v5  ;;  %v208_v5 = vld [vmem:[%s1981_s13 + $0xf0] sm:$0xff] }
  0x3b   : > { %1671 = vmatprep.subr.bf16.mxu0 %v1823_v14  ;;  %v213_v14 = vld [vmem:[%s1981_s13 + $0x118] sm:$0xff] }
  0x3c   : > { %1722 = vmatpush3.bf16.msra.mxu1 %v1822_v7  ;;  %v209_v7 = vld [vmem:[%s1981_s13 + $0xf8] sm:$0xff] }
  0x3d   : > { %1018 = vmatmul.mubr.bf16.gmra.mxu0 %v1438_v2  ;;  %1723 = vmatprep.subr.bf16.mxu1 %v1825_v17  ;;  %v1443_v2 = vcombine.high %v196_v60, %v200_v61  ;;  %v1452_v17 = vcombine.low %v205_v6, %v209_v7 }
  0x3e   : > { %1098 = vmatmul.mubr.bf16.gmra.mxu1 %v1440_v4  ;;  %1025 = vmatprep.mubr.bf16.mxu0 %v1447_v11  ;;  %v204_v4 = vld [vmem:[%s1981_s13 + $0xd0] sm:$0xff]  ;;  %v1453_v11 = vcombine.high %v205_v6, %v209_v7 }
  0x3f   : > { %1105 = vmatprep.mubr.bf16.mxu1 %v1449_v13  ;;  %1672 = vmatpush3.bf16.msra.mxu0 %v1824_v15  ;;  %v1451_v10 = vcombine.high %v204_v4, %v208_v5  ;;  %v216_v13 = vld [vmem:[%s1981_s13 + $0x130] sm:$0xff]  ;;  %v217_v15 = vld [vmem:[%s1981_s13 + $0x138] sm:$0xff] }
  0x40   : > { %1724 = vmatpush3.bf16.msra.mxu1 %v1826_v19  ;;  %1673 = vmatprep.subr.bf16.mxu0 %v1827_v20  ;;  %v1461_v19 = vcombine.high %v213_v14, %v217_v15  ;;  %v220_v20 = vld [vmem:[%s1981_s13 + $0x150] sm:$0xff]  ;;  %v1458_v22 = vcombine.low %v212_v12, %v216_v13 }
  0x41   : > { %1725 = vmatprep.subr.bf16.mxu1 %v1829_v28  ;;  %v1467_v24 = vcombine.high %v220_v20, %v220_v20 }
  0x43   : > { %1674 = vmatpush3.bf16.msra.mxu0 %v1828_v27  ;;  %v1468_v27 = vcombine.low %v221_v21, %v221_v21 }
  0x44   : > { %1726 = vmatpush3.bf16.msra.mxu1 %v1830_v29  ;;  %1675 = vmatprep.subr.bf16.mxu0 %v1831_v30 }
  0x45   : > { %1026 = vmatmul.mubr.bf16.gmra.mxu0 %v1446_v16  ;;  %1727 = vmatprep.subr.bf16.mxu1 %v1833_v34  ;;  %v1450_v16 = vcombine.low %v204_v4, %v208_v5 }
  0x46   : > { %1106 = vmatmul.mubr.bf16.gmra.mxu1 %v1448_v18  ;;  %1033 = vmatprep.mubr.bf16.mxu0 %v1455_v23  ;;  %v1459_v18 = vcombine.high %v212_v12, %v216_v13  ;;  %v1460_v23 = vcombine.low %v213_v14, %v217_v15 }
  0x47   : > { %1113 = vmatprep.mubr.bf16.mxu1 %v1457_v26  ;;  %1676 = vmatpush3.bf16.msra.mxu0 %v1832_v32  ;;  %v1466_v26 = vcombine.low %v220_v20, %v220_v20 }
  0x48   : > { %1728 = vmatpush3.bf16.msra.mxu1 %v1836_v39  ;;  %1677 = vmatprep.subr.bf16.mxu0 %v1839_v40 }
  0x49   : > { %1729 = vmatprep.subr.bf16.mxu1 %v1841_v42 }
  0x4b   : > { %1678 = vmatpush3.bf16.msra.mxu0 %v1840_v41 }
  0x4c   : > { %1730 = vmatpush3.bf16.msra.mxu1 %v1842_v43 }
  0x4d   : > { %1034 = vmatmul.mubr.bf16.gmra.mxu0 %v1454_v31 }
  0x4e   : > { %1114 = vmatmul.mubr.bf16.gmra.mxu1 %v1456_v33  ;;  %1041 = vmatprep.mubr.bf16.mxu0 %v1463_v36 }
  0x4f   : > { %1121 = vmatprep.mubr.bf16.mxu1 %v1465_v38 }
  0x55   : > { %1042 = vmatmul.mubr.bf16.gmra.mxu0 %v1462_v46 }
  0x56   : > { %1122 = vmatmul.mubr.bf16.gmra.mxu1 %v1464_v49  ;;  %1161 = vmatprep.mubr.bf16.mxu0 %v1427_v50 }
  0x57   : > { %1241 = vmatprep.mubr.bf16.mxu1 %v1429_v51 }
  0x5d   : > { %1162 = vmatmul.mubr.bf16.vlgmr.msra.gmra.mxu0 %v1426_v56 }
  0x5e   : > { %1242 = vmatmul.mubr.bf16.vlgmr.msra.gmra.mxu1 %v1428_v57  ;;  %1169 = vmatprep.mubr.bf16.mxu0 %v1435_v58 }
  0x5f   : > { %1249 = vmatprep.mubr.bf16.mxu1 %v1437_v59 }
  0x65   : > { %1170 = vmatmul.mubr.bf16.gmra.mxu0 %v1434_v0 }
  0x66   : > { %1250 = vmatmul.mubr.bf16.gmra.mxu1 %v1436_v1  ;;  %1177 = vmatprep.mubr.bf16.mxu0 %v1443_v2 }
  0x67   : > { %1257 = vmatprep.mubr.bf16.mxu1 %v1445_v3 }
  0x6d   : > { %1178 = vmatmul.mubr.bf16.gmra.mxu0 %v1442_v8 }
  0x6e   : > { %1258 = vmatmul.mubr.bf16.gmra.mxu1 %v1444_v9  ;;  %1185 = vmatprep.mubr.bf16.mxu0 %v1451_v10  ;;  %v2196_v9 = vld [vmem:[%s2274_s2] ss:$0 sm:$0xff] }
  0x6f   : > { %1265 = vmatprep.mubr.bf16.mxu1 %v1453_v11 }
  0x75   : > { %1186 = vmatmul.mubr.bf16.gmra.mxu0 %v1450_v16 }
  0x76   : > { %1266 = vmatmul.mubr.bf16.gmra.mxu1 %v1452_v17  ;;  %1193 = vmatprep.mubr.bf16.mxu0 %v1459_v18 }
  0x77   : > { %1273 = vmatprep.mubr.bf16.mxu1 %v1461_v19 }
  0x7d   : > { %1194 = vmatmul.mubr.bf16.gmra.mxu0 %v1458_v22 }
  0x7e   : > { %1274 = vmatmul.mubr.bf16.gmra.mxu1 %v1460_v23  ;;  %1201 = vmatprep.mubr.bf16.mxu0 %v1467_v24 }
  0x7f   : > { %1281 = vmatprep.mubr.bf16.mxu1 %v1469_v25 }
  0x85   : > { %1202 = vmatmul.mubr.bf16.gmra.mxu0 %v1466_v26 }
  0x86   : > { %1282 = vmatmul.mubr.bf16.gmra.mxu1 %v1468_v27 }
  0xed   : > { %v1575_v28 = vpop.f32.mrf.mxu0 }
  0xee   : > { %v1627_v29 = vpop.f32.mrf.mxu1 }
  0xef   : > { %v1576_v30 = vpop.f32.mrf.mxu0 }
  0xf0   : > { %v1628_v31 = vpop.f32.mrf.mxu1  ;;  %v1577_v7 = vadd.f32 %v1576_v30, %v1575_v28 }
  0xf1   : > { %v1578_v32 = vpop.f32.mrf.mxu0  ;;  %v1629_v17 = vadd.f32 %v1628_v31, %v1627_v29 }
  0xf2   : > { %v1630_v33 = vpop.f32.mrf.mxu1  ;;  %v1004_v13 = vadd.f32 %v1577_v7, %v2196_v9 }
  0xf3   : > { %v1579_v34 = vpop.f32.mrf.mxu0 }
  0xf4   : > { %v1631_v35 = vpop.f32.mrf.mxu1  ;;  %v1580_v14 = vadd.f32 %v1579_v34, %v1578_v32  ;;  %v1084_v21 = vadd.f32 %v1629_v17, %v1004_v13 }
  0xf5   : > { %v1581_v36 = vpop.f32.mrf.mxu0  ;;  %v1632_v26 = vadd.f32 %v1631_v35, %v1630_v33 }
  0xf6   : > { %v2129_v37 = vpop.f32.mrf.mxu1  ;;  %v1007_v22 = vadd.f32 %v1580_v14, %v2196_v9 }
  0xf7   : > { %v1582_v38 = vpop.f32.mrf.mxu0 }
  0xf8   : > { %v2131_v39 = vpop.f32.mrf.mxu1  ;;  %v1583_v19 = vadd.f32 %v1582_v38, %v1581_v36 }
  0xf9   : > { %v1584_v40 = vpop.f32.mrf.mxu0  ;;  %v1635_v38 = vadd.f32 %v2131_v39, %v2129_v37 }
  0xfa   : > { %v2133_v41 = vpop.f32.mrf.mxu1  ;;  %v1012_v7 = vadd.f32 %v1583_v19, %v2196_v9 }
  0xfb   : > { %v1585_v42 = vpop.f32.mrf.mxu0 }
  0xfc   : > { %v2135_v43 = vpop.f32.mrf.mxu1  ;;  %v1586_v32 = vadd.f32 %v1585_v42, %v1584_v40  ;;  %v1092_v35 = vadd.f32 %v1635_v38, %v1012_v7 }
  0xfd   : > { %v2137_v44 = vpop.f32.mrf.mxu0 }
  0xfe   : > { %v2139_v45 = vpop.f32.mrf.mxu1 }
  0xff   : > { %v2141_v46 = vpop.f32.mrf.mxu0 }
 0x100   : > { %v2143_v47 = vpop.f32.mrf.mxu1  ;;  %v1589_v42 = vadd.f32 %v2141_v46, %v2137_v44 }
 0x101   : > { %v2145_v48 = vpop.f32.mrf.mxu0 }
 0x102   : > { %v2147_v49 = vpop.f32.mrf.mxu1  ;;  %v1020_v46 = vadd.f32 %v1589_v42, %v2196_v9 }
 0x103   : > { %v2149_v50 = vpop.f32.mrf.mxu0 }
 0x104   : > { %v2151_v51 = vpop.f32.mrf.mxu1 }
 0x105   : > { %v2153_v52 = vpop.f32.mrf.mxu0 }
 0x106   : > { %v2155_v53 = vpop.f32.mrf.mxu1 }
 0x107   : > { %v2157_v54 = vpop.f32.mrf.mxu0 }
 0x108   : > { %v2159_v55 = vpop.f32.mrf.mxu1 }
 0x109   : > { %v2161_v56 = vpop.f32.mrf.mxu0 }
 0x10a   : > { %v2163_v57 = vpop.f32.mrf.mxu1 }
 0x10b   : > { %v2165_v58 = vpop.f32.mrf.mxu0 }
 0x10c   : > { %v2167_v59 = vpop.f32.mrf.mxu1 }
 0x10d   : > { %v2169_v60 = vpop.f32.mrf.mxu0 }
 0x10e   : > { %v2171_v61 = vpop.f32.mrf.mxu1 }
 0x10f   : > { %v2173_v62 = vpop.f32.mrf.mxu0 }
 0x110   : > { %v2175_v63 = vpop.f32.mrf.mxu1 }
 0x111   : > { %v2177_v0 = vpop.f32.mrf.mxu0 }
 0x112   : > { %v2179_v1 = vpop.f32.mrf.mxu1 }
 0x113   : > { %v2181_v2 = vpop.f32.mrf.mxu0 }
 0x114   : > { %v2183_v3 = vpop.f32.mrf.mxu1 }
 0x115   : > { %v2185_v4 = vpop.f32.mrf.mxu0 }
 0x116   : > { %v2187_v5 = vpop.f32.mrf.mxu1 }
 0x117   : > { %v2189_v6 = vpop.f32.mrf.mxu0 }
 0x118   : > { %v2191_v8 = vpop.f32.mrf.mxu1 }
 0x119   : > { %v1608_v10 = vpop.f32.mrf.mxu0 }
 0x11a   : > { %v1660_v11 = vpop.f32.mrf.mxu1  ;;  %v1087_v10 = vadd.f32 %v1632_v26, %v1007_v22 }
 0x11b   : > { %v1609_v12 = vpop.f32.mrf.mxu0 }
 0x11c   : > { %v1661_v15 = vpop.f32.mrf.mxu1 }
 0x11d   : > { %v1679_v16 = vpop.f32.mrf.mxu0  ;;  %v1015_v15 = vadd.f32 %v1586_v32, %v2196_v9 }
 0x11e   : > { %v1731_v18 = vpop.f32.mrf.mxu1 }
 0x11f   : > { %v1680_v20 = vpop.f32.mrf.mxu0 }
 0x120   : > { %v1681_v23 = vadd.f32 %v1680_v20, %v1679_v16  ;;  %v1732_v24 = vpop.f32.mrf.mxu1 }
 0x121   : > { %v1682_v25 = vpop.f32.mrf.mxu0  ;;  %v1733_v28 = vadd.f32 %v1732_v24, %v1731_v18  ;;  %v1638_v18 = vadd.f32 %v2135_v43, %v2133_v41  ;;  %v1641_v43 = vadd.f32 %v2143_v47, %v2139_v45  ;;  %v1644_v45 = vadd.f32 %v2151_v51, %v2147_v49 }
 0x122   : > { %v1164_v27 = vadd.f32 %v1681_v23, %v1084_v21  ;;  %v1734_v30 = vpop.f32.mrf.mxu1  ;;  %v1647_v49 = vadd.f32 %v2159_v55, %v2155_v53  ;;  %v1650_v55 = vadd.f32 %v2167_v59, %v2163_v57  ;;  %v1653_v57 = vadd.f32 %v2175_v63, %v2171_v61 }
 0x123   : > { %v1683_v34 = vpop.f32.mrf.mxu0  ;;  %v1095_v24 = vadd.f32 %v1638_v18, %v1015_v15  ;;  %v1656_v61 = vadd.f32 %v2183_v3, %v2179_v1  ;;  %v1659_v1 = vadd.f32 %v2191_v8, %v2187_v5 }
 0x124   : > { %v1244_v29 = vadd.f32 %v1733_v28, %v1164_v27  ;;  %v1684_v31 = vadd.f32 %v1683_v34, %v1682_v25  ;;  %v1735_v36 = vpop.f32.mrf.mxu1  ;;  %v1592_v25 = vadd.f32 %v2149_v50, %v2145_v48  ;;  %v1595_v50 = vadd.f32 %v2157_v54, %v2153_v52 }
 0x125   : > { %v1685_v11 = vpop.f32.mrf.mxu0  ;;  %v1736_v14 = vadd.f32 %v1735_v36, %v1734_v30 }
 0x126   : > { %v1289_v12 = vmax.f32 %v1244_v29, 0.0  ;;  %v1167_v13 = vadd.f32 %v1684_v31, %v1087_v10  ;;  %v1737_v33 = vpop.f32.mrf.mxu1  ;;  %v1023_v48 = vadd.f32 %v1592_v25, %v2196_v9  ;;  %v1100_v31 = vadd.f32 %v1641_v43, %v1020_v46 }
 0x127   : > { %v1686_v40 = vpop.f32.mrf.mxu0  ;;  %v1028_v52 = vadd.f32 %v1595_v50, %v2196_v9 }
 0x128   : > { %v1548_v37 = vpack.c.bf16 %v1289_v12, %v1289_v12  ;;  %v1247_v39 = vadd.f32 %v1736_v14, %v1167_v13  ;;  %v1687_v16 = vadd.f32 %v1686_v40, %v1685_v11  ;;  %v1738_v17 = vpop.f32.mrf.mxu1  ;;  %v1103_v15 = vadd.f32 %v1644_v45, %v1023_v48 }
 0x129   : > { %v1688_v19 = vpop.f32.mrf.mxu0  ;;  %v1739_v22 = vadd.f32 %v1738_v17, %v1737_v33  ;;  %v1598_v40 = vadd.f32 %v2165_v58, %v2161_v56 }
 0x12a   : > { %1346 = vst.msk [vmem:[%s2208_s28] sm:$0xf] %vm1345_vm0, %v1548_v37  ;;  %v1290_v20 = vmax.f32 %v1247_v39, 0.0  ;;  %v1172_v21 = vadd.f32 %v1687_v16, %v1092_v35  ;;  %v1740_v23 = vpop.f32.mrf.mxu1 }
 0x12b   : > { %v1689_v44 = vpop.f32.mrf.mxu0  ;;  %v1031_v58 = vadd.f32 %v1598_v40, %v2196_v9 }
 0x12c   : > { %v1549_v26 = vpack.c.bf16 %v1290_v20, %v1290_v20  ;;  %v1252_v27 = vadd.f32 %v1739_v22, %v1172_v21  ;;  %v1690_v28 = vadd.f32 %v1689_v44, %v1688_v19  ;;  %v1741_v30 = vpop.f32.mrf.mxu1  ;;  %v1108_v21 = vadd.f32 %v1647_v49, %v1028_v52 }
 0x12d   : > { %v1691_v41 = vpop.f32.mrf.mxu0  ;;  %v1742_v34 = vadd.f32 %v1741_v30, %v1740_v23  ;;  %v1601_v22 = vadd.f32 %v2173_v62, %v2169_v60  ;;  %v1604_v62 = vadd.f32 %v2181_v2, %v2177_v0 }
 0x12e   : > { %1347 = vst.msk [vmem:[%s2208_s28 + $0x4] sm:$0xf] %vm1345_vm0, %v1549_v26  ;;  %v1291_v7 = vmax.f32 %v1252_v27, 0.0  ;;  %v1175_v32 = vadd.f32 %v1690_v28, %v1095_v24  ;;  %v1743_v10 = vpop.f32.mrf.mxu1 }
 0x12f   : > { %v1692_v29 = vpop.f32.mrf.mxu0  ;;  %v1036_v60 = vadd.f32 %v1601_v22, %v2196_v9  ;;  %v1039_v0 = vadd.f32 %v1604_v62, %v2196_v9 }
 0x130   : > { %v1550_v36 = vpack.c.bf16 %v1291_v7, %v1291_v7  ;;  %v1255_v38 = vadd.f32 %v1742_v34, %v1175_v32  ;;  %v1693_v11 = vadd.f32 %v1692_v29, %v1691_v41  ;;  %v1744_v12 = vpop.f32.mrf.mxu1  ;;  %v1111_v41 = vadd.f32 %v1650_v55, %v1031_v58 }
 0x131   : > { %v1694_v47 = vpop.f32.mrf.mxu0  ;;  %v1745_v33 = vadd.f32 %v1744_v12, %v1743_v10 }
 0x132   : > { %1348 = vst.msk [vmem:[%s2208_s28 + $0x8] sm:$0xf] %vm1345_vm0, %v1550_v36  ;;  %v1292_v13 = vmax.f32 %v1255_v38, 0.0  ;;  %v1180_v14 = vadd.f32 %v1693_v11, %v1100_v31  ;;  %v1746_v35 = vpop.f32.mrf.mxu1  ;;  %v1116_v31 = vadd.f32 %v1653_v57, %v1036_v60  ;;  %v1607_v36 = vadd.f32 %v2189_v6, %v2185_v4 }
 0x133   : > { %v1695_v54 = vpop.f32.mrf.mxu0 }
 0x134   : > { %v1551_v42 = vpack.c.bf16 %v1292_v13, %v1292_v13  ;;  %v1260_v37 = vadd.f32 %v1745_v33, %v1180_v14  ;;  %v1696_v39 = vadd.f32 %v1695_v54, %v1694_v47  ;;  %v1747_v16 = vpop.f32.mrf.mxu1  ;;  %v1044_v52 = vadd.f32 %v1607_v36, %v2196_v9 }
 0x135   : > { %v1697_v51 = vpop.f32.mrf.mxu0  ;;  %v1748_v19 = vadd.f32 %v1747_v16, %v1746_v35  ;;  %v1119_v35 = vadd.f32 %v1656_v61, %v1039_v0 }
 0x136   : > { %1349 = vst.msk [vmem:[%s2208_s28 + $0xc] sm:$0xf] %vm1345_vm0, %v1551_v42  ;;  %v1293_v17 = vmax.f32 %v1260_v37, 0.0  ;;  %v1183_v18 = vadd.f32 %v1696_v39, %v1103_v15  ;;  %v1749_v20 = vpop.f32.mrf.mxu1 }
 0x137   : > { %v1698_v56 = vpop.f32.mrf.mxu0 }
 0x138   : > { %v1552_v23 = vpack.c.bf16 %v1293_v17, %v1293_v17  ;;  %v1263_v24 = vadd.f32 %v1748_v19, %v1183_v18  ;;  %v1699_v25 = vadd.f32 %v1698_v56, %v1697_v51  ;;  %v1750_v44 = vpop.f32.mrf.mxu1  ;;  %v1124_v51 = vadd.f32 %v1659_v1, %v1044_v52 }
 0x139   : > { %v1700_v53 = vpop.f32.mrf.mxu0  ;;  %v1751_v27 = vadd.f32 %v1750_v44, %v1749_v20 }
 0x13a   : > { %1350 = vst.msk [vmem:[%s2208_s28 + $0x10] sm:$0xf] %vm1345_vm0, %v1552_v23  ;;  %v1294_v46 = vmax.f32 %v1263_v24, 0.0  ;;  %v1188_v26 = vadd.f32 %v1699_v25, %v1108_v21  ;;  %v1752_v28 = vpop.f32.mrf.mxu1 }
 0x13b   : > { %v1701_v30 = vpop.f32.mrf.mxu0 }
 0x13c   : > { %v1553_v43 = vpack.c.bf16 %v1294_v46, %v1294_v46  ;;  %v1268_v7 = vadd.f32 %v1751_v27, %v1188_v26  ;;  %v1702_v32 = vadd.f32 %v1701_v30, %v1700_v53  ;;  %v1753_v34 = vpop.f32.mrf.mxu1 }
 0x13d   : > { %v1703_v59 = vpop.f32.mrf.mxu0  ;;  %v1754_v50 = vadd.f32 %v1753_v34, %v1752_v28 }
 0x13e   : > { %1351 = vst.msk [vmem:[%s2208_s28 + $0x14] sm:$0xf] %vm1345_vm0, %v1553_v43  ;;  %v1295_v10 = vmax.f32 %v1268_v7, 0.0  ;;  %v1191_v48 = vadd.f32 %v1702_v32, %v1111_v41  ;;  %v1755_v29 = vpop.f32.mrf.mxu1 }
 0x13f   : > { %v1704_v2 = vpop.f32.mrf.mxu0 }
 0x140   : > { %v1554_v38 = vpack.c.bf16 %v1295_v10, %v1295_v10  ;;  %v1271_v11 = vadd.f32 %v1754_v50, %v1191_v48  ;;  %v1705_v12 = vadd.f32 %v1704_v2, %v1703_v59  ;;  %v1756_v45 = vpop.f32.mrf.mxu1 }
 0x141   : > { %v1706_v63 = vpop.f32.mrf.mxu0  ;;  %v1757_v14 = vadd.f32 %v1756_v45, %v1755_v29 }
 0x142   : > { %1352 = vst.msk [vmem:[%s2208_s28 + $0x18] sm:$0xf] %vm1345_vm0, %v1554_v38  ;;  %v1296_v47 = vmax.f32 %v1271_v11, 0.0  ;;  %v1196_v13 = vadd.f32 %v1705_v12, %v1116_v31  ;;  %v1758_v33 = vpop.f32.mrf.mxu1 }
 0x143   : > { %v1707_v15 = vpop.f32.mrf.mxu0 }
 0x144   : > { %v1555_v4 = vpack.c.bf16 %v1296_v47, %v1296_v47  ;;  %v1276_v6 = vadd.f32 %v1757_v14, %v1196_v13  ;;  %v1708_v54 = vadd.f32 %v1707_v15, %v1706_v63  ;;  %v1759_v40 = vpop.f32.mrf.mxu1 }
 0x145   : > { %v1709_v42 = vpop.f32.mrf.mxu0  ;;  %v1760_v39 = vadd.f32 %v1759_v40, %v1758_v33 }
 0x146   : > { %1353 = vst.msk [vmem:[%s2208_s28 + $0x1c] sm:$0xf] %vm1345_vm0, %v1555_v4  ;;  %v1297_v3 = vmax.f32 %v1276_v6, 0.0  ;;  %v1199_v37 = vadd.f32 %v1708_v54, %v1119_v35  ;;  %v1761_v16 = vpop.f32.mrf.mxu1 }
 0x147   : > { %v1710_v49 = vpop.f32.mrf.mxu0 }
 0x148   : > { %v1556_v17 = vpack.c.bf16 %v1297_v3, %v1297_v3  ;;  %v1279_v9 = vadd.f32 %v1760_v39, %v1199_v37  ;;  %v1711_v18 = vadd.f32 %v1710_v49, %v1709_v42  ;;  %v1762_v19 = vpop.f32.mrf.mxu1 }
 0x149   : > { %v1712_v20 = vpop.f32.mrf.mxu0  ;;  %v1763_v5 = vadd.f32 %v1762_v19, %v1761_v16 }
 0x14a   : > { %1354 = vst.msk [vmem:[%s2208_s28 + $0x20] sm:$0xf] %vm1345_vm0, %v1556_v17  ;;  %v1298_v21 = vmax.f32 %v1279_v9, 0.0  ;;  %v1204_v22 = vadd.f32 %v1711_v18, %v1124_v51  ;;  %v1764_v8 = vpop.f32.mrf.mxu1 }
 0x14b   : > { %v1713_v56 = vpop.f32.mrf.mxu0 }
 0x14c   : > { %v1557_v58 = vpack.c.bf16 %v1298_v21, %v1298_v21  ;;  %v1284_v23 = vadd.f32 %v1763_v5, %v1204_v22  ;;  %v1765_v24 = vpop.f32.mrf.mxu1 }
 0x14e   : > { %1355 = vst.msk [vmem:[%s2208_s28 + $0x24] sm:$0xf] %vm1345_vm0, %v1557_v58  ;;  %v1299_v25 = vmax.f32 %v1284_v23, 0.0 }
 0x150   : > { %v1558_v44 = vpack.c.bf16 %v1299_v25, %v1299_v25 }
 0x152   : > { %1356 = vst.msk [vmem:[%s2208_s28 + $0x28] sm:$0xf] %vm1345_vm0, %v1558_v44 }
 0x153 PF: > { %s13_s12 = sadd.s32 1, %s1853_s12  }
 0x154   : > { %p10_p4 = scmp.ge.s32.totalorder %s13_s12, 4  }
 0x156   :  { %12 = sbr.rel (!%p10_p4) target bundleno = 1 (0x1), region = 62 }

// kernel: rnd_forward.14
= control target key start
LH: loop header
LB: loop body
LE: loop exit
PB: predicated region body
PF: predicated region fallthrough
CT: control target
= control target key end

     0   :  { %s1186_s12 = smov 0   ;;  %s1356_s0 = inlined_call_operand.vmem [shape: bf16[112,576], index: 0, kind: input, shape index: {}]   ;;  %s1357_s1 = inlined_call_operand.vmem [shape: bf16[576,64], index: 1, kind: input, shape index: {}]   ;;  %s1358_s2 = inlined_call_operand.vmem [shape: f32[1,64], index: 2, kind: input, shape index: {}]   ;;  %s1359_s3 = inlined_call_operand.vmem [shape: bf16[112,64], index: 3, kind: output, shape index: {}]  }
   0x1 LB: > { %s891_s13 = sadd.s32 4294967295, %s1164_s12   ;;  %p895_p0 = scmp.ge.s32.totalorder %s1164_s12, 1  ;;  %s1164_s12 = sphi %s1186_s12, %s13_s12  }
   0x2   : > { %p139_p1 = scmp.lt.s32.totalorder %s1164_s12, 3 }
   0x4   : > { %p140_p2 = pnand %p895_p0, %p139_p1 }
   0x5   : > { %s164_s17 = smul.u32 (!%p140_p2), 7, %s891_s13 }
   0x6   : > { %143 = sbr.rel (%p140_p2) target bundleno = 284 (0x11c), region = 32 }
   0x7   : > { %p165_p3 = scmp.lt.s32.totalorder (!%p140_p2), %s164_s17, 13 }
   0xb   : > { %v1096_v0 = vld [vmem:[%s1357_s1 + $0x78] sm:$0xff]   ;;  %v1100_v4 = vld [vmem:[%s1357_s1 + $0x70] sm:$0xff]   ;;  %v1104_v8 = vld [vmem:[%s1357_s1 + $0x68] sm:$0xff]   ;;  %s1361_s17 = smov (!%p165_p3, %s164_s17), 13  ;;  %vm586_vm0 = vcmask 523264   ;;  %vm827_vm1 = vcmask 519168  }
   0xc   : > { %v1097_v1 = vld [vmem:[%s1357_s1 + $0xf8] sm:$0xff]   ;;  %975 = vmatprep.subr.bf16.mxu0 %v1096_v0  ;;  %v1101_v5 = vld [vmem:[%s1357_s1 + $0xf0] sm:$0xff]   ;;  %v1105_v9 = vld [vmem:[%s1357_s1 + $0xe8] sm:$0xff]   ;;  %s1087_s16 = smul.u32 20, %s1361_s17  ;;  %s897_s18 = sshll.u32 %s1361_s17, 2 }
   0xd   : > { %v1098_v2 = vld [vmem:[%s1357_s1 + $0x38] sm:$0xff]   ;;  %1015 = vmatprep.subr.bf16.mxu1 %v1097_v1  ;;  %v1102_v6 = vld [vmem:[%s1357_s1 + $0x30] sm:$0xff]   ;;  %v1106_v10 = vld [vmem:[%s1357_s1 + $0x28] sm:$0xff]   ;;  %s1337_s21 = scalar_lea.vmem %s1359_s3, %s897_s18 }
   0xe   : > { %v1099_v3 = vld [vmem:[%s1357_s1 + $0xb8] sm:$0xff]   ;;  %976 = vmatpush3.bf16.msra.mxu0 %v1098_v2  ;;  %v1103_v7 = vld [vmem:[%s1357_s1 + $0xb0] sm:$0xff]   ;;  %v1107_v11 = vld [vmem:[%s1357_s1 + $0xa8] sm:$0xff]   ;;  %s1292_s27 = scalar_lea.vmem %s1356_s0, %s1087_s16 }
   0xf   : > { %1016 = vmatpush3.bf16.msra.mxu1 %v1099_v3  ;;  %977 = vmatprep.subr.bf16.mxu0 %v1100_v4  ;;  %v1108_v12 = vld [vmem:[%s1357_s1 + $0x60] sm:$0xff]   ;;  %v1112_v16 = vld [vmem:[%s1357_s1 + $0x58] sm:$0xff]   ;;  %v1116_v20 = vld [vmem:[%s1357_s1 + $0x50] sm:$0xff]  }
  0x10   : > { %1017 = vmatprep.subr.bf16.mxu1 %v1101_v5  ;;  %v1109_v13 = vld [vmem:[%s1357_s1 + $0xe0] sm:$0xff]   ;;  %v1113_v17 = vld [vmem:[%s1357_s1 + $0xd8] sm:$0xff]   ;;  %v1117_v21 = vld [vmem:[%s1357_s1 + $0xd0] sm:$0xff]  }
  0x11   : > { %v1110_v14 = vld [vmem:[%s1357_s1 + $0x20] sm:$0xff]   ;;  %v1114_v18 = vld [vmem:[%s1357_s1 + $0x18] sm:$0xff]   ;;  %v1118_v22 = vld [vmem:[%s1357_s1 + $0x10] sm:$0xff]  }
  0x12   : > { %978 = vmatpush3.bf16.msra.mxu0 %v1102_v6  ;;  %v1111_v15 = vld [vmem:[%s1357_s1 + $0xa0] sm:$0xff]   ;;  %v1115_v19 = vld [vmem:[%s1357_s1 + $0x98] sm:$0xff]   ;;  %v1119_v23 = vld [vmem:[%s1357_s1 + $0x90] sm:$0xff]  }
  0x13   : > { %1018 = vmatpush3.bf16.msra.mxu1 %v1103_v7  ;;  %979 = vmatprep.subr.bf16.mxu0 %v1104_v8  ;;  %v1120_v24 = vld [vmem:[%s1357_s1 + $0x48] sm:$0xff]   ;;  %v1124_v28 = vld [vmem:[%s1357_s1 + $0x40] sm:$0xff]   ;;  %v1134_v36 = vld [vmem:[%s1357_s1 + $0x118] sm:$0xff]  }
  0x14   : > { %1019 = vmatprep.subr.bf16.mxu1 %v1105_v9  ;;  %v1121_v25 = vld [vmem:[%s1357_s1 + $0xc8] sm:$0xff]   ;;  %v1125_v29 = vld [vmem:[%s1357_s1 + $0xc0] sm:$0xff]   ;;  %v1141_v39 = vld [vmem:[%s1357_s1 + $0x110] sm:$0xff]  }
  0x15   : > { %v1122_v26 = vld [vmem:[%s1357_s1 + $0x8] sm:$0xff]   ;;  %v1126_v30 = vld [vmem:[%s1357_s1] sm:$0xff]   ;;  %v1144_v43 = vld [vmem:[%s1292_s27 + $0x5c] ss:$20 sps:$4 sm:$0xff]  }
  0x16   : > { %980 = vmatpush3.bf16.msra.mxu0 %v1106_v10  ;;  %v1123_v27 = vld [vmem:[%s1357_s1 + $0x88] sm:$0xff]   ;;  %v1127_v31 = vld [vmem:[%s1357_s1 + $0x80] sm:$0xff]   ;;  %v196_v46 = vld [vmem:[%s1292_s27 + $0x78] sm:$0xff] }
  0x17   : > { %1020 = vmatpush3.bf16.msra.mxu1 %v1107_v11  ;;  %981 = vmatprep.subr.bf16.mxu0 %v1108_v12  ;;  %v1128_v32 = vld [vmem:[%s1292_s27] ss:$20 sps:$4 sm:$0xff]   ;;  %v1130_v33 = vld [vmem:[%s1292_s27 + $0x4] ss:$20 sps:$4 sm:$0xff]   ;;  %v1131_v34 = vld [vmem:[%s1292_s27 + $0x8] ss:$20 sps:$4 sm:$0xff]   ;;  %v915_v50 = vcombine.high %v196_v46, %v196_v46  ;;  %v914_v52 = vcombine.low %v196_v46, %v196_v46 }
  0x18   : > { %1021 = vmatprep.subr.bf16.mxu1 %v1109_v13  ;;  %v1133_v35 = vld [vmem:[%s1292_s27 + $0xc] ss:$20 sps:$4 sm:$0xff]   ;;  %631 = vmatprep.mubr.bf16.mxu0 %v1130_v33  ;;  %v1137_v38 = vld [vmem:[%s1292_s27 + $0x34] ss:$20 sps:$4 sm:$0xff]   ;;  %v1140_v41 = vld [vmem:[%s1292_s27 + $0x30] ss:$20 sps:$4 sm:$0xff]  }
  0x19   : > { %695 = vmatprep.mubr.bf16.mxu1 %v1133_v35  ;;  %v1135_v37 = vld [vmem:[%s1292_s27 + $0x2c] ss:$20 sps:$4 sm:$0xff]   ;;  %v1139_v40 = vld [vmem:[%s1292_s27 + $0x28] ss:$20 sps:$4 sm:$0xff]   ;;  %v1146_v48 = vld [vmem:[%s1292_s27 + $0x50] ss:$20 sps:$4 sm:$0xff]  }
  0x1a   : > { %982 = vmatpush3.bf16.msra.mxu0 %v1110_v14  ;;  %v1142_v42 = vld [vmem:[%s1292_s27 + $0x54] ss:$20 sps:$4 sm:$0xff]   ;;  %v1153_v45 = vld [vmem:[%s1357_s1 + $0x100] sm:$0xff]   ;;  %v1147_v49 = vld [vmem:[%s1292_s27 + $0x58] ss:$20 sps:$4 sm:$0xff]  }
  0x1b   : > { %1022 = vmatpush3.bf16.msra.mxu1 %v1111_v15  ;;  %983 = vmatprep.subr.bf16.mxu0 %v1112_v16  ;;  %v1148_v44 = vld [vmem:[%s1357_s1 + $0x108] sm:$0xff]   ;;  %v197_v47 = vld [vmem:[%s1292_s27 + $0x80] sm:$0xff] }
  0x1c   : > { %1023 = vmatprep.subr.bf16.mxu1 %v1113_v17  ;;  %v917_v51 = vcombine.high %v197_v47, %v197_v47  ;;  %v916_v53 = vcombine.low %v197_v47, %v197_v47  ;;  %v1154_v54 = vld [vmem:[%s1292_s27 + $0x10] ss:$20 sps:$4 sm:$0xff]   ;;  %v1155_v55 = vld [vmem:[%s1292_s27 + $0x60] ss:$20 sps:$4 sm:$0xff]   ;;  %v1156_v56 = vld [vmem:[%s1292_s27 + $0x38] ss:$20 sps:$4 sm:$0xff]  }
  0x1d   : > { %v1157_v57 = vld [vmem:[%s1292_s27 + $0x88] ss:$0 sps:$4 sm:$0xff]  }
  0x1e   : > { %984 = vmatpush3.bf16.msra.mxu0 %v1114_v18 }
  0x1f   : > { %1024 = vmatpush3.bf16.msra.mxu1 %v1115_v19  ;;  %985 = vmatprep.subr.bf16.mxu0 %v1116_v20 }
  0x20   : > { %1025 = vmatprep.subr.bf16.mxu1 %v1117_v21  ;;  %v898_v21 = vld [vmem:[%s1358_s2] ss:$0 sm:$0xff] }
  0x22   : > { %986 = vmatpush3.bf16.msra.mxu0 %v1118_v22 }
  0x23   : > { %1026 = vmatpush3.bf16.msra.mxu1 %v1119_v23  ;;  %987 = vmatprep.subr.bf16.mxu0 %v1120_v24 }
  0x24   : > { %1027 = vmatprep.subr.bf16.mxu1 %v1121_v25 }
  0x26   : > { %988 = vmatpush3.bf16.msra.mxu0 %v1122_v26 }
  0x27   : > { %1028 = vmatpush3.bf16.msra.mxu1 %v1123_v27  ;;  %989 = vmatprep.subr.bf16.mxu0 %v1124_v28 }
  0x28   : > { %1029 = vmatprep.subr.bf16.mxu1 %v1125_v29 }
  0x2a   : > { %990 = vmatpush3.bf16.msra.mxu0 %v1126_v30 }
  0x2b   : > { %1030 = vmatpush3.bf16.msra.mxu1 %v1127_v31  ;;  %1063 = vmatprep.subr.bf16.mxu0 %v1134_v36 }
  0x2c   : > { %1079 = vmatprep.subr.bf16.mxu1 %v1134_v36 }
  0x2d   : > { %632 = vmatmul.mubr.bf16.vlgmr.msra.gmra.mxu0 %v1128_v32 }
  0x2e   : > { %696 = vmatmul.mubr.bf16.vlgmr.msra.gmra.mxu1 %v1131_v34  ;;  %1064 = vmatpush3.bf16.msra.mxu0 %v1134_v36 }
  0x2f   : > { %1083 = vmatpush3.bf16.msra.mxu1 %v1134_v36  ;;  %639 = vmatprep.mubr.bf16.mxu0 %v1135_v37 }
  0x30   : > { %703 = vmatprep.mubr.bf16.mxu1 %v1137_v38  ;;  %1065 = vmatprep.subr.bf16.mxu0 %v1141_v39 }
  0x31   : > { %1080 = vmatprep.subr.bf16.mxu1 %v1141_v39 }
  0x32   : > { %1066 = vmatpush3.bf16.msra.mxu0 %v1141_v39 }
  0x33   : > { %1084 = vmatpush3.bf16.msra.mxu1 %v1141_v39  ;;  %1067 = vmatprep.subr.bf16.mxu0 %v1148_v44 }
  0x34   : > { %1081 = vmatprep.subr.bf16.mxu1 %v1148_v44 }
  0x35   : > { %640 = vmatmul.mubr.bf16.gmra.mxu0 %v1139_v40 }
  0x36   : > { %704 = vmatmul.mubr.bf16.gmra.mxu1 %v1140_v41  ;;  %647 = vmatprep.mubr.bf16.mxu0 %v1142_v42 }
  0x37   : > { %711 = vmatprep.mubr.bf16.mxu1 %v1144_v43  ;;  %1068 = vmatpush3.bf16.msra.mxu0 %v1148_v44 }
  0x38   : > { %1085 = vmatpush3.bf16.msra.mxu1 %v1148_v44  ;;  %1069 = vmatprep.subr.bf16.mxu0 %v1153_v45 }
  0x39   : > { %1082 = vmatprep.subr.bf16.mxu1 %v1153_v45 }
  0x3b   : > { %1070 = vmatpush3.bf16.msra.mxu0 %v1153_v45 }
  0x3c   : > { %1086 = vmatpush3.bf16.msra.mxu1 %v1153_v45 }
  0x3d   : > { %648 = vmatmul.mubr.bf16.gmra.mxu0 %v1146_v48 }
  0x3e   : > { %712 = vmatmul.mubr.bf16.gmra.mxu1 %v1147_v49  ;;  %655 = vmatprep.mubr.bf16.mxu0 %v915_v50 }
  0x3f   : > { %719 = vmatprep.mubr.bf16.mxu1 %v917_v51 }
  0x45   : > { %656 = vmatmul.mubr.bf16.gmra.mxu0 %v914_v52 }
  0x46   : > { %720 = vmatmul.mubr.bf16.gmra.mxu1 %v916_v53  ;;  %1071 = vmatprep.mubr.msk.bf16.mxu0 %vm586_vm0, %v1154_v54 }
  0x47   : > { %1075 = vmatprep.mubr.msk.bf16.mxu1 %vm586_vm0, %v1155_v55 }
  0x4d   : > { %1072 = vmatmul.mubr.msk.bf16.vlgmr.msra.gmra.mxu0 %vm586_vm0, %v1156_v56 }
  0x4e   : > { %1076 = vmatmul.mubr.msk.bf16.vlgmr.msra.gmra.mxu1 %vm586_vm0, %v1157_v57 }
  0xed   : > { %v991_v58 = vpop.f32.mrf.mxu0 }
  0xee   : > { %v1031_v59 = vpop.f32.mrf.mxu1 }
  0xef   : > { %v992_v60 = vpop.f32.mrf.mxu0 }
  0xf0   : > { %v1032_v61 = vpop.f32.mrf.mxu1  ;;  %v993_v19 = vadd.f32 %v992_v60, %v991_v58 }
  0xf1   : > { %v994_v62 = vpop.f32.mrf.mxu0  ;;  %v1033_v39 = vadd.f32 %v1032_v61, %v1031_v59 }
  0xf2   : > { %v1034_v63 = vpop.f32.mrf.mxu1  ;;  %v634_v29 = vadd.f32 %v993_v19, %v898_v21 }
  0xf3   : > { %v995_v0 = vpop.f32.mrf.mxu0 }
  0xf4   : > { %v1035_v1 = vpop.f32.mrf.mxu1  ;;  %v996_v31 = vadd.f32 %v995_v0, %v994_v62  ;;  %v698_v50 = vadd.f32 %v1033_v39, %v634_v29 }
  0xf5   : > { %v997_v2 = vpop.f32.mrf.mxu0  ;;  %v1036_v55 = vadd.f32 %v1035_v1, %v1034_v63 }
  0xf6   : > { %v1037_v3 = vpop.f32.mrf.mxu1  ;;  %v637_v46 = vadd.f32 %v996_v31, %v898_v21 }
  0xf7   : > { %v998_v4 = vpop.f32.mrf.mxu0 }
  0xf8   : > { %v1038_v5 = vpop.f32.mrf.mxu1  ;;  %v999_v17 = vadd.f32 %v998_v4, %v997_v2  ;;  %v701_v4 = vadd.f32 %v1036_v55, %v637_v46 }
  0xf9   : > { %v1000_v6 = vpop.f32.mrf.mxu0  ;;  %v1039_v32 = vadd.f32 %v1038_v5, %v1037_v3 }
  0xfa   : > { %v1040_v7 = vpop.f32.mrf.mxu1  ;;  %v642_v25 = vadd.f32 %v999_v17, %v898_v21 }
  0xfb   : > { %v1001_v8 = vpop.f32.mrf.mxu0 }
  0xfc   : > { %v1041_v9 = vpop.f32.mrf.mxu1  ;;  %v1002_v26 = vadd.f32 %v1001_v8, %v1000_v6  ;;  %v706_v42 = vadd.f32 %v1039_v32, %v642_v25 }
  0xfd   : > { %v1003_v10 = vpop.f32.mrf.mxu0  ;;  %v1042_v47 = vadd.f32 %v1041_v9, %v1040_v7 }
  0xfe   : > { %v1043_v11 = vpop.f32.mrf.mxu1  ;;  %v645_v40 = vadd.f32 %v1002_v26, %v898_v21 }
  0xff   : > { %v1004_v12 = vpop.f32.mrf.mxu0 }
 0x100   : > { %v1044_v13 = vpop.f32.mrf.mxu1  ;;  %v1005_v23 = vadd.f32 %v1004_v12, %v1003_v10  ;;  %v709_v59 = vadd.f32 %v1042_v47, %v645_v40 }
 0x101   : > { %v1006_v14 = vpop.f32.mrf.mxu0  ;;  %v1045_v44 = vadd.f32 %v1044_v13, %v1043_v11 }
 0x102   : > { %v1046_v15 = vpop.f32.mrf.mxu1  ;;  %v650_v36 = vadd.f32 %v1005_v23, %v898_v21 }
 0x103   : > { %v1007_v16 = vpop.f32.mrf.mxu0 }
 0x104   : > { %v1047_v18 = vpop.f32.mrf.mxu1  ;;  %v1008_v37 = vadd.f32 %v1007_v16, %v1006_v14  ;;  %v714_v54 = vadd.f32 %v1045_v44, %v650_v36 }
 0x105   : > { %v1009_v20 = vpop.f32.mrf.mxu0  ;;  %v1048_v60 = vadd.f32 %v1047_v18, %v1046_v15 }
 0x106   : > { %v1049_v22 = vpop.f32.mrf.mxu1  ;;  %v653_v51 = vadd.f32 %v1008_v37, %v898_v21 }
 0x107   : > { %v1010_v24 = vpop.f32.mrf.mxu0 }
 0x108   : > { %v1011_v27 = vadd.f32 %v1010_v24, %v1009_v20  ;;  %v1050_v28 = vpop.f32.mrf.mxu1  ;;  %v717_v8 = vadd.f32 %v1048_v60, %v653_v51 }
 0x109   : > { %v1012_v30 = vpop.f32.mrf.mxu0  ;;  %v1051_v34 = vadd.f32 %v1050_v28, %v1049_v22 }
 0x10a   : > { %v658_v33 = vadd.f32 %v1011_v27, %v898_v21  ;;  %v1052_v35 = vpop.f32.mrf.mxu1 }
 0x10b   : > { %v1013_v38 = vpop.f32.mrf.mxu0 }
 0x10c   : > { %v1053_v41 = vpop.f32.mrf.mxu1  ;;  %v722_v43 = vadd.f32 %v1051_v34, %v658_v33 }
 0x10d   : > { %v1073_v45 = vpop.f32.mrf.mxu0 }
 0x10e   : > { %v770_v48 = vadd.f32 %v1073_v45, %v706_v42  ;;  %v1077_v49 = vpop.f32.mrf.mxu1 }
 0x10f   : > { %v786_v52 = vadd.f32 %v1077_v49, %v722_v43  ;;  %v761_v53 = vpop.f32.mrf.mxu0 }
 0x110   : > { %v793_v56 = vmax.f32 %v770_v48, 0.0  ;;  %v762_v57 = vadd.f32 %v761_v53, %v698_v50  ;;  %v777_v58 = vpop.f32.mrf.mxu1 }
 0x111   : > { %v797_v61 = vmax.f32 %v786_v52, 0.0  ;;  %v778_v62 = vadd.f32 %v777_v58, %v714_v54  ;;  %v1074_v0 = vpop.f32.mrf.mxu0 }
 0x112   : > { %v970_v2 = vpack.c.bf16 %v793_v56, %v793_v56  ;;  %v791_v3 = vmax.f32 %v762_v57, 0.0  ;;  %v773_v63 = vadd.f32 %v1074_v0, %v709_v59  ;;  %v1078_v1 = vpop.f32.mrf.mxu1 }
 0x113   : > { %v974_v5 = vpack.c.bf16 %v797_v61, %v797_v61  ;;  %v795_v6 = vmax.f32 %v778_v62, 0.0  ;;  %v764_v7 = vpop.f32.mrf.mxu0 }
 0x114   : > { %830 = vst.msk [vmem:[%s1337_s21 + $0x8] sm:$0xf] %vm827_vm1, %v970_v2  ;;  %v968_v9 = vpack.c.bf16 %v791_v3, %v791_v3  ;;  %v794_v10 = vmax.f32 %v773_v63, 0.0  ;;  %v765_v11 = vadd.f32 %v764_v7, %v701_v4  ;;  %v780_v12 = vpop.f32.mrf.mxu1 }
 0x115   : > { %834 = vst.msk [vmem:[%s1337_s21 + $0x18] sm:$0xf] %vm827_vm1, %v974_v5  ;;  %v972_v13 = vpack.c.bf16 %v795_v6, %v795_v6  ;;  %v781_v14 = vadd.f32 %v780_v12, %v717_v8 }
 0x116   : > { %828 = vst.msk [vmem:[%s1337_s21] sm:$0xf] %vm827_vm1, %v968_v9  ;;  %v971_v15 = vpack.c.bf16 %v794_v10, %v794_v10  ;;  %v792_v16 = vmax.f32 %v765_v11, 0.0 }
 0x117   : > { %832 = vst.msk [vmem:[%s1337_s21 + $0x10] sm:$0xf] %vm827_vm1, %v972_v13  ;;  %v796_v17 = vmax.f32 %v781_v14, 0.0 }
 0x118   : > { %831 = vst.msk [vmem:[%s1337_s21 + $0xc] sm:$0xf] %vm827_vm1, %v971_v15  ;;  %v969_v18 = vpack.c.bf16 %v792_v16, %v792_v16 }
 0x119   : > { %v973_v19 = vpack.c.bf16 %v796_v17, %v796_v17 }
 0x11a   : > { %829 = vst.msk [vmem:[%s1337_s21 + $0x4] sm:$0xf] %vm827_vm1, %v969_v18 }
 0x11b   : > { %833 = vst.msk [vmem:[%s1337_s21 + $0x14] sm:$0xf] %vm827_vm1, %v973_v19 }
 0x11c PF: > { %s13_s12 = sadd.s32 1, %s1164_s12  }
 0x11d   : > { %p10_p4 = scmp.ge.s32.totalorder %s13_s12, 4  }
 0x11f   :  { %12 = sbr.rel (!%p10_p4) target bundleno = 1 (0x1), region = 62 }

// kernel: rnd_forward.11
= control target key start
LH: loop header
LB: loop body
LE: loop exit
PB: predicated region body
PF: predicated region fallthrough
CT: control target
= control target key end

     0   :  { %s1583_s18 = smov 0   ;;  %s1819_s0 = inlined_call_operand.vmem [shape: bf16[2,3200], index: 0, kind: input, shape index: {}]   ;;  %s1820_s1 = inlined_call_operand.vmem [shape: bf16[3200,256], index: 1, kind: input, shape index: {}]   ;;  %s1821_s2 = inlined_call_operand.vmem [shape: f32[1,256], index: 2, kind: input, shape index: {}]   ;;  %s1822_s3 = inlined_call_operand.vmem [shape: bf16[256,256], index: 3, kind: input, shape index: {}]   ;;  %s1823_s4 = inlined_call_operand.vmem [shape: f32[1,256], index: 4, kind: input, shape index: {}]   ;;  %s1824_s5 = inlined_call_operand.vmem [shape: f32[2,256], index: 5, kind: output, shape index: {}]  }
   0x1 LB: > { %s1589_s19 = sadd.s32 4294967295, %s1547_s18   ;;  %p1239_p0 = scmp.ge.s32.totalorder %s1547_s18, 1  ;;  %s1547_s18 = sphi %s1583_s18, %s15_s18  }
   0x2   : > { %p194_p1 = scmp.lt.s32.totalorder %s1547_s18, 6 }
   0x4   : > { %p195_p2 = pnand %p1239_p0, %p194_p1 }
   0x5   : > { %s222_s20 = smul.u32 (!%p195_p2), 5, %s1589_s19  ;;  %p1242_p5 = scmp.ne.s32.totalorder (!%p195_p2), %s1589_s19, 0 }
   0x6   : > { %198 = sbr.rel (%p195_p2) target bundleno = 586 (0x24a), region = 40 }
   0x7   : > { %s227_s21 = smul.u32 (!%p195_p2), 80, %s1589_s19  ;;  %p223_p3 = scmp.lt.s32.totalorder (!%p195_p2), %s222_s20, 24 }
   0x9   : > { %p228_p4 = scmp.lt.s32.totalorder (!%p195_p2), %s227_s21, 399 }
   0xb   : > { %s1826_s20 = smov (!%p223_p3, %s222_s20), 24  ;;  %s1828_s21 = smov (!%p228_p4, %s227_s21), 399 }
   0xc   : > { %s225_s24 = scalar_lea.vmem %s1819_s0, %s1826_s20  ;;  %s1359_s25 = sshll.u32 %s1828_s21, 3 }
   0xd   : > { %s1604_s28 = scalar_lea.vmem %s1820_s1, %s1359_s25  ;;  %238 = sbr.rel (%p1242_p5) target bundleno = 20 (0x14), region = 44 }
  0x12   : > { %v1549_v0 = vmov 0.0  }
  0x13   : > { %239 = vst [vmem:[#allocation2] sm:$0xf] %v1549_v0 }
  0x14 PF: > { %v1372_v1 = vld [vmem:[%s1604_s28 + $0x74] ss:$8 sps:$4 sm:$0xff]   ;;  %v1376_v3 = vld [vmem:[%s1604_s28 + $0x70] ss:$8 sps:$4 sm:$0xff]   ;;  %v1378_v5 = vld [vmem:[%s1604_s28 + $0x64] ss:$8 sps:$4 sm:$0xff]   ;;  %v327_v39 = vlaneseq }
  0x15   : > { %v1374_v2 = vld [vmem:[%s1604_s28 + $0x174] ss:$8 sps:$4 sm:$0xff]   ;;  %767 = vmatprep.subr.bf16.mxu0 %v1372_v1  ;;  %v1377_v4 = vld [vmem:[%s1604_s28 + $0x170] ss:$8 sps:$4 sm:$0xff]   ;;  %v1380_v6 = vld [vmem:[%s1604_s28 + $0x164] ss:$8 sps:$4 sm:$0xff]  }
  0x16   : > { %808 = vmatprep.subr.bf16.mxu1 %v1374_v2  ;;  %768 = vmatpush1.bf16.msra.mxu0 %v1376_v3  ;;  %v1382_v7 = vld [vmem:[%s1604_s28 + $0x60] ss:$8 sps:$4 sm:$0xff]   ;;  %v1384_v9 = vld [vmem:[%s1604_s28 + $0x54] ss:$8 sps:$4 sm:$0xff]   ;;  %v1388_v11 = vld [vmem:[%s1604_s28 + $0x50] ss:$8 sps:$4 sm:$0xff]  }
  0x17   : > { %809 = vmatpush1.bf16.msra.mxu1 %v1377_v4  ;;  %769 = vmatprep.subr.bf16.mxu0 %v1378_v5  ;;  %v1383_v8 = vld [vmem:[%s1604_s28 + $0x160] ss:$8 sps:$4 sm:$0xff]   ;;  %v1386_v10 = vld [vmem:[%s1604_s28 + $0x154] ss:$8 sps:$4 sm:$0xff]   ;;  %v1389_v12 = vld [vmem:[%s1604_s28 + $0x150] ss:$8 sps:$4 sm:$0xff]  }
  0x18   : > { %810 = vmatprep.subr.bf16.mxu1 %v1380_v6  ;;  %v1390_v13 = vld [vmem:[%s1604_s28 + $0x44] ss:$8 sps:$4 sm:$0xff]   ;;  %v1394_v15 = vld [vmem:[%s1604_s28 + $0x40] ss:$8 sps:$4 sm:$0xff]   ;;  %v1396_v17 = vld [vmem:[%s1604_s28 + $0x34] ss:$8 sps:$4 sm:$0xff]  }
  0x19   : > { %v1392_v14 = vld [vmem:[%s1604_s28 + $0x144] ss:$8 sps:$4 sm:$0xff]   ;;  %v1395_v16 = vld [vmem:[%s1604_s28 + $0x140] ss:$8 sps:$4 sm:$0xff]   ;;  %v1398_v18 = vld [vmem:[%s1604_s28 + $0x134] ss:$8 sps:$4 sm:$0xff]  }
  0x1a   : > { %770 = vmatpush1.bf16.msra.mxu0 %v1382_v7  ;;  %v1400_v19 = vld [vmem:[%s1604_s28 + $0x30] ss:$8 sps:$4 sm:$0xff]   ;;  %v1402_v21 = vld [vmem:[%s1604_s28 + $0x24] ss:$8 sps:$4 sm:$0xff]   ;;  %v1406_v23 = vld [vmem:[%s1604_s28 + $0x20] ss:$8 sps:$4 sm:$0xff]  }
  0x1b   : > { %811 = vmatpush1.bf16.msra.mxu1 %v1383_v8  ;;  %771 = vmatprep.subr.bf16.mxu0 %v1384_v9  ;;  %v1401_v20 = vld [vmem:[%s1604_s28 + $0x130] ss:$8 sps:$4 sm:$0xff]   ;;  %v1404_v22 = vld [vmem:[%s1604_s28 + $0x124] ss:$8 sps:$4 sm:$0xff]   ;;  %v1407_v24 = vld [vmem:[%s1604_s28 + $0x120] ss:$8 sps:$4 sm:$0xff]  }
  0x1c   : > { %812 = vmatprep.subr.bf16.mxu1 %v1386_v10  ;;  %v1408_v25 = vld [vmem:[%s1604_s28 + $0x14] ss:$8 sps:$4 sm:$0xff]   ;;  %v1412_v27 = vld [vmem:[%s1604_s28 + $0x10] ss:$8 sps:$4 sm:$0xff]   ;;  %v1414_v29 = vld [vmem:[%s1604_s28 + $0x4] ss:$8 sps:$4 sm:$0xff]  }
  0x1d   : > { %v1410_v26 = vld [vmem:[%s1604_s28 + $0x114] ss:$8 sps:$4 sm:$0xff]   ;;  %v1413_v28 = vld [vmem:[%s1604_s28 + $0x110] ss:$8 sps:$4 sm:$0xff]   ;;  %v1416_v30 = vld [vmem:[%s1604_s28 + $0x104] ss:$8 sps:$4 sm:$0xff]  }
  0x1e   : > { %772 = vmatpush1.bf16.msra.mxu0 %v1388_v11  ;;  %v1418_v31 = vld [vmem:[%s1604_s28] ss:$8 sps:$4 sm:$0xff]   ;;  %v1420_v33 = vld [vmem:[%s1604_s28 + $0xf4] ss:$8 sps:$4 sm:$0xff]   ;;  %v1424_v35 = vld [vmem:[%s1604_s28 + $0xf0] ss:$8 sps:$4 sm:$0xff]  }
  0x1f   : > { %813 = vmatpush1.bf16.msra.mxu1 %v1389_v12  ;;  %773 = vmatprep.subr.bf16.mxu0 %v1390_v13  ;;  %v1419_v32 = vld [vmem:[%s1604_s28 + $0x100] ss:$8 sps:$4 sm:$0xff]   ;;  %v1422_v34 = vld [vmem:[%s1604_s28 + $0x1f4] ss:$8 sps:$4 sm:$0xff]   ;;  %v1425_v36 = vld [vmem:[%s1604_s28 + $0x1f0] ss:$8 sps:$4 sm:$0xff]  }
  0x20   : > { %814 = vmatprep.subr.bf16.mxu1 %v1392_v14  ;;  %v1550_v37 = vmov 1966171168   ;;  %v1426_v40 = vld [vmem:[%s1604_s28 + $0xe4] ss:$8 sps:$4 sm:$0xff]   ;;  %v1430_v42 = vld [vmem:[%s1604_s28 + $0xe0] ss:$8 sps:$4 sm:$0xff]  }
  0x21   : > { %v325_v38 = vunpack.c.l.s4 %v1550_v37  ;;  %v1428_v41 = vld [vmem:[%s1604_s28 + $0x1e4] ss:$8 sps:$4 sm:$0xff]   ;;  %v1646_v44 = vshrl.u32 %v327_v39, 7  ;;  %v1431_v45 = vld [vmem:[%s1604_s28 + $0x1e0] ss:$8 sps:$4 sm:$0xff]   ;;  %p1323_p6 = scmp.ne.s32.totalorder %s1589_s19, 4 }
  0x22   : > { %774 = vmatpush1.bf16.msra.mxu0 %v1394_v15  ;;  %v1432_v46 = vld [vmem:[%s1604_s28 + $0xd4] ss:$8 sps:$4 sm:$0xff]   ;;  %v1436_v48 = vld [vmem:[%s1604_s28 + $0xd0] ss:$8 sps:$4 sm:$0xff]   ;;  %v1438_v51 = vld [vmem:[%s1604_s28 + $0xc4] ss:$8 sps:$4 sm:$0xff]  }
  0x23   : > { %815 = vmatpush1.bf16.msra.mxu1 %v1395_v16  ;;  %775 = vmatprep.subr.bf16.mxu0 %v1396_v17  ;;  %v326_v43 = vunpack.c.0.s8 %v325_v38  ;;  %v1434_v47 = vld [vmem:[%s1604_s28 + $0x1d4] ss:$8 sps:$4 sm:$0xff]   ;;  %v1437_v49 = vld [vmem:[%s1604_s28 + $0x1d0] ss:$8 sps:$4 sm:$0xff]   ;;  %v1440_v52 = vld [vmem:[%s1604_s28 + $0x1c4] ss:$8 sps:$4 sm:$0xff]  }
  0x24   : > { %816 = vmatprep.subr.bf16.mxu1 %v1398_v18  ;;  %v1663_v53 = vld [vmem:[%s225_s24] sm:$0x1f]  ;;  %v1444_v57 = vld [vmem:[%s1604_s28 + $0xb4] ss:$8 sps:$4 sm:$0xff]   ;;  %v1448_v60 = vld [vmem:[%s1604_s28 + $0xb0] ss:$8 sps:$4 sm:$0xff]  }
  0x25   : > { %v1654_v50 = vsub.s32 %v326_v43, %v1646_v44  ;;  %v1442_v54 = vld [vmem:[%s1604_s28 + $0xc0] ss:$8 sps:$4 sm:$0xff]   ;;  %v1446_v58 = vld [vmem:[%s1604_s28 + $0x1b4] ss:$8 sps:$4 sm:$0xff]   ;;  %v1449_v62 = vld [vmem:[%s1604_s28 + $0x1b0] ss:$8 sps:$4 sm:$0xff]  }
  0x26   : > { %776 = vmatpush1.bf16.msra.mxu0 %v1400_v19  ;;  %v1443_v56 = vld [vmem:[%s1604_s28 + $0x1c0] ss:$8 sps:$4 sm:$0xff]   ;;  %v1450_v63 = vld [vmem:[%s1604_s28 + $0xa4] ss:$8 sps:$4 sm:$0xff]   ;;  %v1456_v4 = vld [vmem:[%s1604_s28 + $0x94] ss:$8 sps:$4 sm:$0xff]  }
  0x27   : > { %817 = vmatpush1.bf16.msra.mxu1 %v1401_v20  ;;  %777 = vmatprep.subr.bf16.mxu0 %v1402_v21  ;;  %v330_v55 = vrot.slane %v1663_v53, %v1654_v50  ;;  %v1452_v0 = vld [vmem:[%s1604_s28 + $0x1a4] ss:$8 sps:$4 sm:$0xff]   ;;  %v1454_v2 = vld [vmem:[%s1604_s28 + $0xa0] ss:$8 sps:$4 sm:$0xff]   ;;  %v1458_v5 = vld [vmem:[%s1604_s28 + $0x194] ss:$8 sps:$4 sm:$0xff]  }
  0x28   : > { %818 = vmatprep.subr.bf16.mxu1 %v1404_v22  ;;  %v1455_v3 = vld [vmem:[%s1604_s28 + $0x1a0] ss:$8 sps:$4 sm:$0xff]   ;;  %v1460_v6 = vld [vmem:[%s1604_s28 + $0x90] ss:$8 sps:$4 sm:$0xff]   ;;  %v1462_v8 = vld [vmem:[%s1604_s28 + $0x84] ss:$8 sps:$4 sm:$0xff]  }
  0x29   : > { %v338_v59 = vcombine.high %v330_v55, %v330_v55  ;;  %v1461_v7 = vld [vmem:[%s1604_s28 + $0x190] ss:$8 sps:$4 sm:$0xff]   ;;  %v1464_v9 = vld [vmem:[%s1604_s28 + $0x184] ss:$8 sps:$4 sm:$0xff]   ;;  %v345_v10 = vrot.slane %v330_v55, %v1654_v50  ;;  %v1466_v11 = vld [vmem:[%s1604_s28 + $0x80] ss:$8 sps:$4 sm:$0xff]  }
  0x2a   : > { %778 = vmatpush1.bf16.msra.mxu0 %v1406_v23  ;;  %v1467_v12 = vld [vmem:[%s1604_s28 + $0x180] ss:$8 sps:$4 sm:$0xff]   ;;  %v1471_v13 = vld [vmem:[%s1604_s28 + $0x274] ss:$8 sps:$4 sm:$0xff]   ;;  %v1469_v15 = vld [vmem:[%s1604_s28 + $0x270] ss:$8 sps:$4 sm:$0xff]  }
  0x2b   : > { %819 = vmatpush1.bf16.msra.mxu1 %v1407_v24  ;;  %779 = vmatprep.subr.bf16.mxu0 %v1408_v25  ;;  %v359_v61 = vrot.slane %v338_v59, %v1654_v50  ;;  %v360_v14 = vcombine.high %v345_v10, %v345_v10  ;;  %v1474_v16 = vld [vmem:[%s1604_s28 + $0x264] ss:$8 sps:$4 sm:$0xff]   ;;  %v1472_v17 = vld [vmem:[%s1604_s28 + $0x260] ss:$8 sps:$4 sm:$0xff]   ;;  %v1551_v18 = vmov 0  }
  0x2c   : > { %820 = vmatprep.subr.bf16.mxu1 %v1410_v26  ;;  %v1477_v19 = vld [vmem:[%s1604_s28 + $0x254] ss:$8 sps:$4 sm:$0xff]   ;;  %v1475_v20 = vld [vmem:[%s1604_s28 + $0x250] ss:$8 sps:$4 sm:$0xff]   ;;  %v1480_v21 = vld [vmem:[%s1604_s28 + $0x244] ss:$8 sps:$4 sm:$0xff]  }
  0x2d   : > { %v361_v1 = vcombine.high %v359_v61, %v359_v61  ;;  %799 = vmatprep.mubr.bf16.mxu0 %v359_v61  ;;  %v1478_v22 = vld [vmem:[%s1604_s28 + $0x240] ss:$8 sps:$4 sm:$0xff]   ;;  %v1483_v23 = vld [vmem:[%s1604_s28 + $0x234] ss:$8 sps:$4 sm:$0xff]   ;;  %v1481_v24 = vld [vmem:[%s1604_s28 + $0x230] ss:$8 sps:$4 sm:$0xff]  }
  0x2e   : > { %780 = vmatpush1.bf16.msra.mxu0 %v1412_v27  ;;  %v1486_v25 = vld [vmem:[%s1604_s28 + $0x224] ss:$8 sps:$4 sm:$0xff]   ;;  %v1484_v26 = vld [vmem:[%s1604_s28 + $0x220] ss:$8 sps:$4 sm:$0xff]   ;;  %v1489_v27 = vld [vmem:[%s1604_s28 + $0x214] ss:$8 sps:$4 sm:$0xff]  }
  0x2f   : > { %821 = vmatpush1.bf16.msra.mxu1 %v1413_v28  ;;  %781 = vmatprep.subr.bf16.mxu0 %v1414_v29  ;;  %v323_v28 = vcombine.high %v1663_v53, %v1663_v53  ;;  %v1487_v29 = vld [vmem:[%s1604_s28 + $0x210] ss:$8 sps:$4 sm:$0xff]   ;;  %v240_v55 = vld [vmem:[#allocation2] sm:$0xf] }
  0x30   : > { %822 = vmatprep.subr.bf16.mxu1 %v1416_v30  ;;  %840 = vmatprep.mubr.bf16.mxu1 %v361_v1  ;;  %v1492_v30 = vld [vmem:[%s1604_s28 + $0x204] ss:$8 sps:$4 sm:$0xff]  }
  0x32   : > { %782 = vmatpush1.bf16.msra.mxu0 %v1418_v31  ;;  %v337_v31 = vrot.slane %v323_v28, %v1654_v50 }
  0x33   : > { %823 = vmatpush1.bf16.msra.mxu1 %v1419_v32  ;;  %783 = vmatprep.subr.bf16.mxu0 %v1420_v33  ;;  %v1490_v32 = vld [vmem:[%s1604_s28 + $0x200] ss:$8 sps:$4 sm:$0xff]  }
  0x34   : > { %824 = vmatprep.subr.bf16.mxu1 %v1422_v34  ;;  %v352_v33 = vrot.slane %v337_v31, %v1654_v50 }
  0x36   : > { %784 = vmatpush2.bf16.msra.mxu0 %v1424_v35 }
  0x37   : > { %825 = vmatpush2.bf16.msra.mxu1 %v1425_v36  ;;  %785 = vmatprep.subr.bf16.mxu0 %v1426_v40 }
  0x38   : > { %826 = vmatprep.subr.bf16.mxu1 %v1428_v41 }
  0x3a   : > { %786 = vmatpush2.bf16.msra.mxu0 %v1430_v42  ;;  %v1552_v42 = vmov 1983009808  }
  0x3b   : > { %827 = vmatpush2.bf16.msra.mxu1 %v1431_v45  ;;  %787 = vmatprep.subr.bf16.mxu0 %v1432_v46  ;;  %v894_v43 = vunpack.c.l.s4 %v1552_v42 }
  0x3c   : > { %828 = vmatprep.subr.bf16.mxu1 %v1434_v47 }
  0x3d   : > { %v895_v45 = vunpack.c.0.s8 %v894_v43 }
  0x3e   : > { %788 = vmatpush2.bf16.msra.mxu0 %v1436_v48 }
  0x3f   : > { %829 = vmatpush2.bf16.msra.mxu1 %v1437_v49  ;;  %789 = vmatprep.subr.bf16.mxu0 %v1438_v51  ;;  %v898_v50 = vsub.s32 %v895_v45, %v1646_v44 }
  0x40   : > { %830 = vmatprep.subr.bf16.mxu1 %v1440_v52 }
  0x42   : > { %790 = vmatpush2.bf16.msra.mxu0 %v1442_v54 }
  0x43   : > { %831 = vmatpush2.bf16.msra.mxu1 %v1443_v56  ;;  %791 = vmatprep.subr.bf16.mxu0 %v1444_v57 }
  0x44   : > { %832 = vmatprep.subr.bf16.mxu1 %v1446_v58 }
  0x46   : > { %792 = vmatpush2.bf16.msra.mxu0 %v1448_v60 }
  0x47   : > { %833 = vmatpush2.bf16.msra.mxu1 %v1449_v62  ;;  %793 = vmatprep.subr.bf16.mxu0 %v1450_v63 }
  0x48   : > { %834 = vmatprep.subr.bf16.mxu1 %v1452_v0 }
  0x4a   : > { %794 = vmatpush2.bf16.msra.mxu0 %v1454_v2 }
  0x4b   : > { %835 = vmatpush2.bf16.msra.mxu1 %v1455_v3  ;;  %795 = vmatprep.subr.bf16.mxu0 %v1456_v4 }
  0x4c   : > { %836 = vmatprep.subr.bf16.mxu1 %v1458_v5 }
  0x4e   : > { %796 = vmatpush2.bf16.msra.mxu0 %v1460_v6 }
  0x4f   : > { %837 = vmatpush2.bf16.msra.mxu1 %v1461_v7  ;;  %797 = vmatprep.subr.bf16.mxu0 %v1462_v8 }
  0x50   : > { %838 = vmatprep.subr.bf16.mxu1 %v1464_v9 }
  0x52   : > { %798 = vmatpush2.bf16.msra.mxu0 %v1466_v11 }
  0x53   : > { %839 = vmatpush2.bf16.msra.mxu1 %v1467_v12  ;;  %849 = vmatprep.subr.bf16.mxu0 %v1471_v13 }
  0x55   : > { %800 = vmatmul.mubr.bf16.vlgmr.msra.gmra.mxu0 %v345_v10 }
  0x56   : > { %841 = vmatmul.mubr.bf16.vlgmr.msra.gmra.mxu1 %v360_v14  ;;  %850 = vmatpush1.bf16.msra.mxu0 %v1469_v15 }
  0x57   : > { %881 = vmatprep.mubr.bf16.mxu0 %v1551_v18  ;;  %851 = vmatprep.subr.bf16.mxu0 %v1474_v16 }
  0x5a   : > { %852 = vmatpush1.bf16.msra.mxu0 %v1472_v17 }
  0x5b   : > { %853 = vmatprep.subr.bf16.mxu0 %v1477_v19 }
  0x5e   : > { %854 = vmatpush1.bf16.msra.mxu0 %v1475_v20 }
  0x5f   : > { %855 = vmatprep.subr.bf16.mxu0 %v1480_v21 }
  0x62   : > { %856 = vmatpush1.bf16.msra.mxu0 %v1478_v22 }
  0x63   : > { %857 = vmatprep.subr.bf16.mxu0 %v1483_v23 }
  0x66   : > { %858 = vmatpush1.bf16.msra.mxu0 %v1481_v24 }
  0x67   : > { %859 = vmatprep.subr.bf16.mxu0 %v1486_v25 }
  0x6a   : > { %860 = vmatpush1.bf16.msra.mxu0 %v1484_v26 }
  0x6b   : > { %861 = vmatprep.subr.bf16.mxu0 %v1489_v27 }
  0x6e   : > { %862 = vmatpush1.bf16.msra.mxu0 %v1487_v29 }
  0x6f   : > { %863 = vmatprep.subr.bf16.mxu0 %v1492_v30 }
  0x72   : > { %864 = vmatpush1.bf16.msra.mxu0 %v1490_v32 }
  0x75   : > { %882 = vmatmul.mubr.bf16.vlgmr.msra.gmra.mxu0 %v352_v33 }
 0x115   : > { %v801_v34 = vpop.f32.mrf.mxu0 }
 0x116   : > { %v842_v35 = vpop.f32.mrf.mxu1 }
 0x117   : > { %v803_v36 = vpop.f32.mrf.mxu0  ;;  %v843_v47 = vadd.f32 %v842_v35, %v801_v34 }
 0x118   : > { %v844_v37 = vpop.f32.mrf.mxu1 }
 0x119   : > { %v805_v38 = vpop.f32.mrf.mxu0  ;;  %v845_v48 = vadd.f32 %v844_v37, %v803_v36 }
 0x11a   : > { %v846_v39 = vpop.f32.mrf.mxu1 }
 0x11b   : > { %v806_v40 = vpop.f32.mrf.mxu0 }
 0x11c   : > { %v847_v41 = vpop.f32.mrf.mxu1 }
 0x135   : > { %v883_v46 = vpop.f32.mrf.mxu0 }
 0x136   : > { %v884_v51 = vadd.f32 %v883_v46, %v843_v47 }
 0x137   : > { %v885_v49 = vpop.f32.mrf.mxu0 }
 0x138   : > { %v886_v52 = vadd.f32 %v885_v49, %v845_v48 }
 0x139   : > { %v887_v53 = vpop.f32.mrf.mxu0 }
 0x13a   : > { %v892_v54 = vcombine.low %v884_v51, %v886_v52 }
 0x13b   : > { %v888_v56 = vpop.f32.mrf.mxu0 }
 0x13c   : > { %v899_v57 = vrot.slane %v892_v54, %v898_v50  ;;  %906 = sbr.rel (%p1323_p6) target bundleno = 586 (0x24a), region = 48 }
 0x13e   : > { %v901_v58 = vadd.f32 %v899_v57, %v240_v55 }
 0x140   : > { %902 = vst [vmem:[#allocation2] sm:$0xf] %v901_v58 }
 0x141   : > { %v1493_v59 = vld [vmem:[%s1822_s3 + $0x74] ss:$8 sps:$4 sm:$0xff]   ;;  %v1495_v60 = vld [vmem:[%s1822_s3 + $0x70] ss:$8 sps:$4 sm:$0xff]   ;;  %v1496_v61 = vld [vmem:[%s1822_s3 + $0x64] ss:$8 sps:$4 sm:$0xff]  }
 0x142   : > { %1146 = vmatprep.subr.bf16.mxu0 %v1493_v59  ;;  %v1498_v62 = vld [vmem:[%s1822_s3 + $0x60] ss:$8 sps:$4 sm:$0xff]   ;;  %v1499_v63 = vld [vmem:[%s1822_s3 + $0x54] ss:$8 sps:$4 sm:$0xff]   ;;  %v1501_v0 = vld [vmem:[%s1822_s3 + $0x50] ss:$8 sps:$4 sm:$0xff]  }
 0x143   : > { %1147 = vmatpush1.bf16.msra.mxu0 %v1495_v60  ;;  %v1502_v1 = vld [vmem:[%s1822_s3 + $0x44] ss:$8 sps:$4 sm:$0xff]   ;;  %v1504_v2 = vld [vmem:[%s1822_s3 + $0x40] ss:$8 sps:$4 sm:$0xff]   ;;  %v1505_v3 = vld [vmem:[%s1822_s3 + $0x34] ss:$8 sps:$4 sm:$0xff]  }
 0x144   : > { %1148 = vmatprep.subr.bf16.mxu0 %v1496_v61  ;;  %v1507_v4 = vld [vmem:[%s1822_s3 + $0x30] ss:$8 sps:$4 sm:$0xff]   ;;  %v1508_v5 = vld [vmem:[%s1822_s3 + $0x24] ss:$8 sps:$4 sm:$0xff]   ;;  %v912_v6 = vsub.s32 0, %v1646_v44  ;;  %v916_v7 = vsub.s32 1, %v1646_v44 }
 0x145   : > { %v1510_v8 = vld [vmem:[%s1822_s3 + $0x20] ss:$8 sps:$4 sm:$0xff]   ;;  %v1511_v9 = vld [vmem:[%s1822_s3 + $0x14] ss:$8 sps:$4 sm:$0xff]   ;;  %v1513_v44 = vld [vmem:[%s1822_s3 + $0x10] ss:$8 sps:$4 sm:$0xff]  }
 0x146   : > { %v908_v10 = vld [vmem:[%s1821_s2] sm:$0x3]  ;;  %v1514_v13 = vld [vmem:[%s1822_s3 + $0x4] ss:$8 sps:$4 sm:$0xff]   ;;  %v1517_v18 = vld [vmem:[%s1822_s3 + $0xf4] ss:$8 sps:$4 sm:$0xff]  }
 0x147   : > { %1149 = vmatpush1.bf16.msra.mxu0 %v1498_v62  ;;  %v913_v11 = vrot.slane %v908_v10, %v912_v6  ;;  %v917_v12 = vrot.slane %v908_v10, %v916_v7  ;;  %v907_v15 = vld [vmem:[#allocation2] sm:$0xf]  ;;  %v1519_v21 = vld [vmem:[%s1822_s3 + $0xf0] ss:$8 sps:$4 sm:$0xff]   ;;  %v1520_v22 = vld [vmem:[%s1822_s3 + $0xe4] ss:$8 sps:$4 sm:$0xff]  }
 0x148   : > { %1150 = vmatprep.subr.bf16.mxu0 %v1499_v63  ;;  %v1516_v17 = vld [vmem:[%s1822_s3] ss:$8 sps:$4 sm:$0xff]   ;;  %v1523_v26 = vld [vmem:[%s1822_s3 + $0xd4] ss:$8 sps:$4 sm:$0xff]   ;;  %v1525_v28 = vld [vmem:[%s1822_s3 + $0xd0] ss:$8 sps:$4 sm:$0xff]  }
 0x149   : > { %v918_v14 = vcombine.low %v913_v11, %v917_v12  ;;  %v1522_v25 = vld [vmem:[%s1822_s3 + $0xe0] ss:$8 sps:$4 sm:$0xff]   ;;  %v1526_v29 = vld [vmem:[%s1822_s3 + $0xc4] ss:$8 sps:$4 sm:$0xff]   ;;  %v1529_v31 = vld [vmem:[%s1822_s3 + $0xb4] ss:$8 sps:$4 sm:$0xff]  }
 0x14a   : > { %v1528_v30 = vld [vmem:[%s1822_s3 + $0xc0] ss:$8 sps:$4 sm:$0xff]   ;;  %v1531_v32 = vld [vmem:[%s1822_s3 + $0xb0] ss:$8 sps:$4 sm:$0xff]   ;;  %v1532_v33 = vld [vmem:[%s1822_s3 + $0xa4] ss:$8 sps:$4 sm:$0xff]  }
 0x14b   : > { %1151 = vmatpush1.bf16.msra.mxu0 %v1501_v0  ;;  %v925_v16 = vrot.slane %v918_v14, %v898_v50  ;;  %v1534_v34 = vld [vmem:[%s1822_s3 + $0xa0] ss:$8 sps:$4 sm:$0xff]   ;;  %v1535_v35 = vld [vmem:[%s1822_s3 + $0x94] ss:$8 sps:$4 sm:$0xff]   ;;  %v1537_v36 = vld [vmem:[%s1822_s3 + $0x90] ss:$8 sps:$4 sm:$0xff]  }
 0x14c   : > { %1152 = vmatprep.subr.bf16.mxu0 %v1502_v1  ;;  %v1538_v37 = vld [vmem:[%s1822_s3 + $0x84] ss:$8 sps:$4 sm:$0xff]   ;;  %v1540_v38 = vld [vmem:[%s1822_s3 + $0x80] ss:$8 sps:$4 sm:$0xff]  }
 0x14d   : > { %v927_v19 = vadd.f32 %v925_v16, %v907_v15  ;;  %v974_v40 = vld [vmem:[%s1823_s4] sm:$0x3] }
 0x14e   : > { %v979_v41 = vrot.slane %v974_v40, %v912_v6  ;;  %v983_v42 = vrot.slane %v974_v40, %v916_v7 }
 0x14f   : > { %1153 = vmatpush1.bf16.msra.mxu0 %v1504_v2  ;;  %v928_v20 = vmax.f32 %v927_v19, 0.0 }
 0x150   : > { %1154 = vmatprep.subr.bf16.mxu0 %v1505_v3 }
 0x151   : > { %v936_v23 = vrot.slane %v928_v20, %v898_v50 }
 0x153   : > { %1155 = vmatpush1.bf16.msra.mxu0 %v1507_v4  ;;  %v937_v24 = vcombine.high %v936_v23, %v936_v23  ;;  %v940_v39 = vpack.c.bf16 %v936_v23, %v936_v23 }
 0x154   : > { %1156 = vmatprep.subr.bf16.mxu0 %v1508_v5 }
 0x155   : > { %v941_v27 = vpack.c.bf16 %v937_v24, %v937_v24 }
 0x157   : > { %1157 = vmatpush1.bf16.msra.mxu0 %v1510_v8  ;;  %1178 = vmatprep.mubr.bf16.mxu0 %v941_v27 }
 0x158   : > { %1158 = vmatprep.subr.bf16.mxu0 %v1511_v9 }
 0x15b   : > { %1159 = vmatpush1.bf16.msra.mxu0 %v1513_v44 }
 0x15c   : > { %1160 = vmatprep.subr.bf16.mxu0 %v1514_v13 }
 0x15f   : > { %1161 = vmatpush1.bf16.msra.mxu0 %v1516_v17 }
 0x160   : > { %1162 = vmatprep.subr.bf16.mxu0 %v1517_v18 }
 0x163   : > { %1163 = vmatpush2.bf16.msra.mxu0 %v1519_v21 }
 0x164   : > { %1164 = vmatprep.subr.bf16.mxu0 %v1520_v22 }
 0x167   : > { %1165 = vmatpush2.bf16.msra.mxu0 %v1522_v25 }
 0x168   : > { %1166 = vmatprep.subr.bf16.mxu0 %v1523_v26 }
 0x16b   : > { %1167 = vmatpush2.bf16.msra.mxu0 %v1525_v28 }
 0x16c   : > { %1168 = vmatprep.subr.bf16.mxu0 %v1526_v29 }
 0x16f   : > { %1169 = vmatpush2.bf16.msra.mxu0 %v1528_v30 }
 0x170   : > { %1170 = vmatprep.subr.bf16.mxu0 %v1529_v31 }
 0x173   : > { %1171 = vmatpush2.bf16.msra.mxu0 %v1531_v32 }
 0x174   : > { %1172 = vmatprep.subr.bf16.mxu0 %v1532_v33 }
 0x177   : > { %1173 = vmatpush2.bf16.msra.mxu0 %v1534_v34 }
 0x178   : > { %1174 = vmatprep.subr.bf16.mxu0 %v1535_v35 }
 0x17b   : > { %1175 = vmatpush2.bf16.msra.mxu0 %v1537_v36 }
 0x17c   : > { %1176 = vmatprep.subr.bf16.mxu0 %v1538_v37 }
 0x17f   : > { %1177 = vmatpush2.bf16.msra.mxu0 %v1540_v38 }
 0x182   : > { %1179 = vmatmul.mubr.bf16.vlgmr.msra.gmra.mxu0 %v940_v39 }
 0x242   : > { %v1180_v43 = vpop.f32.mrf.mxu0 }
 0x243   : > { %v1181_v46 = vadd.f32 %v1180_v43, %v979_v41 }
 0x244   : > { %v1182_v45 = vpop.f32.mrf.mxu0 }
 0x245   : > { %v1183_v47 = vadd.f32 %v1182_v45, %v983_v42 }
 0x246   : > { %v1184_v48 = vpop.f32.mrf.mxu0 }
 0x247   : > { %v1189_v49 = vcombine.low %v1181_v46, %v1183_v47 }
 0x248   : > { %v1185_v51 = vpop.f32.mrf.mxu0 }
 0x249   : > { %1356 = vst.sshfl [vmem:[%s1824_s5] sm:$0x33 pattern:$0x76325410] %v1189_v49 }
 0x24a PF: > { %s15_s18 = sadd.s32 1, %s1547_s18  }
 0x24b   : > { %p12_p7 = scmp.ge.s32.totalorder %s15_s18, 7  }
 0x24d   :  { %14 = sbr.rel (!%p12_p7) target bundleno = 1 (0x1), region = 77 }

// kernel: rnd_forward.15
= control target key start
LH: loop header
LB: loop body
LE: loop exit
PB: predicated region body
PF: predicated region fallthrough
CT: control target
= control target key end

     0   :  { %s1976_s24 = smov 0   ;;  %s2332_s0 = inlined_call_operand.vmem [shape: bf16[2,3200], index: 0, kind: input, shape index: {}]   ;;  %s2333_s1 = inlined_call_operand.vmem [shape: bf16[3200,256], index: 1, kind: input, shape index: {}]   ;;  %s2334_s2 = inlined_call_operand.vmem [shape: f32[1,256], index: 2, kind: input, shape index: {}]   ;;  %s2335_s3 = inlined_call_operand.vmem [shape: bf16[256,256], index: 3, kind: input, shape index: {}]   ;;  %s2336_s4 = inlined_call_operand.vmem [shape: f32[1,256], index: 4, kind: input, shape index: {}]   ;;  %s2337_s5 = inlined_call_operand.vmem [shape: bf16[256,256], index: 5, kind: input, shape index: {}]   ;;  %s2338_s6 = inlined_call_operand.vmem [shape: f32[1,256], index: 6, kind: input, shape index: {}]   ;;  %s2339_s7 = inlined_call_operand.vmem [shape: f32[2,256], index: 7, kind: output, shape index: {}]  }
   0x1 LB: > { %s1982_s25 = sadd.s32 4294967295, %s1930_s24   ;;  %p1542_p0 = scmp.ge.s32.totalorder %s1930_s24, 1  ;;  %s1930_s24 = sphi %s1976_s24, %s17_s24  }
   0x2   : > { %p244_p1 = scmp.lt.s32.totalorder %s1930_s24, 6 }
   0x4   : > { %p245_p2 = pnand %p1542_p0, %p244_p1 }
   0x5   : > { %s276_s26 = smul.u32 (!%p245_p2), 5, %s1982_s25  ;;  %p1545_p5 = scmp.ne.s32.totalorder (!%p245_p2), %s1982_s25, 0 }
   0x6   : > { %248 = sbr.rel (%p245_p2) target bundleno = 788 (0x314), region = 48 }
   0x7   : > { %s281_s27 = smul.u32 (!%p245_p2), 80, %s1982_s25  ;;  %p277_p3 = scmp.lt.s32.totalorder (!%p245_p2), %s276_s26, 24 }
   0x9   : > { %p282_p4 = scmp.lt.s32.totalorder (!%p245_p2), %s281_s27, 399 }
   0xb   : > { %s2341_s26 = smov (!%p277_p3, %s276_s26), 24  ;;  %s2343_s27 = smov (!%p282_p4, %s281_s27), 399 }
   0xc   : > { %s279_s30 = scalar_lea.vmem %s2332_s0, %s2341_s26  ;;  %s1694_s8 = sshll.u32 %s2343_s27, 3 }
   0xd   : > { %s1997_s11 = scalar_lea.vmem %s2333_s1, %s1694_s8  ;;  %292 = sbr.rel (%p1545_p5) target bundleno = 20 (0x14), region = 52 }
  0x12   : > { %v1932_v0 = vmov 0.0  }
  0x13   : > { %293 = vst [vmem:[#allocation2] sm:$0xf] %v1932_v0 }
  0x14 PF: > { %v1707_v1 = vld [vmem:[%s1997_s11 + $0x74] ss:$8 sps:$4 sm:$0xff]   ;;  %v1711_v3 = vld [vmem:[%s1997_s11 + $0x70] ss:$8 sps:$4 sm:$0xff]   ;;  %v1713_v5 = vld [vmem:[%s1997_s11 + $0x64] ss:$8 sps:$4 sm:$0xff]   ;;  %v381_v39 = vlaneseq }
  0x15   : > { %v1709_v2 = vld [vmem:[%s1997_s11 + $0x174] ss:$8 sps:$4 sm:$0xff]   ;;  %821 = vmatprep.subr.bf16.mxu0 %v1707_v1  ;;  %v1712_v4 = vld [vmem:[%s1997_s11 + $0x170] ss:$8 sps:$4 sm:$0xff]   ;;  %v1715_v6 = vld [vmem:[%s1997_s11 + $0x164] ss:$8 sps:$4 sm:$0xff]  }
  0x16   : > { %862 = vmatprep.subr.bf16.mxu1 %v1709_v2  ;;  %822 = vmatpush1.bf16.msra.mxu0 %v1711_v3  ;;  %v1717_v7 = vld [vmem:[%s1997_s11 + $0x60] ss:$8 sps:$4 sm:$0xff]   ;;  %v1719_v9 = vld [vmem:[%s1997_s11 + $0x54] ss:$8 sps:$4 sm:$0xff]   ;;  %v1723_v11 = vld [vmem:[%s1997_s11 + $0x50] ss:$8 sps:$4 sm:$0xff]  }
  0x17   : > { %863 = vmatpush1.bf16.msra.mxu1 %v1712_v4  ;;  %823 = vmatprep.subr.bf16.mxu0 %v1713_v5  ;;  %v1718_v8 = vld [vmem:[%s1997_s11 + $0x160] ss:$8 sps:$4 sm:$0xff]   ;;  %v1721_v10 = vld [vmem:[%s1997_s11 + $0x154] ss:$8 sps:$4 sm:$0xff]   ;;  %v1724_v12 = vld [vmem:[%s1997_s11 + $0x150] ss:$8 sps:$4 sm:$0xff]  }
  0x18   : > { %864 = vmatprep.subr.bf16.mxu1 %v1715_v6  ;;  %v1725_v13 = vld [vmem:[%s1997_s11 + $0x44] ss:$8 sps:$4 sm:$0xff]   ;;  %v1729_v15 = vld [vmem:[%s1997_s11 + $0x40] ss:$8 sps:$4 sm:$0xff]   ;;  %v1731_v17 = vld [vmem:[%s1997_s11 + $0x34] ss:$8 sps:$4 sm:$0xff]  }
  0x19   : > { %v1727_v14 = vld [vmem:[%s1997_s11 + $0x144] ss:$8 sps:$4 sm:$0xff]   ;;  %v1730_v16 = vld [vmem:[%s1997_s11 + $0x140] ss:$8 sps:$4 sm:$0xff]   ;;  %v1733_v18 = vld [vmem:[%s1997_s11 + $0x134] ss:$8 sps:$4 sm:$0xff]  }
  0x1a   : > { %824 = vmatpush1.bf16.msra.mxu0 %v1717_v7  ;;  %v1735_v19 = vld [vmem:[%s1997_s11 + $0x30] ss:$8 sps:$4 sm:$0xff]   ;;  %v1737_v21 = vld [vmem:[%s1997_s11 + $0x24] ss:$8 sps:$4 sm:$0xff]   ;;  %v1741_v23 = vld [vmem:[%s1997_s11 + $0x20] ss:$8 sps:$4 sm:$0xff]  }
  0x1b   : > { %865 = vmatpush1.bf16.msra.mxu1 %v1718_v8  ;;  %825 = vmatprep.subr.bf16.mxu0 %v1719_v9  ;;  %v1736_v20 = vld [vmem:[%s1997_s11 + $0x130] ss:$8 sps:$4 sm:$0xff]   ;;  %v1739_v22 = vld [vmem:[%s1997_s11 + $0x124] ss:$8 sps:$4 sm:$0xff]   ;;  %v1742_v24 = vld [vmem:[%s1997_s11 + $0x120] ss:$8 sps:$4 sm:$0xff]  }
  0x1c   : > { %866 = vmatprep.subr.bf16.mxu1 %v1721_v10  ;;  %v1743_v25 = vld [vmem:[%s1997_s11 + $0x14] ss:$8 sps:$4 sm:$0xff]   ;;  %v1747_v27 = vld [vmem:[%s1997_s11 + $0x10] ss:$8 sps:$4 sm:$0xff]   ;;  %v1749_v29 = vld [vmem:[%s1997_s11 + $0x4] ss:$8 sps:$4 sm:$0xff]  }
  0x1d   : > { %v1745_v26 = vld [vmem:[%s1997_s11 + $0x114] ss:$8 sps:$4 sm:$0xff]   ;;  %v1748_v28 = vld [vmem:[%s1997_s11 + $0x110] ss:$8 sps:$4 sm:$0xff]   ;;  %v1751_v30 = vld [vmem:[%s1997_s11 + $0x104] ss:$8 sps:$4 sm:$0xff]  }
  0x1e   : > { %826 = vmatpush1.bf16.msra.mxu0 %v1723_v11  ;;  %v1753_v31 = vld [vmem:[%s1997_s11] ss:$8 sps:$4 sm:$0xff]   ;;  %v1755_v33 = vld [vmem:[%s1997_s11 + $0xf4] ss:$8 sps:$4 sm:$0xff]   ;;  %v1759_v35 = vld [vmem:[%s1997_s11 + $0xf0] ss:$8 sps:$4 sm:$0xff]  }
  0x1f   : > { %867 = vmatpush1.bf16.msra.mxu1 %v1724_v12  ;;  %827 = vmatprep.subr.bf16.mxu0 %v1725_v13  ;;  %v1754_v32 = vld [vmem:[%s1997_s11 + $0x100] ss:$8 sps:$4 sm:$0xff]   ;;  %v1757_v34 = vld [vmem:[%s1997_s11 + $0x1f4] ss:$8 sps:$4 sm:$0xff]   ;;  %v1760_v36 = vld [vmem:[%s1997_s11 + $0x1f0] ss:$8 sps:$4 sm:$0xff]  }
  0x20   : > { %868 = vmatprep.subr.bf16.mxu1 %v1727_v14  ;;  %v1933_v37 = vmov 1966171168   ;;  %v1761_v40 = vld [vmem:[%s1997_s11 + $0xe4] ss:$8 sps:$4 sm:$0xff]   ;;  %v1765_v42 = vld [vmem:[%s1997_s11 + $0xe0] ss:$8 sps:$4 sm:$0xff]  }
  0x21   : > { %v379_v38 = vunpack.c.l.s4 %v1933_v37  ;;  %v1763_v41 = vld [vmem:[%s1997_s11 + $0x1e4] ss:$8 sps:$4 sm:$0xff]   ;;  %v2039_v44 = vshrl.u32 %v381_v39, 7  ;;  %v1766_v45 = vld [vmem:[%s1997_s11 + $0x1e0] ss:$8 sps:$4 sm:$0xff]   ;;  %p1626_p6 = scmp.ne.s32.totalorder %s1982_s25, 4 }
  0x22   : > { %828 = vmatpush1.bf16.msra.mxu0 %v1729_v15  ;;  %v1767_v46 = vld [vmem:[%s1997_s11 + $0xd4] ss:$8 sps:$4 sm:$0xff]   ;;  %v1771_v48 = vld [vmem:[%s1997_s11 + $0xd0] ss:$8 sps:$4 sm:$0xff]   ;;  %v1773_v51 = vld [vmem:[%s1997_s11 + $0xc4] ss:$8 sps:$4 sm:$0xff]  }
  0x23   : > { %869 = vmatpush1.bf16.msra.mxu1 %v1730_v16  ;;  %829 = vmatprep.subr.bf16.mxu0 %v1731_v17  ;;  %v380_v43 = vunpack.c.0.s8 %v379_v38  ;;  %v1769_v47 = vld [vmem:[%s1997_s11 + $0x1d4] ss:$8 sps:$4 sm:$0xff]   ;;  %v1772_v49 = vld [vmem:[%s1997_s11 + $0x1d0] ss:$8 sps:$4 sm:$0xff]   ;;  %v1775_v52 = vld [vmem:[%s1997_s11 + $0x1c4] ss:$8 sps:$4 sm:$0xff]  }
  0x24   : > { %870 = vmatprep.subr.bf16.mxu1 %v1733_v18  ;;  %v2056_v53 = vld [vmem:[%s279_s30] sm:$0x1f]  ;;  %v1779_v57 = vld [vmem:[%s1997_s11 + $0xb4] ss:$8 sps:$4 sm:$0xff]   ;;  %v1783_v60 = vld [vmem:[%s1997_s11 + $0xb0] ss:$8 sps:$4 sm:$0xff]  }
  0x25   : > { %v2047_v50 = vsub.s32 %v380_v43, %v2039_v44  ;;  %v1777_v54 = vld [vmem:[%s1997_s11 + $0xc0] ss:$8 sps:$4 sm:$0xff]   ;;  %v1781_v58 = vld [vmem:[%s1997_s11 + $0x1b4] ss:$8 sps:$4 sm:$0xff]   ;;  %v1784_v62 = vld [vmem:[%s1997_s11 + $0x1b0] ss:$8 sps:$4 sm:$0xff]  }
  0x26   : > { %830 = vmatpush1.bf16.msra.mxu0 %v1735_v19  ;;  %v1778_v56 = vld [vmem:[%s1997_s11 + $0x1c0] ss:$8 sps:$4 sm:$0xff]   ;;  %v1785_v63 = vld [vmem:[%s1997_s11 + $0xa4] ss:$8 sps:$4 sm:$0xff]   ;;  %v1791_v4 = vld [vmem:[%s1997_s11 + $0x94] ss:$8 sps:$4 sm:$0xff]  }
  0x27   : > { %871 = vmatpush1.bf16.msra.mxu1 %v1736_v20  ;;  %831 = vmatprep.subr.bf16.mxu0 %v1737_v21  ;;  %v384_v55 = vrot.slane %v2056_v53, %v2047_v50  ;;  %v1787_v0 = vld [vmem:[%s1997_s11 + $0x1a4] ss:$8 sps:$4 sm:$0xff]   ;;  %v1789_v2 = vld [vmem:[%s1997_s11 + $0xa0] ss:$8 sps:$4 sm:$0xff]   ;;  %v1793_v5 = vld [vmem:[%s1997_s11 + $0x194] ss:$8 sps:$4 sm:$0xff]  }
  0x28   : > { %872 = vmatprep.subr.bf16.mxu1 %v1739_v22  ;;  %v1790_v3 = vld [vmem:[%s1997_s11 + $0x1a0] ss:$8 sps:$4 sm:$0xff]   ;;  %v1795_v6 = vld [vmem:[%s1997_s11 + $0x90] ss:$8 sps:$4 sm:$0xff]   ;;  %v1797_v8 = vld [vmem:[%s1997_s11 + $0x84] ss:$8 sps:$4 sm:$0xff]  }
  0x29   : > { %v392_v59 = vcombine.high %v384_v55, %v384_v55  ;;  %v1796_v7 = vld [vmem:[%s1997_s11 + $0x190] ss:$8 sps:$4 sm:$0xff]   ;;  %v1799_v9 = vld [vmem:[%s1997_s11 + $0x184] ss:$8 sps:$4 sm:$0xff]   ;;  %v399_v10 = vrot.slane %v384_v55, %v2047_v50  ;;  %v1801_v11 = vld [vmem:[%s1997_s11 + $0x80] ss:$8 sps:$4 sm:$0xff]  }
  0x2a   : > { %832 = vmatpush1.bf16.msra.mxu0 %v1741_v23  ;;  %v1802_v12 = vld [vmem:[%s1997_s11 + $0x180] ss:$8 sps:$4 sm:$0xff]   ;;  %v1806_v13 = vld [vmem:[%s1997_s11 + $0x274] ss:$8 sps:$4 sm:$0xff]   ;;  %v1804_v15 = vld [vmem:[%s1997_s11 + $0x270] ss:$8 sps:$4 sm:$0xff]  }
  0x2b   : > { %873 = vmatpush1.bf16.msra.mxu1 %v1742_v24  ;;  %833 = vmatprep.subr.bf16.mxu0 %v1743_v25  ;;  %v413_v61 = vrot.slane %v392_v59, %v2047_v50  ;;  %v414_v14 = vcombine.high %v399_v10, %v399_v10  ;;  %v1809_v16 = vld [vmem:[%s1997_s11 + $0x264] ss:$8 sps:$4 sm:$0xff]   ;;  %v1807_v17 = vld [vmem:[%s1997_s11 + $0x260] ss:$8 sps:$4 sm:$0xff]   ;;  %v1934_v18 = vmov 0  }
  0x2c   : > { %874 = vmatprep.subr.bf16.mxu1 %v1745_v26  ;;  %v1812_v19 = vld [vmem:[%s1997_s11 + $0x254] ss:$8 sps:$4 sm:$0xff]   ;;  %v1810_v20 = vld [vmem:[%s1997_s11 + $0x250] ss:$8 sps:$4 sm:$0xff]   ;;  %v1815_v21 = vld [vmem:[%s1997_s11 + $0x244] ss:$8 sps:$4 sm:$0xff]  }
  0x2d   : > { %v415_v1 = vcombine.high %v413_v61, %v413_v61  ;;  %853 = vmatprep.mubr.bf16.mxu0 %v413_v61  ;;  %v1813_v22 = vld [vmem:[%s1997_s11 + $0x240] ss:$8 sps:$4 sm:$0xff]   ;;  %v1818_v23 = vld [vmem:[%s1997_s11 + $0x234] ss:$8 sps:$4 sm:$0xff]   ;;  %v1816_v24 = vld [vmem:[%s1997_s11 + $0x230] ss:$8 sps:$4 sm:$0xff]  }
  0x2e   : > { %834 = vmatpush1.bf16.msra.mxu0 %v1747_v27  ;;  %v1821_v25 = vld [vmem:[%s1997_s11 + $0x224] ss:$8 sps:$4 sm:$0xff]   ;;  %v1819_v26 = vld [vmem:[%s1997_s11 + $0x220] ss:$8 sps:$4 sm:$0xff]   ;;  %v1824_v27 = vld [vmem:[%s1997_s11 + $0x214] ss:$8 sps:$4 sm:$0xff]  }
  0x2f   : > { %875 = vmatpush1.bf16.msra.mxu1 %v1748_v28  ;;  %835 = vmatprep.subr.bf16.mxu0 %v1749_v29  ;;  %v377_v28 = vcombine.high %v2056_v53, %v2056_v53  ;;  %v1822_v29 = vld [vmem:[%s1997_s11 + $0x210] ss:$8 sps:$4 sm:$0xff]   ;;  %v294_v55 = vld [vmem:[#allocation2] sm:$0xf] }
  0x30   : > { %876 = vmatprep.subr.bf16.mxu1 %v1751_v30  ;;  %894 = vmatprep.mubr.bf16.mxu1 %v415_v1  ;;  %v1827_v30 = vld [vmem:[%s1997_s11 + $0x204] ss:$8 sps:$4 sm:$0xff]  }
  0x32   : > { %836 = vmatpush1.bf16.msra.mxu0 %v1753_v31  ;;  %v391_v31 = vrot.slane %v377_v28, %v2047_v50 }
  0x33   : > { %877 = vmatpush1.bf16.msra.mxu1 %v1754_v32  ;;  %837 = vmatprep.subr.bf16.mxu0 %v1755_v33  ;;  %v1825_v32 = vld [vmem:[%s1997_s11 + $0x200] ss:$8 sps:$4 sm:$0xff]  }
  0x34   : > { %878 = vmatprep.subr.bf16.mxu1 %v1757_v34  ;;  %v406_v33 = vrot.slane %v391_v31, %v2047_v50 }
  0x36   : > { %838 = vmatpush2.bf16.msra.mxu0 %v1759_v35 }
  0x37   : > { %879 = vmatpush2.bf16.msra.mxu1 %v1760_v36  ;;  %839 = vmatprep.subr.bf16.mxu0 %v1761_v40 }
  0x38   : > { %880 = vmatprep.subr.bf16.mxu1 %v1763_v41 }
  0x3a   : > { %840 = vmatpush2.bf16.msra.mxu0 %v1765_v42  ;;  %v1935_v42 = vmov 1983009808  }
  0x3b   : > { %881 = vmatpush2.bf16.msra.mxu1 %v1766_v45  ;;  %841 = vmatprep.subr.bf16.mxu0 %v1767_v46  ;;  %v948_v43 = vunpack.c.l.s4 %v1935_v42 }
  0x3c   : > { %882 = vmatprep.subr.bf16.mxu1 %v1769_v47 }
  0x3d   : > { %v949_v45 = vunpack.c.0.s8 %v948_v43 }
  0x3e   : > { %842 = vmatpush2.bf16.msra.mxu0 %v1771_v48 }
  0x3f   : > { %883 = vmatpush2.bf16.msra.mxu1 %v1772_v49  ;;  %843 = vmatprep.subr.bf16.mxu0 %v1773_v51  ;;  %v2101_v50 = vsub.s32 %v949_v45, %v2039_v44 }
  0x40   : > { %884 = vmatprep.subr.bf16.mxu1 %v1775_v52 }
  0x42   : > { %844 = vmatpush2.bf16.msra.mxu0 %v1777_v54 }
  0x43   : > { %885 = vmatpush2.bf16.msra.mxu1 %v1778_v56  ;;  %845 = vmatprep.subr.bf16.mxu0 %v1779_v57 }
  0x44   : > { %886 = vmatprep.subr.bf16.mxu1 %v1781_v58 }
  0x46   : > { %846 = vmatpush2.bf16.msra.mxu0 %v1783_v60 }
  0x47   : > { %887 = vmatpush2.bf16.msra.mxu1 %v1784_v62  ;;  %847 = vmatprep.subr.bf16.mxu0 %v1785_v63 }
  0x48   : > { %888 = vmatprep.subr.bf16.mxu1 %v1787_v0 }
  0x4a   : > { %848 = vmatpush2.bf16.msra.mxu0 %v1789_v2 }
  0x4b   : > { %889 = vmatpush2.bf16.msra.mxu1 %v1790_v3  ;;  %849 = vmatprep.subr.bf16.mxu0 %v1791_v4 }
  0x4c   : > { %890 = vmatprep.subr.bf16.mxu1 %v1793_v5 }
  0x4e   : > { %850 = vmatpush2.bf16.msra.mxu0 %v1795_v6 }
  0x4f   : > { %891 = vmatpush2.bf16.msra.mxu1 %v1796_v7  ;;  %851 = vmatprep.subr.bf16.mxu0 %v1797_v8 }
  0x50   : > { %892 = vmatprep.subr.bf16.mxu1 %v1799_v9 }
  0x52   : > { %852 = vmatpush2.bf16.msra.mxu0 %v1801_v11 }
  0x53   : > { %893 = vmatpush2.bf16.msra.mxu1 %v1802_v12  ;;  %903 = vmatprep.subr.bf16.mxu0 %v1806_v13 }
  0x55   : > { %854 = vmatmul.mubr.bf16.vlgmr.msra.gmra.mxu0 %v399_v10 }
  0x56   : > { %895 = vmatmul.mubr.bf16.vlgmr.msra.gmra.mxu1 %v414_v14  ;;  %904 = vmatpush1.bf16.msra.mxu0 %v1804_v15 }
  0x57   : > { %935 = vmatprep.mubr.bf16.mxu0 %v1934_v18  ;;  %905 = vmatprep.subr.bf16.mxu0 %v1809_v16 }
  0x5a   : > { %906 = vmatpush1.bf16.msra.mxu0 %v1807_v17 }
  0x5b   : > { %907 = vmatprep.subr.bf16.mxu0 %v1812_v19 }
  0x5e   : > { %908 = vmatpush1.bf16.msra.mxu0 %v1810_v20 }
  0x5f   : > { %909 = vmatprep.subr.bf16.mxu0 %v1815_v21 }
  0x62   : > { %910 = vmatpush1.bf16.msra.mxu0 %v1813_v22 }
  0x63   : > { %911 = vmatprep.subr.bf16.mxu0 %v1818_v23 }
  0x66   : > { %912 = vmatpush1.bf16.msra.mxu0 %v1816_v24 }
  0x67   : > { %913 = vmatprep.subr.bf16.mxu0 %v1821_v25 }
  0x6a   : > { %914 = vmatpush1.bf16.msra.mxu0 %v1819_v26 }
  0x6b   : > { %915 = vmatprep.subr.bf16.mxu0 %v1824_v27 }
  0x6e   : > { %916 = vmatpush1.bf16.msra.mxu0 %v1822_v29 }
  0x6f   : > { %917 = vmatprep.subr.bf16.mxu0 %v1827_v30 }
  0x72   : > { %918 = vmatpush1.bf16.msra.mxu0 %v1825_v32 }
  0x75   : > { %936 = vmatmul.mubr.bf16.vlgmr.msra.gmra.mxu0 %v406_v33 }
 0x115   : > { %v855_v34 = vpop.f32.mrf.mxu0 }
 0x116   : > { %v896_v35 = vpop.f32.mrf.mxu1 }
 0x117   : > { %v857_v36 = vpop.f32.mrf.mxu0  ;;  %v897_v47 = vadd.f32 %v896_v35, %v855_v34 }
 0x118   : > { %v898_v37 = vpop.f32.mrf.mxu1 }
 0x119   : > { %v859_v38 = vpop.f32.mrf.mxu0  ;;  %v899_v48 = vadd.f32 %v898_v37, %v857_v36 }
 0x11a   : > { %v900_v39 = vpop.f32.mrf.mxu1 }
 0x11b   : > { %v860_v40 = vpop.f32.mrf.mxu0 }
 0x11c   : > { %v901_v41 = vpop.f32.mrf.mxu1 }
 0x135   : > { %v937_v46 = vpop.f32.mrf.mxu0 }
 0x136   : > { %v938_v51 = vadd.f32 %v937_v46, %v897_v47 }
 0x137   : > { %v939_v49 = vpop.f32.mrf.mxu0 }
 0x138   : > { %v940_v52 = vadd.f32 %v939_v49, %v899_v48 }
 0x139   : > { %v941_v53 = vpop.f32.mrf.mxu0 }
 0x13a   : > { %v946_v54 = vcombine.low %v938_v51, %v940_v52 }
 0x13b   : > { %v942_v56 = vpop.f32.mrf.mxu0 }
 0x13c   : > { %v953_v57 = vrot.slane %v946_v54, %v2101_v50  ;;  %960 = sbr.rel (%p1626_p6) target bundleno = 788 (0x314), region = 56 }
 0x13e   : > { %v955_v58 = vadd.f32 %v953_v57, %v294_v55 }
 0x140   : > { %956 = vst [vmem:[#allocation2] sm:$0xf] %v955_v58 }
 0x141   : > { %v1828_v59 = vld [vmem:[%s2335_s3 + $0x74] ss:$8 sps:$4 sm:$0xff]   ;;  %v1830_v60 = vld [vmem:[%s2335_s3 + $0x70] ss:$8 sps:$4 sm:$0xff]   ;;  %v1831_v61 = vld [vmem:[%s2335_s3 + $0x64] ss:$8 sps:$4 sm:$0xff]  }
 0x142   : > { %1200 = vmatprep.subr.bf16.mxu0 %v1828_v59  ;;  %v1833_v62 = vld [vmem:[%s2335_s3 + $0x60] ss:$8 sps:$4 sm:$0xff]   ;;  %v1834_v63 = vld [vmem:[%s2335_s3 + $0x54] ss:$8 sps:$4 sm:$0xff]   ;;  %v1836_v0 = vld [vmem:[%s2335_s3 + $0x50] ss:$8 sps:$4 sm:$0xff]  }
 0x143   : > { %1201 = vmatpush1.bf16.msra.mxu0 %v1830_v60  ;;  %v1837_v1 = vld [vmem:[%s2335_s3 + $0x44] ss:$8 sps:$4 sm:$0xff]   ;;  %v1839_v2 = vld [vmem:[%s2335_s3 + $0x40] ss:$8 sps:$4 sm:$0xff]   ;;  %v1840_v3 = vld [vmem:[%s2335_s3 + $0x34] ss:$8 sps:$4 sm:$0xff]  }
 0x144   : > { %1202 = vmatprep.subr.bf16.mxu0 %v1831_v61  ;;  %v1842_v4 = vld [vmem:[%s2335_s3 + $0x30] ss:$8 sps:$4 sm:$0xff]   ;;  %v1843_v5 = vld [vmem:[%s2335_s3 + $0x24] ss:$8 sps:$4 sm:$0xff]   ;;  %v2139_v6 = vsub.s32 0, %v2039_v44  ;;  %v2142_v7 = vsub.s32 1, %v2039_v44 }
 0x145   : > { %v1845_v8 = vld [vmem:[%s2335_s3 + $0x20] ss:$8 sps:$4 sm:$0xff]   ;;  %v1846_v9 = vld [vmem:[%s2335_s3 + $0x14] ss:$8 sps:$4 sm:$0xff]   ;;  %v1848_v10 = vld [vmem:[%s2335_s3 + $0x10] ss:$8 sps:$4 sm:$0xff]  }
 0x146   : > { %v962_v11 = vld [vmem:[%s2334_s2] sm:$0x3]  ;;  %v1876_v13 = vld [vmem:[%s2337_s5 + $0x74] ss:$8 sps:$4 sm:$0xff]   ;;  %v1878_v14 = vld [vmem:[%s2337_s5 + $0x70] ss:$8 sps:$4 sm:$0xff]  }
 0x147   : > { %1203 = vmatpush1.bf16.msra.mxu0 %v1833_v62  ;;  %v967_v44 = vrot.slane %v962_v11, %v2139_v6  ;;  %v971_v12 = vrot.slane %v962_v11, %v2142_v7  ;;  %v1849_v15 = vld [vmem:[%s2335_s3 + $0x4] ss:$8 sps:$4 sm:$0xff]   ;;  %1449 = vmatprep.subr.bf16.mxu1 %v1876_v13  ;;  %v961_v18 = vld [vmem:[#allocation2] sm:$0xf]  ;;  %v1882_v21 = vld [vmem:[%s2337_s5 + $0x54] ss:$8 sps:$4 sm:$0xff]  }
 0x148   : > { %1204 = vmatprep.subr.bf16.mxu0 %v1834_v63  ;;  %v1879_v17 = vld [vmem:[%s2337_s5 + $0x64] ss:$8 sps:$4 sm:$0xff]   ;;  %1450 = vmatpush1.bf16.msra.mxu1 %v1878_v14  ;;  %v1881_v19 = vld [vmem:[%s2337_s5 + $0x60] ss:$8 sps:$4 sm:$0xff]   ;;  %v1852_v23 = vld [vmem:[%s2335_s3 + $0xf4] ss:$8 sps:$4 sm:$0xff]  }
 0x149   : > { %v972_v16 = vcombine.low %v967_v44, %v971_v12  ;;  %1451 = vmatprep.subr.bf16.mxu1 %v1879_v17  ;;  %v1851_v22 = vld [vmem:[%s2335_s3] ss:$8 sps:$4 sm:$0xff]   ;;  %v1884_v25 = vld [vmem:[%s2337_s5 + $0x50] ss:$8 sps:$4 sm:$0xff]   ;;  %v1885_v27 = vld [vmem:[%s2337_s5 + $0x44] ss:$8 sps:$4 sm:$0xff]  }
 0x14a   : > { %v1854_v28 = vld [vmem:[%s2335_s3 + $0xf0] ss:$8 sps:$4 sm:$0xff]   ;;  %v1855_v29 = vld [vmem:[%s2335_s3 + $0xe4] ss:$8 sps:$4 sm:$0xff]   ;;  %v1887_v31 = vld [vmem:[%s2337_s5 + $0x40] ss:$8 sps:$4 sm:$0xff]  }
 0x14b   : > { %1205 = vmatpush1.bf16.msra.mxu0 %v1836_v0  ;;  %v979_v20 = vrot.slane %v972_v16, %v2101_v50  ;;  %v1888_v33 = vld [vmem:[%s2337_s5 + $0x34] ss:$8 sps:$4 sm:$0xff]   ;;  %v1857_v34 = vld [vmem:[%s2335_s3 + $0xe0] ss:$8 sps:$4 sm:$0xff]   ;;  %v1890_v37 = vld [vmem:[%s2337_s5 + $0x30] ss:$8 sps:$4 sm:$0xff]  }
 0x14c   : > { %1206 = vmatprep.subr.bf16.mxu0 %v1837_v1  ;;  %1452 = vmatpush1.bf16.msra.mxu1 %v1881_v19  ;;  %v1858_v35 = vld [vmem:[%s2335_s3 + $0xd4] ss:$8 sps:$4 sm:$0xff]   ;;  %v1891_v38 = vld [vmem:[%s2337_s5 + $0x24] ss:$8 sps:$4 sm:$0xff]   ;;  %v1860_v39 = vld [vmem:[%s2335_s3 + $0xd0] ss:$8 sps:$4 sm:$0xff]  }
 0x14d   : > { %v981_v24 = vadd.f32 %v979_v20, %v961_v18  ;;  %1453 = vmatprep.subr.bf16.mxu1 %v1882_v21  ;;  %v1861_v40 = vld [vmem:[%s2335_s3 + $0xc4] ss:$8 sps:$4 sm:$0xff]   ;;  %v1893_v41 = vld [vmem:[%s2337_s5 + $0x20] ss:$8 sps:$4 sm:$0xff]   ;;  %v1894_v42 = vld [vmem:[%s2337_s5 + $0x14] ss:$8 sps:$4 sm:$0xff]  }
 0x14e   : > { %v1863_v43 = vld [vmem:[%s2335_s3 + $0xc0] ss:$8 sps:$4 sm:$0xff]   ;;  %v1864_v45 = vld [vmem:[%s2335_s3 + $0xb4] ss:$8 sps:$4 sm:$0xff]   ;;  %v1896_v46 = vld [vmem:[%s2337_s5 + $0x10] ss:$8 sps:$4 sm:$0xff]  }
 0x14f   : > { %1207 = vmatpush1.bf16.msra.mxu0 %v1839_v2  ;;  %v982_v26 = vmax.f32 %v981_v24, 0.0  ;;  %v1897_v47 = vld [vmem:[%s2337_s5 + $0x4] ss:$8 sps:$4 sm:$0xff]   ;;  %v1866_v48 = vld [vmem:[%s2335_s3 + $0xb0] ss:$8 sps:$4 sm:$0xff]  }
 0x150   : > { %1208 = vmatprep.subr.bf16.mxu0 %v1840_v3  ;;  %1454 = vmatpush1.bf16.msra.mxu1 %v1884_v25  ;;  %v1867_v49 = vld [vmem:[%s2335_s3 + $0xa4] ss:$8 sps:$4 sm:$0xff]   ;;  %v1899_v51 = vld [vmem:[%s2337_s5] ss:$8 sps:$4 sm:$0xff]   ;;  %v1900_v52 = vld [vmem:[%s2337_s5 + $0xf4] ss:$8 sps:$4 sm:$0xff]  }
 0x151   : > { %v2196_v30 = vrot.slane %v982_v26, %v2101_v50  ;;  %1455 = vmatprep.subr.bf16.mxu1 %v1885_v27  ;;  %v1869_v50 = vld [vmem:[%s2335_s3 + $0xa0] ss:$8 sps:$4 sm:$0xff]   ;;  %v1870_v53 = vld [vmem:[%s2335_s3 + $0x94] ss:$8 sps:$4 sm:$0xff]   ;;  %v1902_v54 = vld [vmem:[%s2337_s5 + $0xf0] ss:$8 sps:$4 sm:$0xff]  }
 0x152   : > { %v1903_v55 = vld [vmem:[%s2337_s5 + $0xe4] ss:$8 sps:$4 sm:$0xff]   ;;  %v1872_v56 = vld [vmem:[%s2335_s3 + $0x90] ss:$8 sps:$4 sm:$0xff]   ;;  %v1905_v58 = vld [vmem:[%s2337_s5 + $0xe0] ss:$8 sps:$4 sm:$0xff]  }
 0x153   : > { %1209 = vmatpush1.bf16.msra.mxu0 %v1842_v4  ;;  %v991_v32 = vcombine.high %v2196_v30, %v2196_v30  ;;  %v1873_v57 = vld [vmem:[%s2335_s3 + $0x84] ss:$8 sps:$4 sm:$0xff]   ;;  %v1906_v59 = vld [vmem:[%s2337_s5 + $0xd4] ss:$8 sps:$4 sm:$0xff]   ;;  %v1875_v60 = vld [vmem:[%s2335_s3 + $0x80] ss:$8 sps:$4 sm:$0xff]   ;;  %v994_v62 = vpack.c.bf16 %v2196_v30, %v2196_v30 }
 0x154   : > { %1210 = vmatprep.subr.bf16.mxu0 %v1843_v5  ;;  %1456 = vmatpush1.bf16.msra.mxu1 %v1887_v31  ;;  %v1908_v61 = vld [vmem:[%s2337_s5 + $0xd0] ss:$8 sps:$4 sm:$0xff]   ;;  %v1909_v63 = vld [vmem:[%s2337_s5 + $0xc4] ss:$8 sps:$4 sm:$0xff]   ;;  %v1911_v0 = vld [vmem:[%s2337_s5 + $0xc0] ss:$8 sps:$4 sm:$0xff]  }
 0x155   : > { %v995_v36 = vpack.c.bf16 %v991_v32, %v991_v32  ;;  %1457 = vmatprep.subr.bf16.mxu1 %v1888_v33  ;;  %v1912_v1 = vld [vmem:[%s2337_s5 + $0xb4] ss:$8 sps:$4 sm:$0xff]   ;;  %v1914_v2 = vld [vmem:[%s2337_s5 + $0xb0] ss:$8 sps:$4 sm:$0xff]   ;;  %v1915_v3 = vld [vmem:[%s2337_s5 + $0xa4] ss:$8 sps:$4 sm:$0xff]  }
 0x156   : > { %v1917_v4 = vld [vmem:[%s2337_s5 + $0xa0] ss:$8 sps:$4 sm:$0xff]   ;;  %v1918_v5 = vld [vmem:[%s2337_s5 + $0x94] ss:$8 sps:$4 sm:$0xff]  }
 0x157   : > { %1211 = vmatpush1.bf16.msra.mxu0 %v1845_v8  ;;  %1232 = vmatprep.mubr.bf16.mxu0 %v995_v36  ;;  %v1920_v8 = vld [vmem:[%s2337_s5 + $0x90] ss:$8 sps:$4 sm:$0xff]   ;;  %v1028_v11 = vld [vmem:[%s2336_s4] sm:$0x3] }
 0x158   : > { %1212 = vmatprep.subr.bf16.mxu0 %v1846_v9  ;;  %1458 = vmatpush1.bf16.msra.mxu1 %v1890_v37  ;;  %v1921_v9 = vld [vmem:[%s2337_s5 + $0x84] ss:$8 sps:$4 sm:$0xff]   ;;  %v1033_v44 = vrot.slane %v1028_v11, %v2139_v6  ;;  %v1037_v12 = vrot.slane %v1028_v11, %v2142_v7 }
 0x159   : > { %1459 = vmatprep.subr.bf16.mxu1 %v1891_v38 }
 0x15b   : > { %1213 = vmatpush1.bf16.msra.mxu0 %v1848_v10  ;;  %v1923_v10 = vld [vmem:[%s2337_s5 + $0x80] ss:$8 sps:$4 sm:$0xff]  }
 0x15c   : > { %1214 = vmatprep.subr.bf16.mxu0 %v1849_v15  ;;  %1460 = vmatpush1.bf16.msra.mxu1 %v1893_v41 }
 0x15d   : > { %1461 = vmatprep.subr.bf16.mxu1 %v1894_v42 }
 0x15f   : > { %1215 = vmatpush1.bf16.msra.mxu0 %v1851_v22 }
 0x160   : > { %1216 = vmatprep.subr.bf16.mxu0 %v1852_v23  ;;  %1462 = vmatpush1.bf16.msra.mxu1 %v1896_v46  ;;  %v1277_v23 = vld [vmem:[%s2338_s6] sm:$0x3] }
 0x161   : > { %1463 = vmatprep.subr.bf16.mxu1 %v1897_v47  ;;  %v1282_v24 = vrot.slane %v1277_v23, %v2139_v6  ;;  %v1286_v25 = vrot.slane %v1277_v23, %v2142_v7 }
 0x163   : > { %1217 = vmatpush2.bf16.msra.mxu0 %v1854_v28 }
 0x164   : > { %1218 = vmatprep.subr.bf16.mxu0 %v1855_v29  ;;  %1464 = vmatpush1.bf16.msra.mxu1 %v1899_v51 }
 0x165   : > { %1465 = vmatprep.subr.bf16.mxu1 %v1900_v52 }
 0x167   : > { %1219 = vmatpush2.bf16.msra.mxu0 %v1857_v34 }
 0x168   : > { %1220 = vmatprep.subr.bf16.mxu0 %v1858_v35  ;;  %1466 = vmatpush2.bf16.msra.mxu1 %v1902_v54 }
 0x169   : > { %1467 = vmatprep.subr.bf16.mxu1 %v1903_v55 }
 0x16b   : > { %1221 = vmatpush2.bf16.msra.mxu0 %v1860_v39 }
 0x16c   : > { %1222 = vmatprep.subr.bf16.mxu0 %v1861_v40  ;;  %1468 = vmatpush2.bf16.msra.mxu1 %v1905_v58 }
 0x16d   : > { %1469 = vmatprep.subr.bf16.mxu1 %v1906_v59 }
 0x16f   : > { %1223 = vmatpush2.bf16.msra.mxu0 %v1863_v43 }
 0x170   : > { %1224 = vmatprep.subr.bf16.mxu0 %v1864_v45  ;;  %1470 = vmatpush2.bf16.msra.mxu1 %v1908_v61 }
 0x171   : > { %1471 = vmatprep.subr.bf16.mxu1 %v1909_v63 }
 0x173   : > { %1225 = vmatpush2.bf16.msra.mxu0 %v1866_v48 }
 0x174   : > { %1226 = vmatprep.subr.bf16.mxu0 %v1867_v49  ;;  %1472 = vmatpush2.bf16.msra.mxu1 %v1911_v0 }
 0x175   : > { %1473 = vmatprep.subr.bf16.mxu1 %v1912_v1 }
 0x177   : > { %1227 = vmatpush2.bf16.msra.mxu0 %v1869_v50 }
 0x178   : > { %1228 = vmatprep.subr.bf16.mxu0 %v1870_v53  ;;  %1474 = vmatpush2.bf16.msra.mxu1 %v1914_v2 }
 0x179   : > { %1475 = vmatprep.subr.bf16.mxu1 %v1915_v3 }
 0x17b   : > { %1229 = vmatpush2.bf16.msra.mxu0 %v1872_v56 }
 0x17c   : > { %1230 = vmatprep.subr.bf16.mxu0 %v1873_v57  ;;  %1476 = vmatpush2.bf16.msra.mxu1 %v1917_v4 }
 0x17d   : > { %1477 = vmatprep.subr.bf16.mxu1 %v1918_v5 }
 0x17f   : > { %1231 = vmatpush2.bf16.msra.mxu0 %v1875_v60 }
 0x180   : > { %1478 = vmatpush2.bf16.msra.mxu1 %v1920_v8 }
 0x181   : > { %1479 = vmatprep.subr.bf16.mxu1 %v1921_v9 }
 0x182   : > { %1233 = vmatmul.mubr.bf16.vlgmr.msra.gmra.mxu0 %v994_v62 }
 0x184   : > { %1480 = vmatpush2.bf16.msra.mxu1 %v1923_v10 }
 0x242   : > { %v1234_v13 = vpop.f32.mrf.mxu0 }
 0x243   : > { %v1235_v14 = vadd.f32 %v1234_v13, %v1033_v44 }
 0x244   : > { %v1236_v15 = vpop.f32.mrf.mxu0 }
 0x245   : > { %v1237_v16 = vadd.f32 %v1236_v15, %v1037_v12  ;;  %v1241_v17 = vmax.f32 %v1235_v14, 0.0 }
 0x246   : > { %v1238_v18 = vpop.f32.mrf.mxu0 }
 0x247   : > { %v1242_v19 = vmax.f32 %v1237_v16, 0.0  ;;  %v1243_v22 = vpack.c.bf16 %v1241_v17, %v1241_v17 }
 0x248   : > { %v1239_v20 = vpop.f32.mrf.mxu0 }
 0x249   : > { %v1244_v21 = vpack.c.bf16 %v1242_v19, %v1242_v19 }
 0x24b   : > { %1481 = vmatprep.mubr.bf16.mxu1 %v1244_v21 }
 0x24c   : > { %1482 = vmatmul.mubr.bf16.vlgmr.msra.gmra.mxu1 %v1243_v22 }
 0x30c   : > { %v1483_v26 = vpop.f32.mrf.mxu1 }
 0x30d   : > { %v1484_v28 = vadd.f32 %v1483_v26, %v1282_v24 }
 0x30e   : > { %v1485_v27 = vpop.f32.mrf.mxu1 }
 0x30f   : > { %v1486_v29 = vadd.f32 %v1485_v27, %v1286_v25 }
 0x310   : > { %v1487_v30 = vpop.f32.mrf.mxu1 }
 0x311   : > { %v1492_v31 = vcombine.low %v1484_v28, %v1486_v29 }
 0x312   : > { %v1488_v32 = vpop.f32.mrf.mxu1 }
 0x313   : > { %1691 = vst.sshfl [vmem:[%s2339_s7] sm:$0x33 pattern:$0x76325410] %v1492_v31 }
 0x314 PF: > { %s17_s24 = sadd.s32 1, %s1930_s24  }
 0x315   : > { %p14_p7 = scmp.ge.s32.totalorder %s17_s24, 7  }
 0x317   :  { %16 = sbr.rel (!%p14_p7) target bundleno = 1 (0x1), region = 85 }

</bundles_post_ra>
